<compile_context>
chip_gen: v5e
topology: v5e:2x2
jax: 0.10.0
libtpu: 0.0.40
codegen_flags: <defaults>
</compile_context>

<pallas_src>
import numpy as np
import jax
import jax.numpy as jnp
from jax import lax
from jax.experimental import pallas as pl
from jax.experimental.pallas import tpu as pltpu

# ---- static model config: EEGNet(input_size=(4, 64), sampling_rate=64,
#      n_classes=4, F1=8, D=2, F2=16, pool_mode='mean') ----
N      = 2                   # batch
C_EEG  = 4                   # EEG channels  (input_size[0])
T      = 64                  # time samples  (input_size[1])
SR     = 64                  # sampling rate
F1, D, F2 = 8, 2, 16
NCLS   = 4
K1     = SR // 2             # 32  block1 temporal kernel
PAD1   = K1 // 2             # 16
P1     = SR // 32            # 2   block1 pooling
K2     = 16                  # block2 temporal kernel
PAD2   = K2 // 2             # 8
P2     = 8                   # block2 pooling
CH     = F1 * D              # 16
T1     = T + 2 * PAD1 - K1 + 1     # 65
TP1    = T1 // P1                  # 32
T2     = TP1 + 2 * PAD2 - K2 + 1   # 33
TP2    = T2 // P2                  # 4   ('auto' final_conv_length)
FEAT   = F2 * TP2            # 64
NCH    = N * CH              # 32
NF2    = N * F2              # 32
BN_EPS = 1e-3
TBLK   = 128                 # lane width used for all time-axis tiles / aligned blocks

HI = jax.lax.Precision.HIGHEST

# ---- packed parameter slab layout (all row offsets are multiples of 8) ----
ROW_PM1    = 0                      # (128, 128) pool1 matrix, PAD2 zero cols folded in
ROW_W2     = ROW_PM1 + TBLK         # (K2*NCH=512, 128) per-tap depthwise weight planes
ROW_MSTACK = ROW_W2 + K2 * NCH      # (32, 64)  spatial depthwise mix, BN1/BN2 folded
ROW_WPW    = ROW_MSTACK + NCH       # (32, 32)  pointwise conv block-diag, BN3 folded
ROW_PM2    = ROW_WPW + NF2          # (128, 4)  pool2 matrix
ROW_WQ     = ROW_PM2 + TBLK         # (TP2*NF2=128, 4) classifier per-q weight planes
ROW_GSEL   = ROW_WQ + TP2 * NF2     # (2, 32)   per-batch group-sum selector
ROW_B2     = ROW_GSEL + 8           # (32, 1)   block1 folded bias
ROW_B3     = ROW_B2 + NCH           # (32, 1)   block2 folded bias
ROW_BC     = ROW_B3 + NF2           # (1, 4)    classifier bias
P_ROWS     = ROW_BC + 8             # 1040


def _elu(x):
    return jnp.where(x > 0, x, jnp.exp(jnp.minimum(x, 0.0)) - 1.0)


# =============================================================================
# Pallas kernel (single invocation, whole network resident in VMEM, ~1 MB)
# =============================================================================
def eegnet_kernel(x_ref, w1toe_ref, p_ref, o_ref):
    # ---- block1 temporal conv (1 x K1), 1 -> F1, PAD1 folded into the Toeplitz weight ----
    # x_ref: (N*C_EEG=8, T=64); w1toe: (64, F1*128), 128-lane block per filter f.
    y1 = jnp.dot(x_ref[...], w1toe_ref[...],
                 preferred_element_type=jnp.float32, precision=HI)          # (8, 1024)

    # restack the F1 lane-blocks onto sublanes (vreg-aligned slices -> cheap relayout)
    y1s = jnp.concatenate([y1[:, f * TBLK:(f + 1) * TBLK] for f in range(F1)],
                          axis=0)                                           # (64, 128)

    # ---- block1 depthwise spatial conv (BN1/BN2 folded) + ELU ----
    mstack = p_ref[pl.ds(ROW_MSTACK, NCH), pl.ds(0, F1 * N * C_EEG)]        # (32, 64)
    b2col  = p_ref[pl.ds(ROW_B2, NCH), pl.ds(0, 1)]                         # (32, 1)
    a1 = _elu(jnp.dot(mstack, y1s,
                      preferred_element_type=jnp.float32, precision=HI) + b2col)  # (32,128)

    # ---- block1 mean-pool (1, P1) with block2 zero-padding folded into pm1 ----
    # yp[:, PAD2+m] = mean(a1[:, 2m], a1[:, 2m+1]); cols [0,8) and [40,128) are 0.
    pm1 = p_ref[pl.ds(ROW_PM1, TBLK), :]                                    # (128, 128)
    yp = jnp.dot(a1, pm1, preferred_element_type=jnp.float32, precision=HI) # (32, 128)

    # ---- block2 depthwise temporal conv: 16 taps = XLU roll + VPU mul against
    #      host-pre-broadcast weight planes, 4 independent accumulator chains ----
    accs = [None, None, None, None]
    for k in range(K2):
        wk = p_ref[pl.ds(ROW_W2 + k * NCH, NCH), :]                         # (32, 128)
        yk = yp if k == 0 else pltpu.roll(yp, shift=TBLK - k, axis=1)       # yk[:,j]=yp[:,j+k]
        term = wk * yk
        s = k % 4
        accs[s] = term if accs[s] is None else accs[s] + term
    acc2 = (accs[0] + accs[1]) + (accs[2] + accs[3])                        # (32,128); cols>=T2 are 0

    # ---- block2 pointwise 1x1 conv CH->F2 (block-diag over batch, BN3 folded) + ELU ----
    wpw   = p_ref[pl.ds(ROW_WPW, NF2), pl.ds(0, NCH)]                       # (32, 32)
    b3col = p_ref[pl.ds(ROW_B3, NF2), pl.ds(0, 1)]                          # (32, 1)
    a2 = _elu(jnp.dot(wpw, acc2,
                      preferred_element_type=jnp.float32, precision=HI) + b3col)  # (32,128)

    # ---- block2 mean-pool (1, P2) ----
    pm2 = p_ref[pl.ds(ROW_PM2, TBLK), pl.ds(0, TP2)]                        # (128, 4)
    p2 = jnp.dot(a2, pm2, preferred_element_type=jnp.float32, precision=HI) # (32, 4)

    # ---- flatten + Linear: TP2-tap FMA against per-q (NF2, NCLS) planes, then
    #      per-batch group row-sum via one tiny matmul (no cross-lane reductions) ----
    r = None
    for q in range(TP2):
        wq = p_ref[pl.ds(ROW_WQ + q * NF2, NF2), pl.ds(0, NCLS)]            # (32, 4)
        t = p2[:, q:q + 1] * wq
        r = t if r is None else r + t                                       # (32, 4)
    gsel = p_ref[pl.ds(ROW_GSEL, N), pl.ds(0, NF2)]                         # (2, 32)
    bc   = p_ref[pl.ds(ROW_BC, 1), pl.ds(0, NCLS)]                          # (1, 4)
    logits = jnp.dot(gsel, r, preferred_element_type=jnp.float32,
                     precision=HI) + bc                                     # (2, 4)

    # ---- LogSoftmax ----
    m = jnp.max(logits, axis=1, keepdims=True)
    zl = logits - m
    lse = jnp.log(jnp.sum(jnp.exp(zl), axis=1, keepdims=True))
    o_ref[...] = zl - lse


# =============================================================================
# Host-side parameter preparation (weight reshaping / BN folding only — no data work)
# =============================================================================
def build_kernel_params(w1_4, wdw_4, w2d_4, wpw_4, s1, b1, s2, b2, s3, b3, wc, bc):
    w1  = w1_4[:, 0, 0, :]     # (F1, K1)
    wdw = wdw_4[:, 0, :, 0]    # (CH, C_EEG)
    w2d = w2d_4[:, 0, 0, :]    # (CH, K2)
    wpw = wpw_4[:, :, 0, 0]    # (F2, CH)

    # Toeplitz temporal-conv weight over the UNPADDED time axis (PAD1 folded in),
    # one 128-lane block per filter: w1toe[t, f*128+j] = w1[f, t - j + PAD1].
    t_idx = jnp.arange(T)[:, None]
    j_idx = jnp.arange(TBLK)[None, :]
    k_rel = t_idx - j_idx + PAD1
    valid = (k_rel >= 0) & (k_rel < K1) & (j_idx < T1)
    kc = jnp.clip(k_rel, 0, K1 - 1)
    w1toe = jnp.where(valid[None], w1[:, kc], 0.0)                           # (F1, 64, 128)
    w1toe = jnp.transpose(w1toe, (1, 0, 2)).reshape(T, F1 * TBLK)            # (64, 1024)

    # spatial depthwise mixing matrix with BN1/BN2 scales folded in
    s1c = s1[jnp.arange(CH) // D]
    coef = (s2 * s1c)[:, None] * wdw                                         # (CH, C_EEG)
    self_f = (jnp.arange(CH)[:, None] // D ==
              jnp.arange(F1)[None, :]).astype(jnp.float32)                   # (CH, F1)
    eyeN = jnp.eye(N, dtype=jnp.float32)
    m5 = (eyeN[:, None, None, :, None] * self_f[None, :, :, None, None]
          * coef[None, :, None, None, :])                                    # (N,CH,F1,N,C_EEG)
    mstack = m5.reshape(NCH, F1 * N * C_EEG)                                 # (32, 64)

    # BN1 shift pushed through the spatial conv + BN2 shift
    b2c = s2 * (b1[jnp.arange(CH) // D] * jnp.sum(wdw, axis=1)) + b2
    b2col = jnp.tile(b2c, (N,)).reshape(NCH, 1)

    # pool-1 matrix with block2 zero-padding folded in: (a1 time t) -> (yp col PAD2+m)
    tt = jnp.arange(TBLK)[:, None]
    jj = jnp.arange(TBLK)[None, :]
    mm = jj - PAD2
    pm1 = jnp.where((mm >= 0) & (mm < TP1) & (tt // P1 == mm) & (tt < TP1 * P1),
                    1.0 / P1, 0.0)                                           # (128, 128)

    # block2 depthwise weights: per-tap planes pre-broadcast along lanes (zero past T2)
    w2full = jnp.tile(w2d, (N, 1))                                           # (NCH, K2)
    lane_ok = (jnp.arange(TBLK) < T2).astype(jnp.float32)
    w2rows = (w2full.T[:, :, None] * lane_ok[None, None, :]
              ).reshape(K2 * NCH, TBLK)                                      # (512, 128)

    # block2 pointwise conv as block-diagonal matrix with BN3 scale folded
    wpwblk = jnp.kron(eyeN, s3[:, None] * wpw)                               # (NF2, NCH)
    b3col = jnp.tile(b3, (N,)).reshape(NF2, 1)

    # pool-2 matrix
    qq = jnp.arange(TP2)[None, :]
    pm2 = jnp.where((tt < TP2 * P2) & (tt // P2 == qq), 1.0 / P2, 0.0)       # (128, 4)

    # classifier: per-q weight planes wq[q, n*F2+g, c] = wc[c, g*TP2+q]; group selector; bias
    wc3 = wc.reshape(NCLS, F2, TP2)
    wq = jnp.transpose(wc3, (2, 1, 0))                                       # (TP2, F2, NCLS)
    wqrows = jnp.tile(wq[:, None, :, :], (1, N, 1, 1)).reshape(TP2 * NF2, NCLS)
    gsel = jnp.kron(eyeN, jnp.ones((1, F2), jnp.float32))                    # (N, NF2)
    bc2 = bc.reshape(1, NCLS)

    # ---- pack everything small into one (P_ROWS, 128) VMEM slab (3 input DMAs total) ----
    slab = jnp.zeros((P_ROWS, TBLK), jnp.float32)

    def put(s, row, blk):
        blk = blk.astype(jnp.float32)
        return s.at[row:row + blk.shape[0], :blk.shape[1]].set(blk)

    slab = put(slab, ROW_PM1, pm1)
    slab = put(slab, ROW_W2, w2rows)
    slab = put(slab, ROW_MSTACK, mstack)
    slab = put(slab, ROW_WPW, wpwblk)
    slab = put(slab, ROW_PM2, pm2)
    slab = put(slab, ROW_WQ, wqrows)
    slab = put(slab, ROW_GSEL, gsel)
    slab = put(slab, ROW_B2, b2col)
    slab = put(slab, ROW_B3, b3col)
    slab = put(slab, ROW_BC, bc2)

    return w1toe, slab


def eegnet_pallas(x, params):
    w1toe, pslab = params
    x2 = x[:, 0].reshape(N * C_EEG, T)                                       # rows n*C_EEG + c

    vmem = lambda: pl.BlockSpec(memory_space=pltpu.MemorySpace.VMEM)
    return pl.pallas_call(
        eegnet_kernel,
        out_shape=jax.ShapeDtypeStruct((N, NCLS), jnp.float32),
        in_specs=[vmem(), vmem(), vmem()],
        out_specs=pl.BlockSpec(memory_space=pltpu.MemorySpace.VMEM),
    )(x2, w1toe, pslab)


# =============================================================================
# Pure-JAX reference (NCHW, lax.conv) used only to validate the kernel output
# =============================================================================
def _avgpool_time(x, p):
    w = x.shape[-1]
    wc = (w // p) * p
    return x[..., :wc].reshape(x.shape[:-1] + (w // p, p)).mean(axis=-1)


def reference_forward(x, w1_4, wdw_4, w2d_4, wpw_4, s1, b1, s2, b2, s3, b3, wc, bc):
    dn = ('NCHW', 'OIHW', 'NCHW')
    out = lax.conv_general_dilated(x, w1_4, (1, 1), [(0, 0), (PAD1, PAD1)],
                                   dimension_numbers=dn, precision=HI)
    out = out * s1.reshape(1, -1, 1, 1) + b1.reshape(1, -1, 1, 1)
    out = lax.conv_general_dilated(out, wdw_4, (1, 1), [(0, 0), (0, 0)],
                                   feature_group_count=F1, dimension_numbers=dn,
                                   precision=HI)
    out = out * s2.reshape(1, -1, 1, 1) + b2.reshape(1, -1, 1, 1)
    out = jax.nn.elu(out)
    out = _avgpool_time(out, P1)
    out = lax.conv_general_dilated(out, w2d_4, (1, 1), [(0, 0), (PAD2, PAD2)],
                                   feature_group_count=CH, dimension_numbers=dn,
                                   precision=HI)
    out = lax.conv_general_dilated(out, wpw_4, (1, 1), [(0, 0), (0, 0)],
                                   dimension_numbers=dn, precision=HI)
    out = out * s3.reshape(1, -1, 1, 1) + b3.reshape(1, -1, 1, 1)
    out = jax.nn.elu(out)
    out = _avgpool_time(out, P2)
    feat = out.reshape(N, -1)
    logits = jnp.dot(feat, wc.T, precision=HI) + bc
    return jax.nn.log_softmax(logits, axis=1)


def _fold_bn(gamma, beta, mean, var, eps=BN_EPS):
    scale = gamma / jnp.sqrt(var + eps)
    return scale, beta - mean * scale


def _bn_params(key, ch):
    k1, k2, k3, k4 = jax.random.split(key, 4)
    gamma = 1.0 + 0.1 * jax.random.normal(k1, (ch,), jnp.float32)
    beta = 0.1 * jax.random.normal(k2, (ch,), jnp.float32)
    mean = 0.1 * jax.random.normal(k3, (ch,), jnp.float32)
    var = 1.0 + 0.2 * jax.random.uniform(k4, (ch,), jnp.float32)
    return _fold_bn(gamma, beta, mean, var)


if __name__ == "__main__":
    key = jax.random.PRNGKey(0)
    ks = jax.random.split(key, 12)

    x = jax.random.normal(ks[0], (N, 1, C_EEG, T), jnp.float32)

    # conv weights (torch layouts), deterministic init
    w1_4  = 0.3 * jax.random.normal(ks[1], (F1, 1, 1, K1), jnp.float32)
    wdw_4 = 0.5 * jax.random.normal(ks[2], (CH, 1, C_EEG, 1), jnp.float32)
    w2d_4 = 0.3 * jax.random.normal(ks[3], (CH, 1, 1, K2), jnp.float32)
    wpw_4 = 0.3 * jax.random.normal(ks[4], (F2, CH, 1, 1), jnp.float32)
    wc    = 0.3 * jax.random.normal(ks[5], (NCLS, FEAT), jnp.float32)
    bc    = 0.1 * jax.random.normal(ks[6], (NCLS,), jnp.float32)

    # Conv2dWithConstraint: renorm each output-channel filter to L2 norm <= 1
    norms = jnp.sqrt(jnp.sum(wdw_4 ** 2, axis=(1, 2, 3)))
    factor = jnp.where(norms > 1.0, 1.0 / (norms + 1e-7), 1.0)
    wdw_4 = wdw_4 * factor[:, None, None, None]

    # BatchNorm (inference) folded to per-channel scale/shift
    s1, b1 = _bn_params(ks[7], F1)
    s2, b2 = _bn_params(ks[8], CH)
    s3, b3 = _bn_params(ks[9], F2)

    params = build_kernel_params(w1_4, wdw_4, w2d_4, wpw_4,
                                 s1, b1, s2, b2, s3, b3, wc, bc)

    y = eegnet_pallas(x, params)
    y = jax.block_until_ready(y)

    y_ref = reference_forward(x, w1_4, wdw_4, w2d_4, wpw_4,
                              s1, b1, s2, b2, s3, b3, wc, bc)
    y_ref = jax.block_until_ready(y_ref)

    assert y.shape == (N, NCLS)
    assert np.allclose(np.asarray(y), np.asarray(y_ref), atol=1e-3, rtol=1e-3), (
        "mismatch", np.max(np.abs(np.asarray(y) - np.asarray(y_ref))))
    print("KERNEL_OK")
</pallas_src>

<mosaic_0001>
module attributes {stable_mosaic.version = 11 : i64} {
  func.func @eegnet_kernel(%arg0: memref<8x64xf32, #tpu.memory_space<vmem>>, %arg1: memref<64x1024xf32, #tpu.memory_space<vmem>>, %arg2: memref<1040x128xf32, #tpu.memory_space<vmem>>, %arg3: memref<2x4xf32, #tpu.memory_space<vmem>>) attributes {dimension_semantics = [], scalar_prefetch = 0 : i64, scratch_operands = 0 : i64, tpu.core_type = #tpu.core_type<tc>} {
    %c0 = arith.constant 0 : index
    %c0_0 = arith.constant 0 : index
    %0 = vector.load %arg0[%c0, %c0_0] : memref<8x64xf32, #tpu.memory_space<vmem>>, vector<8x64xf32>
    %c0_1 = arith.constant 0 : index
    %c0_2 = arith.constant 0 : index
    %1 = vector.load %arg1[%c0_1, %c0_2] : memref<64x1024xf32, #tpu.memory_space<vmem>>, vector<64x1024xf32>
    %cst = arith.constant dense<0.000000e+00> : vector<8x1024xf32>
    %2 = tpu.matmul %0, %1, %cst {dimension_numbers = #tpu.dot_dimension_numbers<[1], [0], [0], [1], [0, 0, 1, 1], [], []>, precision = #tpu.contract_precision<fp32>} : vector<8x64xf32>, vector<64x1024xf32>, vector<8x1024xf32> -> vector<8x1024xf32>
    %3 = vector.extract_strided_slice %2 {offsets = [0, 0], sizes = [8, 128], strides = [1, 1]} : vector<8x1024xf32> to vector<8x128xf32>
    %4 = vector.extract_strided_slice %2 {offsets = [0, 128], sizes = [8, 128], strides = [1, 1]} : vector<8x1024xf32> to vector<8x128xf32>
    %5 = vector.extract_strided_slice %2 {offsets = [0, 256], sizes = [8, 128], strides = [1, 1]} : vector<8x1024xf32> to vector<8x128xf32>
    %6 = vector.extract_strided_slice %2 {offsets = [0, 384], sizes = [8, 128], strides = [1, 1]} : vector<8x1024xf32> to vector<8x128xf32>
    %7 = vector.extract_strided_slice %2 {offsets = [0, 512], sizes = [8, 128], strides = [1, 1]} : vector<8x1024xf32> to vector<8x128xf32>
    %8 = vector.extract_strided_slice %2 {offsets = [0, 640], sizes = [8, 128], strides = [1, 1]} : vector<8x1024xf32> to vector<8x128xf32>
    %9 = vector.extract_strided_slice %2 {offsets = [0, 768], sizes = [8, 128], strides = [1, 1]} : vector<8x1024xf32> to vector<8x128xf32>
    %10 = vector.extract_strided_slice %2 {offsets = [0, 896], sizes = [8, 128], strides = [1, 1]} : vector<8x1024xf32> to vector<8x128xf32>
    %11 = tpu.concatenate %3, %4, %5, %6, %7, %8, %9, %10 in 0 : vector<8x128xf32>, vector<8x128xf32>, vector<8x128xf32>, vector<8x128xf32>, vector<8x128xf32>, vector<8x128xf32>, vector<8x128xf32>, vector<8x128xf32> -> vector<64x128xf32>
    %c640 = arith.constant 640 : index
    %c0_3 = arith.constant 0 : index
    %12 = vector.load %arg2[%c640, %c0_3] : memref<1040x128xf32, #tpu.memory_space<vmem>>, vector<32x64xf32>
    %c968 = arith.constant 968 : index
    %c0_4 = arith.constant 0 : index
    %13 = vector.load %arg2[%c968, %c0_4] : memref<1040x128xf32, #tpu.memory_space<vmem>>, vector<32x1xf32>
    %cst_5 = arith.constant dense<0.000000e+00> : vector<32x128xf32>
    %14 = tpu.matmul %12, %11, %cst_5 {dimension_numbers = #tpu.dot_dimension_numbers<[1], [0], [0], [1], [0, 0, 1, 1], [], []>, precision = #tpu.contract_precision<fp32>} : vector<32x64xf32>, vector<64x128xf32>, vector<32x128xf32> -> vector<32x128xf32>
    %15 = vector.broadcast %13 : vector<32x1xf32> to vector<32x128xf32>
    %16 = arith.addf %14, %15 : vector<32x128xf32>
    %cst_6 = arith.constant 0.000000e+00 : f32
    %17 = vector.broadcast %cst_6 : f32 to vector<32x128xf32>
    %18 = arith.cmpf ogt, %16, %17 : vector<32x128xf32>
    %cst_7 = arith.constant 0.000000e+00 : f32
    %19 = vector.broadcast %cst_7 : f32 to vector<32x128xf32>
    %20 = arith.minimumf %16, %19 : vector<32x128xf32>
    %21 = math.exp %20 : vector<32x128xf32>
    %cst_8 = arith.constant 1.000000e+00 : f32
    %22 = vector.broadcast %cst_8 : f32 to vector<32x128xf32>
    %23 = arith.subf %21, %22 : vector<32x128xf32>
    %24 = arith.select %18, %16, %23 : vector<32x128xi1>, vector<32x128xf32>
    %c0_9 = arith.constant 0 : index
    %c0_10 = arith.constant 0 : index
    %25 = vector.load %arg2[%c0_9, %c0_10] : memref<1040x128xf32, #tpu.memory_space<vmem>>, vector<128x128xf32>
    %cst_11 = arith.constant dense<0.000000e+00> : vector<32x128xf32>
    %26 = tpu.matmul %24, %25, %cst_11 {dimension_numbers = #tpu.dot_dimension_numbers<[1], [0], [0], [1], [0, 0, 1, 1], [], []>, precision = #tpu.contract_precision<fp32>} : vector<32x128xf32>, vector<128x128xf32>, vector<32x128xf32> -> vector<32x128xf32>
    %c128 = arith.constant 128 : index
    %c0_12 = arith.constant 0 : index
    %27 = vector.load %arg2[%c128, %c0_12] : memref<1040x128xf32, #tpu.memory_space<vmem>>, vector<32x128xf32>
    %28 = arith.mulf %27, %26 : vector<32x128xf32>
    %c160 = arith.constant 160 : index
    %c0_13 = arith.constant 0 : index
    %29 = vector.load %arg2[%c160, %c0_13] : memref<1040x128xf32, #tpu.memory_space<vmem>>, vector<32x128xf32>
    %c127_i32 = arith.constant 127 : i32
    %30 = tpu.dynamic_rotate %26 by %c127_i32 dim 1 : vector<32x128xf32>, i32 -> vector<32x128xf32>
    %31 = arith.mulf %29, %30 : vector<32x128xf32>
    %c192 = arith.constant 192 : index
    %c0_14 = arith.constant 0 : index
    %32 = vector.load %arg2[%c192, %c0_14] : memref<1040x128xf32, #tpu.memory_space<vmem>>, vector<32x128xf32>
    %c126_i32 = arith.constant 126 : i32
    %33 = tpu.dynamic_rotate %26 by %c126_i32 dim 1 : vector<32x128xf32>, i32 -> vector<32x128xf32>
    %34 = arith.mulf %32, %33 : vector<32x128xf32>
    %c224 = arith.constant 224 : index
    %c0_15 = arith.constant 0 : index
    %35 = vector.load %arg2[%c224, %c0_15] : memref<1040x128xf32, #tpu.memory_space<vmem>>, vector<32x128xf32>
    %c125_i32 = arith.constant 125 : i32
    %36 = tpu.dynamic_rotate %26 by %c125_i32 dim 1 : vector<32x128xf32>, i32 -> vector<32x128xf32>
    %37 = arith.mulf %35, %36 : vector<32x128xf32>
    %c256 = arith.constant 256 : index
    %c0_16 = arith.constant 0 : index
    %38 = vector.load %arg2[%c256, %c0_16] : memref<1040x128xf32, #tpu.memory_space<vmem>>, vector<32x128xf32>
    %c124_i32 = arith.constant 124 : i32
    %39 = tpu.dynamic_rotate %26 by %c124_i32 dim 1 : vector<32x128xf32>, i32 -> vector<32x128xf32>
    %40 = arith.mulf %38, %39 : vector<32x128xf32>
    %41 = arith.addf %28, %40 : vector<32x128xf32>
    %c288 = arith.constant 288 : index
    %c0_17 = arith.constant 0 : index
    %42 = vector.load %arg2[%c288, %c0_17] : memref<1040x128xf32, #tpu.memory_space<vmem>>, vector<32x128xf32>
    %c123_i32 = arith.constant 123 : i32
    %43 = tpu.dynamic_rotate %26 by %c123_i32 dim 1 : vector<32x128xf32>, i32 -> vector<32x128xf32>
    %44 = arith.mulf %42, %43 : vector<32x128xf32>
    %45 = arith.addf %31, %44 : vector<32x128xf32>
    %c320 = arith.constant 320 : index
    %c0_18 = arith.constant 0 : index
    %46 = vector.load %arg2[%c320, %c0_18] : memref<1040x128xf32, #tpu.memory_space<vmem>>, vector<32x128xf32>
    %c122_i32 = arith.constant 122 : i32
    %47 = tpu.dynamic_rotate %26 by %c122_i32 dim 1 : vector<32x128xf32>, i32 -> vector<32x128xf32>
    %48 = arith.mulf %46, %47 : vector<32x128xf32>
    %49 = arith.addf %34, %48 : vector<32x128xf32>
    %c352 = arith.constant 352 : index
    %c0_19 = arith.constant 0 : index
    %50 = vector.load %arg2[%c352, %c0_19] : memref<1040x128xf32, #tpu.memory_space<vmem>>, vector<32x128xf32>
    %c121_i32 = arith.constant 121 : i32
    %51 = tpu.dynamic_rotate %26 by %c121_i32 dim 1 : vector<32x128xf32>, i32 -> vector<32x128xf32>
    %52 = arith.mulf %50, %51 : vector<32x128xf32>
    %53 = arith.addf %37, %52 : vector<32x128xf32>
    %c384 = arith.constant 384 : index
    %c0_20 = arith.constant 0 : index
    %54 = vector.load %arg2[%c384, %c0_20] : memref<1040x128xf32, #tpu.memory_space<vmem>>, vector<32x128xf32>
    %c120_i32 = arith.constant 120 : i32
    %55 = tpu.dynamic_rotate %26 by %c120_i32 dim 1 : vector<32x128xf32>, i32 -> vector<32x128xf32>
    %56 = arith.mulf %54, %55 : vector<32x128xf32>
    %57 = arith.addf %41, %56 : vector<32x128xf32>
    %c416 = arith.constant 416 : index
    %c0_21 = arith.constant 0 : index
    %58 = vector.load %arg2[%c416, %c0_21] : memref<1040x128xf32, #tpu.memory_space<vmem>>, vector<32x128xf32>
    %c119_i32 = arith.constant 119 : i32
    %59 = tpu.dynamic_rotate %26 by %c119_i32 dim 1 : vector<32x128xf32>, i32 -> vector<32x128xf32>
    %60 = arith.mulf %58, %59 : vector<32x128xf32>
    %61 = arith.addf %45, %60 : vector<32x128xf32>
    %c448 = arith.constant 448 : index
    %c0_22 = arith.constant 0 : index
    %62 = vector.load %arg2[%c448, %c0_22] : memref<1040x128xf32, #tpu.memory_space<vmem>>, vector<32x128xf32>
    %c118_i32 = arith.constant 118 : i32
    %63 = tpu.dynamic_rotate %26 by %c118_i32 dim 1 : vector<32x128xf32>, i32 -> vector<32x128xf32>
    %64 = arith.mulf %62, %63 : vector<32x128xf32>
    %65 = arith.addf %49, %64 : vector<32x128xf32>
    %c480 = arith.constant 480 : index
    %c0_23 = arith.constant 0 : index
    %66 = vector.load %arg2[%c480, %c0_23] : memref<1040x128xf32, #tpu.memory_space<vmem>>, vector<32x128xf32>
    %c117_i32 = arith.constant 117 : i32
    %67 = tpu.dynamic_rotate %26 by %c117_i32 dim 1 : vector<32x128xf32>, i32 -> vector<32x128xf32>
    %68 = arith.mulf %66, %67 : vector<32x128xf32>
    %69 = arith.addf %53, %68 : vector<32x128xf32>
    %c512 = arith.constant 512 : index
    %c0_24 = arith.constant 0 : index
    %70 = vector.load %arg2[%c512, %c0_24] : memref<1040x128xf32, #tpu.memory_space<vmem>>, vector<32x128xf32>
    %c116_i32 = arith.constant 116 : i32
    %71 = tpu.dynamic_rotate %26 by %c116_i32 dim 1 : vector<32x128xf32>, i32 -> vector<32x128xf32>
    %72 = arith.mulf %70, %71 : vector<32x128xf32>
    %73 = arith.addf %57, %72 : vector<32x128xf32>
    %c544 = arith.constant 544 : index
    %c0_25 = arith.constant 0 : index
    %74 = vector.load %arg2[%c544, %c0_25] : memref<1040x128xf32, #tpu.memory_space<vmem>>, vector<32x128xf32>
    %c115_i32 = arith.constant 115 : i32
    %75 = tpu.dynamic_rotate %26 by %c115_i32 dim 1 : vector<32x128xf32>, i32 -> vector<32x128xf32>
    %76 = arith.mulf %74, %75 : vector<32x128xf32>
    %77 = arith.addf %61, %76 : vector<32x128xf32>
    %c576 = arith.constant 576 : index
    %c0_26 = arith.constant 0 : index
    %78 = vector.load %arg2[%c576, %c0_26] : memref<1040x128xf32, #tpu.memory_space<vmem>>, vector<32x128xf32>
    %c114_i32 = arith.constant 114 : i32
    %79 = tpu.dynamic_rotate %26 by %c114_i32 dim 1 : vector<32x128xf32>, i32 -> vector<32x128xf32>
    %80 = arith.mulf %78, %79 : vector<32x128xf32>
    %81 = arith.addf %65, %80 : vector<32x128xf32>
    %c608 = arith.constant 608 : index
    %c0_27 = arith.constant 0 : index
    %82 = vector.load %arg2[%c608, %c0_27] : memref<1040x128xf32, #tpu.memory_space<vmem>>, vector<32x128xf32>
    %c113_i32 = arith.constant 113 : i32
    %83 = tpu.dynamic_rotate %26 by %c113_i32 dim 1 : vector<32x128xf32>, i32 -> vector<32x128xf32>
    %84 = arith.mulf %82, %83 : vector<32x128xf32>
    %85 = arith.addf %69, %84 : vector<32x128xf32>
    %86 = arith.addf %73, %77 : vector<32x128xf32>
    %87 = arith.addf %81, %85 : vector<32x128xf32>
    %88 = arith.addf %86, %87 : vector<32x128xf32>
    %c672 = arith.constant 672 : index
    %c0_28 = arith.constant 0 : index
    %89 = vector.load %arg2[%c672, %c0_28] : memref<1040x128xf32, #tpu.memory_space<vmem>>, vector<32x32xf32>
    %c1000 = arith.constant 1000 : index
    %c0_29 = arith.constant 0 : index
    %90 = vector.load %arg2[%c1000, %c0_29] : memref<1040x128xf32, #tpu.memory_space<vmem>>, vector<32x1xf32>
    %cst_30 = arith.constant dense<0.000000e+00> : vector<32x128xf32>
    %91 = tpu.matmul %89, %88, %cst_30 {dimension_numbers = #tpu.dot_dimension_numbers<[1], [0], [0], [1], [0, 0, 1, 1], [], []>, precision = #tpu.contract_precision<fp32>} : vector<32x32xf32>, vector<32x128xf32>, vector<32x128xf32> -> vector<32x128xf32>
    %92 = vector.broadcast %90 : vector<32x1xf32> to vector<32x128xf32>
    %93 = arith.addf %91, %92 : vector<32x128xf32>
    %cst_31 = arith.constant 0.000000e+00 : f32
    %94 = vector.broadcast %cst_31 : f32 to vector<32x128xf32>
    %95 = arith.cmpf ogt, %93, %94 : vector<32x128xf32>
    %cst_32 = arith.constant 0.000000e+00 : f32
    %96 = vector.broadcast %cst_32 : f32 to vector<32x128xf32>
    %97 = arith.minimumf %93, %96 : vector<32x128xf32>
    %98 = math.exp %97 : vector<32x128xf32>
    %cst_33 = arith.constant 1.000000e+00 : f32
    %99 = vector.broadcast %cst_33 : f32 to vector<32x128xf32>
    %100 = arith.subf %98, %99 : vector<32x128xf32>
    %101 = arith.select %95, %93, %100 : vector<32x128xi1>, vector<32x128xf32>
    %c704 = arith.constant 704 : index
    %c0_34 = arith.constant 0 : index
    %102 = vector.load %arg2[%c704, %c0_34] : memref<1040x128xf32, #tpu.memory_space<vmem>>, vector<128x4xf32>
    %cst_35 = arith.constant dense<0.000000e+00> : vector<32x4xf32>
    %103 = tpu.matmul %101, %102, %cst_35 {dimension_numbers = #tpu.dot_dimension_numbers<[1], [0], [0], [1], [0, 0, 1, 1], [], []>, precision = #tpu.contract_precision<fp32>} : vector<32x128xf32>, vector<128x4xf32>, vector<32x4xf32> -> vector<32x4xf32>
    %c832 = arith.constant 832 : index
    %c0_36 = arith.constant 0 : index
    %104 = vector.load %arg2[%c832, %c0_36] : memref<1040x128xf32, #tpu.memory_space<vmem>>, vector<32x4xf32>
    %105 = vector.extract_strided_slice %103 {offsets = [0, 0], sizes = [32, 1], strides = [1, 1]} : vector<32x4xf32> to vector<32x1xf32>
    %106 = vector.broadcast %105 : vector<32x1xf32> to vector<32x4xf32>
    %107 = arith.mulf %106, %104 : vector<32x4xf32>
    %c864 = arith.constant 864 : index
    %c0_37 = arith.constant 0 : index
    %108 = vector.load %arg2[%c864, %c0_37] : memref<1040x128xf32, #tpu.memory_space<vmem>>, vector<32x4xf32>
    %109 = vector.extract_strided_slice %103 {offsets = [0, 1], sizes = [32, 1], strides = [1, 1]} : vector<32x4xf32> to vector<32x1xf32>
    %110 = vector.broadcast %109 : vector<32x1xf32> to vector<32x4xf32>
    %111 = arith.mulf %110, %108 : vector<32x4xf32>
    %112 = arith.addf %107, %111 : vector<32x4xf32>
    %c896 = arith.constant 896 : index
    %c0_38 = arith.constant 0 : index
    %113 = vector.load %arg2[%c896, %c0_38] : memref<1040x128xf32, #tpu.memory_space<vmem>>, vector<32x4xf32>
    %114 = vector.extract_strided_slice %103 {offsets = [0, 2], sizes = [32, 1], strides = [1, 1]} : vector<32x4xf32> to vector<32x1xf32>
    %115 = vector.broadcast %114 : vector<32x1xf32> to vector<32x4xf32>
    %116 = arith.mulf %115, %113 : vector<32x4xf32>
    %117 = arith.addf %112, %116 : vector<32x4xf32>
    %c928 = arith.constant 928 : index
    %c0_39 = arith.constant 0 : index
    %118 = vector.load %arg2[%c928, %c0_39] : memref<1040x128xf32, #tpu.memory_space<vmem>>, vector<32x4xf32>
    %119 = vector.extract_strided_slice %103 {offsets = [0, 3], sizes = [32, 1], strides = [1, 1]} : vector<32x4xf32> to vector<32x1xf32>
    %120 = vector.broadcast %119 : vector<32x1xf32> to vector<32x4xf32>
    %121 = arith.mulf %120, %118 : vector<32x4xf32>
    %122 = arith.addf %117, %121 : vector<32x4xf32>
    %c960 = arith.constant 960 : index
    %c0_40 = arith.constant 0 : index
    %123 = vector.load %arg2[%c960, %c0_40] : memref<1040x128xf32, #tpu.memory_space<vmem>>, vector<2x32xf32>
    %c1032 = arith.constant 1032 : index
    %c0_41 = arith.constant 0 : index
    %124 = vector.load %arg2[%c1032, %c0_41] : memref<1040x128xf32, #tpu.memory_space<vmem>>, vector<1x4xf32>
    %cst_42 = arith.constant dense<0.000000e+00> : vector<2x4xf32>
    %125 = tpu.matmul %123, %122, %cst_42 {dimension_numbers = #tpu.dot_dimension_numbers<[1], [0], [0], [1], [0, 0, 1, 1], [], []>, precision = #tpu.contract_precision<fp32>} : vector<2x32xf32>, vector<32x4xf32>, vector<2x4xf32> -> vector<2x4xf32>
    %126 = vector.broadcast %124 : vector<1x4xf32> to vector<2x4xf32>
    %127 = arith.addf %125, %126 : vector<2x4xf32>
    %cst_43 = arith.constant dense<0xFF800000> : vector<2xf32>
    %128 = vector.multi_reduction <maximumf>, %127, %cst_43 [1] : vector<2x4xf32> to vector<2xf32>
    %129 = vector.shape_cast %128 : vector<2xf32> to vector<2x1xf32>
    %130 = vector.broadcast %129 : vector<2x1xf32> to vector<2x4xf32>
    %131 = arith.subf %127, %130 : vector<2x4xf32>
    %132 = math.exp %131 : vector<2x4xf32>
    %cst_44 = arith.constant dense<0.000000e+00> : vector<2xf32>
    %133 = vector.multi_reduction <add>, %132, %cst_44 [1] : vector<2x4xf32> to vector<2xf32>
    %134 = vector.shape_cast %133 : vector<2xf32> to vector<2x1xf32>
    %135 = math.log %134 : vector<2x1xf32>
    %136 = vector.broadcast %135 : vector<2x1xf32> to vector<2x4xf32>
    %137 = arith.subf %131, %136 : vector<2x4xf32>
    %c0_45 = arith.constant 0 : index
    %c0_46 = arith.constant 0 : index
    %138 = vector.load %arg3[%c0_45, %c0_46] : memref<2x4xf32, #tpu.memory_space<vmem>>, vector<2x4xf32>
    tpu.vector_store %arg3[%c0_45, %c0_46], %137 {strides = array<i32>} : memref<2x4xf32, #tpu.memory_space<vmem>>, vector<2x4xf32>,
    return
  }
}

</mosaic_0001>

<bundles_post_ra>
// kernel: tpu_custom_call.1
= control target key start
LH: loop header
LB: loop body
LE: loop exit
PB: predicated region body
PF: predicated region fallthrough
CT: control target
= control target key end

     0   :  { %8 = vsyncpa [#allocation3], 0  ;;  %s6460_s0 = inlined_call_operand.hbm [shape: f32[8,64], index: 0, kind: input, shape index: {}]   ;;  %s6461_s1 = inlined_call_operand.hbm [shape: f32[64,1024], index: 1, kind: input, shape index: {}]   ;;  %s6462_s2 = inlined_call_operand.hbm [shape: f32[1040,128], index: 2, kind: input, shape index: {}]   ;;  %s6463_s3 = inlined_call_operand.hbm [shape: f32[2,4], index: 3, kind: output, shape index: {}]  }
   0x1   :  { %9 = vsyncpa [#allocation6], 0  ;;  %s26_s14 = sshll.u32 %s6461_s1, 4  ;;  %s27_s14 = int_to_ptr.hbm [resolvable:$true] %s26_s14 }
   0x2   :  { %10 = vsyncpa [#allocation4], 0  ;;  %s4479_s15 = smov [#allocation5]   ;;  %s16_s19 = sshll.u32 %s6460_s0, 4  ;;  %s17_s19 = int_to_ptr.hbm [resolvable:$true] %s16_s19 }
   0x3   :  { %s28_s16 = sshll.u32 %s4479_s15, 4  ;;  %s4480_s20 = smov 1024   ;;  %s29_s16 = int_to_ptr.vmem [resolvable:$true] %s28_s16 }
   0x4   :  { %s4481_s21 = smov 64   ;;  %s4482_s22 = smov [#allocation2]  }
   0x5   :  { %34 = dma.hbm_to_vmem [thread:$0]  %s27_s14, 8192, %s29_s16, [#allocation6], %s4480_s20, %s4480_s20, %s4481_s21  }
   0x6   :  { %s18_s23 = sshll.u32 %s4482_s22, 4  ;;  %s39_s26 = sshll.u32 %s6462_s2, 4  ;;  %s19_s23 = int_to_ptr.vmem [resolvable:$true] %s18_s23  ;;  %s40_s26 = int_to_ptr.hbm [resolvable:$true] %s39_s26 }
   0x7   :  { %21 = dma.hbm_to_vmem [thread:$0]  %s17_s19, 128, %s19_s23, [#allocation3]  }
   0x8   :  { %s4483_s1 = smov [#allocation7]   ;;  %s4484_s28 = smov 128  }
   0x9   :  { %s41_s27 = sshll.u32 %s4483_s1, 4  ;;  %s4485_s29 = smov 8   ;;  %s42_s27 = int_to_ptr.vmem [resolvable:$true] %s41_s27 }
   0xa   :  { %47 = dma.hbm_to_vmem [thread:$0]  %s40_s26, 16640, %s42_s27, [#allocation6], %s4484_s28, %s4484_s28, %s4485_s29  }
   0xb   :  { %4473 = dma.done.wait [#allocation3], 128  }
   0xc   :  { %4474 = vsyncadd [#allocation3], 4294967168 }
   0xd   :  { %4475 = dma.done.wait [#allocation6], 24832  }
   0xe   :  { %4476 = vsyncadd [#allocation6], 4294942464  ;;  %v117_v0 = vld [vmem:[#allocation5 + $0x1c0] sm:$0xff]  ;;  %v118_v22 = vld [vmem:[#allocation5 + $0x1c8] sm:$0xff]  ;;  %vm125_vm0 = vcmask 523264   ;;  %s4487_s0 = smov 125  }
   0xf   :  { %v109_v1 = vld [vmem:[#allocation5 + $0x180] sm:$0xff]  ;;  %v4535_v3 = vand.u32 4294901760, %v117_v0  ;;  %v110_v30 = vld [vmem:[#allocation5 + $0x188] sm:$0xff]  ;;  %v4594_v34 = vand.u32 4294901760, %v118_v22  ;;  %v60_v44 = vld [vmem:[#allocation2] sm:$0xff]  ;;  %s4488_s2 = smov 126  }
  0x10   :  { %v101_v2 = vld [vmem:[#allocation5 + $0x140] sm:$0xff]  ;;  %v4537_v4 = vand.u32 4294901760, %v109_v1  ;;  %v102_v37 = vld [vmem:[#allocation5 + $0x148] sm:$0xff]  ;;  %v4608_v41 = vand.u32 4294901760, %v110_v30  ;;  %v127_v55 = vsel %vm125_vm0, %v60_v44, 0  ;;  %s4489_s30 = smov 127  }
  0x11   :  { %v4539_v5 = vand.u32 4294901760, %v101_v2  ;;  %v93_v6 = vld [vmem:[#allocation5 + $0x100] sm:$0xff]  ;;  %138 = vmatpush.msra.mxu0 %v4535_v3  ;;  %v4549_v14 = vsub.f32 %v117_v0, %v4535_v3  ;;  %270 = vmatpush.msra.mxu3 %v4535_v3  ;;  %v94_v42 = vld [vmem:[#allocation5 + $0x108] sm:$0xff]  ;;  %v4617_v49 = vsub.f32 %v118_v22, %v4594_v34  ;;  %v4619_v50 = vand.u32 4294901760, %v102_v37  ;;  %s4490_s4 = smov 122   ;;  %s4491_s5 = smov 123  }
  0x12   :  { %v85_v7 = vld [vmem:[#allocation5 + $0xc0] sm:$0xff]  ;;  %v4541_v9 = vand.u32 4294901760, %v93_v6  ;;  %v4552_v15 = vsub.f32 %v109_v1, %v4537_v4  ;;  %v86_v43 = vld [vmem:[#allocation5 + $0xc8] sm:$0xff]  ;;  %v4622_v51 = vsub.f32 %v110_v30, %v4608_v41  ;;  %v4627_v53 = vand.u32 4294901760, %v94_v42  ;;  %s4492_s6 = smov 124   ;;  %s4493_s7 = smov 118  }
  0x13   :  { %v77_v8 = vld [vmem:[#allocation5 + $0x80] sm:$0xff]  ;;  %v4543_v10 = vand.u32 4294901760, %v85_v7  ;;  %v4556_v16 = vsub.f32 %v101_v2, %v4539_v5  ;;  %233 = vmatpush.msra.mxu2 %v4549_v14  ;;  %140 = vmatpush.msra.mxu0 %v4537_v4  ;;  %v172_v23 = vand.u32 4294901760, %v4549_v14  ;;  %v4629_v54 = vand.u32 4294901760, %v86_v43  ;;  %v78_v56 = vld [vmem:[#allocation5 + $0x88] sm:$0xff]  ;;  %s4494_s8 = smov 119  }
  0x14   :  { %v4545_v11 = vand.u32 4294901760, %v77_v8  ;;  %v69_v12 = vld [vmem:[#allocation5 + $0x40] sm:$0xff]  ;;  %v4561_v18 = vsub.f32 %v93_v6, %v4541_v9  ;;  %v178_v24 = vand.u32 4294901760, %v4552_v15  ;;  %272 = vmatpush.msra.mxu3 %v4537_v4  ;;  %v409_v58 = vand.u32 4294901760, %v4617_v49  ;;  %v70_v1 = vld [vmem:[#allocation5 + $0x48] sm:$0xff]  ;;  %s4495_s9 = smov 121  }
  0x15   :  { %v61_v13 = vld [vmem:[#allocation5] sm:$0xff]  ;;  %v4558_v17 = vand.u32 4294901760, %v69_v12  ;;  %v4564_v19 = vsub.f32 %v85_v7, %v4543_v10  ;;  %v184_v25 = vand.u32 4294901760, %v4556_v16  ;;  %236 = vmatpush.msra.mxu2 %v4552_v15  ;;  %142 = vmatpush.msra.mxu0 %v4539_v5  ;;  %v173_v31 = vsub.f32 %v4549_v14, %v172_v23  ;;  %s4496_s10 = smov 116   ;;  %s4497_s11 = smov 120  }
  0x16   :  { %v4567_v20 = vsub.f32 %v77_v8, %v4545_v11  ;;  %v4569_v21 = vand.u32 4294901760, %v61_v13  ;;  %v190_v26 = vand.u32 4294901760, %v4561_v18  ;;  %v179_v32 = vsub.f32 %v4552_v15, %v178_v24  ;;  %274 = vmatpush.msra.mxu3 %v4539_v5  ;;  %s4498_s12 = smov 117   ;;  %s4499_s13 = smov 115  }
  0x17   :  { %v196_v27 = vand.u32 4294901760, %v4564_v19  ;;  %v4580_v28 = vsub.f32 %v69_v12, %v4558_v17  ;;  %v185_v33 = vsub.f32 %v4556_v16, %v184_v25  ;;  %v174_v38 = vand.u32 4294901760, %v173_v31  ;;  %239 = vmatpush.msra.mxu2 %v4556_v16  ;;  %144 = vmatpush.msra.mxu0 %v4541_v9  ;;  %v62_v31 = vld [vmem:[#allocation5 + $0x8] sm:$0xff]  ;;  %s4500_s14 = smov 113   ;;  %s4501_s15 = smov 114  }
  0x18   :  { %v202_v29 = vand.u32 4294901760, %v4567_v20  ;;  %v191_v35 = vsub.f32 %v4561_v18, %v190_v26  ;;  %v4601_v36 = vsub.f32 %v61_v13, %v4569_v21  ;;  %v180_v39 = vand.u32 4294901760, %v179_v32  ;;  %276 = vmatpush.msra.mxu3 %v4541_v9  ;;  %s4505_s16 = smov [#allocation8]   ;;  %s4294_s20 = sshll.u32 %s6463_s3, 4  ;;  %s4295_s20 = int_to_ptr.hbm [resolvable:$true] %s4294_s20 }
  0x19   :  { %v197_v40 = vsub.f32 %v4564_v19, %v196_v27  ;;  %v186_v45 = vand.u32 4294901760, %v185_v33  ;;  %v208_v47 = vand.u32 4294901760, %v4580_v28  ;;  %175 = vmatpush.msra.mxu1 %v174_v38  ;;  %242 = vmatpush.msra.mxu2 %v4561_v18  ;;  %v415_v59 = vand.u32 4294901760, %v4622_v51  ;;  %s4292_s17 = sshll.u32 %s4505_s16, 4  ;;  %s4293_s17 = int_to_ptr.vmem [resolvable:$true] %s4292_s17 }
  0x1a   :  { %v203_v46 = vsub.f32 %v4567_v20, %v202_v29  ;;  %v192_v48 = vand.u32 4294901760, %v191_v35  ;;  %146 = vmatpush.msra.mxu0 %v4543_v10  ;;  %278 = vmatpush.msra.mxu3 %v4543_v10  ;;  %v214_v52 = vand.u32 4294901760, %v4601_v36  ;;  %v4636_v60 = vsub.f32 %v102_v37, %v4619_v50 }
  0x1b   :  { %181 = vmatpush.msra.mxu1 %v180_v39  ;;  %245 = vmatpush.msra.mxu2 %v4564_v19  ;;  %v198_v57 = vand.u32 4294901760, %v197_v40  ;;  %v209_v61 = vsub.f32 %v4580_v28, %v208_v47  ;;  %v4644_v62 = vsub.f32 %v94_v42, %v4627_v53  ;;  %v4646_v63 = vand.u32 4294901760, %v127_v55 }
  0x1c   :  { %148 = vmatpush.msra.mxu0 %v4545_v11  ;;  %280 = vmatpush.msra.mxu3 %v4545_v11  ;;  %v4649_v0 = vsub.f32 %v86_v43, %v4629_v54  ;;  %v410_v2 = vsub.f32 %v4617_v49, %v409_v58  ;;  %v416_v6 = vsub.f32 %v4622_v51, %v415_v59  ;;  %v421_v7 = vand.u32 4294901760, %v4636_v60 }
  0x1d   :  { %187 = vmatpush.msra.mxu1 %v186_v45  ;;  %248 = vmatpush.msra.mxu2 %v4567_v20  ;;  %v4659_v8 = vand.u32 4294901760, %v78_v56  ;;  %v204_v12 = vand.u32 4294901760, %v203_v46  ;;  %v215_v13 = vsub.f32 %v4601_v36, %v214_v52  ;;  %v427_v22 = vand.u32 4294901760, %v4644_v62 }
  0x1e   :  { %150 = vmatpush.msra.mxu0 %v4558_v17  ;;  %282 = vmatpush.msra.mxu3 %v4558_v17  ;;  %v4668_v30 = vsub.f32 %v127_v55, %v4646_v63  ;;  %v411_v32 = vand.u32 4294901760, %v410_v2  ;;  %v422_v33 = vsub.f32 %v4636_v60, %v421_v7  ;;  %v433_v35 = vand.u32 4294901760, %v4649_v0 }
  0x1f   :  { %193 = vmatpush.msra.mxu1 %v192_v48  ;;  %251 = vmatpush.msra.mxu2 %v4580_v28  ;;  %v4675_v37 = vand.u32 4294901760, %v70_v1  ;;  %v210_v38 = vand.u32 4294901760, %v209_v61  ;;  %v417_v39 = vand.u32 4294901760, %v416_v6  ;;  %v428_v40 = vsub.f32 %v4644_v62, %v427_v22  ;;  %v87_v28 = vld [vmem:[#allocation5 + $0xd0] sm:$0xff] }
  0x20   :  { %152 = vmatpush.msra.mxu0 %v4569_v21  ;;  %284 = vmatpush.msra.mxu3 %v4569_v21  ;;  %v4684_v42 = vsub.f32 %v78_v56, %v4659_v8  ;;  %v4686_v43 = vand.u32 4294901760, %v62_v31  ;;  %v4692_v44 = vand.u32 4294901760, %v4668_v30  ;;  %v216_v45 = vand.u32 4294901760, %v215_v13 }
  0x21   :  { %199 = vmatpush.msra.mxu1 %v198_v57  ;;  %254 = vmatpush.msra.mxu2 %v4601_v36  ;;  %v423_v46 = vand.u32 4294901760, %v422_v33  ;;  %v434_v48 = vsub.f32 %v4649_v0, %v433_v35  ;;  %v4698_v55 = vsub.f32 %v70_v1, %v4675_v37  ;;  %v429_v14 = vand.u32 4294901760, %v428_v40  ;;  %v79_v36 = vld [vmem:[#allocation5 + $0x90] sm:$0xff] }
  0x22   :  { %303 = vmatpush.msrb.mxu0 %v172_v23  ;;  %412 = vmatpush.msrb.mxu3 %v411_v32  ;;  %v439_v23 = vand.u32 4294901760, %v4684_v42  ;;  %v4705_v56 = vsub.f32 %v62_v31, %v4686_v43  ;;  %v156_v57 = vsub.f32 %v4668_v30, %v4692_v44  ;;  %v104_v32 = vld [vmem:[#allocation5 + $0x158] sm:$0xff]  ;;  %vm3205_vm5 = vcmask 261120  }
  0x23   :  { %375 = vmatpush.msrb.mxu2 %v4594_v34  ;;  %205 = vmatpush.msra.mxu1 %v204_v12  ;;  %v435_v15 = vand.u32 4294901760, %v434_v48  ;;  %vm4273_vm10 = vcmask 25600  }
  0x24   :  { %307 = vmatpush.msrb.mxu0 %v178_v24  ;;  %418 = vmatpush.msrb.mxu3 %v417_v39  ;;  %v445_v24 = vand.u32 4294901760, %v4698_v55  ;;  %v440_v16 = vsub.f32 %v4684_v42, %v439_v23  ;;  %v4724_v61 = vand.u32 4294901760, %v156_v57 }
  0x25   :  { %377 = vmatpush.msrb.mxu2 %v4608_v41  ;;  %211 = vmatpush.msra.mxu1 %v210_v38 }
  0x26   :  { %311 = vmatpush.msrb.mxu0 %v184_v25  ;;  %424 = vmatpush.msrb.mxu3 %v423_v46  ;;  %v451_v25 = vand.u32 4294901760, %v4705_v56 }
  0x27   :  { %379 = vmatpush.msrb.mxu2 %v4619_v50  ;;  %217 = vmatpush.msra.mxu1 %v216_v45 }
  0x28   :  { %315 = vmatpush.msrb.mxu0 %v190_v26  ;;  %430 = vmatpush.msrb.mxu3 %v429_v14  ;;  %v452_v18 = vsub.f32 %v4705_v56, %v451_v25 }
  0x29   :  { %346 = vmatpush.msrb.mxu1 %v4535_v3  ;;  %381 = vmatpush.msrb.mxu2 %v4627_v53  ;;  %v446_v3 = vsub.f32 %v4698_v55, %v445_v24 }
  0x2a   :  { %319 = vmatpush.msrb.mxu0 %v196_v27  ;;  %436 = vmatpush.msrb.mxu3 %v435_v15  ;;  %v453_v19 = vand.u32 4294901760, %v452_v18  ;;  %v80_v18 = vld [vmem:[#allocation5 + $0x98] sm:$0xff] }
  0x2b   :  { %348 = vmatpush.msrb.mxu1 %v4537_v4  ;;  %383 = vmatpush.msrb.mxu2 %v4629_v54  ;;  %v441_v4 = vand.u32 4294901760, %v440_v16 }
  0x2c   :  { %257 = vmatmul.f32.vlgmr.msra.gmra.mxu2 %v4668_v30  ;;  %323 = vmatpush.msrb.mxu0 %v202_v29 }
  0x2d   :  { %350 = vmatpush.msrb.mxu1 %v4539_v5  ;;  %385 = vmatpush.msrb.mxu2 %v4659_v8  ;;  %v447_v5 = vand.u32 4294901760, %v446_v3 }
  0x2e   :  { %158 = vmatmul.f32.vlgmr.msra.gmra.mxu0 %v4724_v61  ;;  %288 = vmatmul.f32.vlgmr.msra.gmra.mxu3 %v4692_v44 }
  0x2f   :  { %352 = vmatpush.msrb.mxu1 %v4541_v9  ;;  %327 = vmatpush.msrb.mxu0 %v208_v47  ;;  %v119_v9 = vld [vmem:[#allocation5 + $0x1d0] sm:$0xff] }
  0x30   :  { %387 = vmatpush.msrb.mxu2 %v4675_v37  ;;  %442 = vmatpush.msrb.mxu3 %v441_v4 }
  0x31   :  { %354 = vmatpush.msrb.mxu1 %v4543_v10  ;;  %331 = vmatpush.msrb.mxu0 %v214_v52  ;;  %v111_v10 = vld [vmem:[#allocation5 + $0x190] sm:$0xff]  ;;  %v4809_v52 = vand.u32 4294901760, %v79_v36 }
  0x32   :  { %219 = vmatmul.f32.vlgmr.msra.gmra.mxu1 %v4646_v63  ;;  %389 = vmatpush.msrb.mxu2 %v4686_v43  ;;  %v4768_v20 = vand.u32 4294901760, %v111_v10 }
  0x33   :  { %356 = vmatpush.msrb.mxu1 %v4545_v11  ;;  %448 = vmatpush.msrb.mxu3 %v447_v5  ;;  %v4761_v11 = vand.u32 4294901760, %v119_v9  ;;  %v4835_v6 = vsub.f32 %v79_v36, %v4809_v52 }
  0x34   :  { %470 = vmatpush.msra.mxu0 %v4617_v49  ;;  %540 = vmatpush.msra.mxu2 %v409_v58  ;;  %v4786_v29 = vsub.f32 %v111_v10, %v4768_v20  ;;  %v4799_v49 = vand.u32 4294901760, %v87_v28  ;;  %v120_v58 = vld [vmem:[#allocation5 + $0x1d8] sm:$0xff] }
  0x35   :  { %358 = vmatpush.msrb.mxu1 %v4558_v17  ;;  %454 = vmatpush.msrb.mxu3 %v453_v19  ;;  %v103_v17 = vld [vmem:[#allocation5 + $0x150] sm:$0xff]  ;;  %v4776_v26 = vsub.f32 %v119_v9, %v4761_v11  ;;  %v676_v39 = vand.u32 4294901760, %v4835_v6 }
  0x36   :  { %473 = vmatpush.msra.mxu0 %v4622_v51  ;;  %544 = vmatpush.msra.mxu2 %v415_v59  ;;  %v4778_v27 = vand.u32 4294901760, %v103_v17 }
  0x37   :  { %583 = vmatpush.msra.mxu3 %v4594_v34  ;;  %360 = vmatpush.msrb.mxu1 %v4569_v21  ;;  %v95_v21 = vld [vmem:[#allocation5 + $0x110] sm:$0xff]  ;;  %v677_v15 = vsub.f32 %v4835_v6, %v676_v39 }
  0x38   :  { %333 = vmatmul.f32.vlgmr.msrb.gmra.mxu0 %v4646_v63  ;;  %548 = vmatpush.msra.mxu2 %v421_v7  ;;  %v4797_v47 = vsub.f32 %v103_v17, %v4778_v27  ;;  %v4837_v7 = vand.u32 4294901760, %v120_v58 }
  0x39   :  { %507 = vmatpush.msra.mxu1 %v4594_v34  ;;  %476 = vmatpush.msra.mxu0 %v4636_v60  ;;  %v4788_v34 = vand.u32 4294901760, %v95_v21  ;;  %v4821_v60 = vsub.f32 %v87_v28, %v4799_v49  ;;  %v678_v10 = vand.u32 4294901760, %v677_v15 }
  0x3a   :  { %585 = vmatpush.msra.mxu3 %v4608_v41  ;;  %362 = vmatmul.f32.vlgmr.msrb.gmra.mxu1 %v4646_v63  ;;  %v658_v59 = vand.u32 4294901760, %v4797_v47  ;;  %v4863_v40 = vsub.f32 %v120_v58, %v4837_v7 }
  0x3b   :  { %479 = vmatpush.msra.mxu0 %v4644_v62  ;;  %509 = vmatpush.msra.mxu1 %v4608_v41  ;;  %v646_v41 = vand.u32 4294901760, %v4776_v26  ;;  %v4807_v51 = vsub.f32 %v95_v21, %v4788_v34  ;;  %v63_v62 = vld [vmem:[#allocation5 + $0x10] sm:$0xff]  ;;  %v670_v31 = vand.u32 4294901760, %v4821_v60  ;;  %v72_v21 = vld [vmem:[#allocation5 + $0x58] sm:$0xff] }
  0x3c   :  { %552 = vmatpush.msra.mxu2 %v427_v22  ;;  %587 = vmatpush.msra.mxu3 %v4619_v50  ;;  %v4841_v12 = vand.u32 4294901760, %v63_v62  ;;  %v659_v22 = vsub.f32 %v4797_v47, %v658_v59 }
  0x3d   :  { %482 = vmatpush.msra.mxu0 %v4649_v0  ;;  %511 = vmatpush.msra.mxu1 %v4619_v50  ;;  %v652_v50 = vand.u32 4294901760, %v4786_v29  ;;  %v664_v2 = vand.u32 4294901760, %v4807_v51  ;;  %v671_v48 = vsub.f32 %v4821_v60, %v670_v31 }
  0x3e   :  { %556 = vmatpush.msra.mxu2 %v433_v35  ;;  %589 = vmatpush.msra.mxu3 %v4627_v53  ;;  %v4868_v45 = vsub.f32 %v63_v62, %v4841_v12  ;;  %v660_v46 = vand.u32 4294901760, %v659_v22 }
  0x3f   :  { %395 = vmatmul.f32.vlgmr.msrb.gmra.mxu2 %v4724_v61  ;;  %485 = vmatpush.msra.mxu0 %v4684_v42  ;;  %v653_v1 = vsub.f32 %v4786_v29, %v652_v50  ;;  %v665_v38 = vsub.f32 %v4807_v51, %v664_v2  ;;  %v96_v42 = vld [vmem:[#allocation5 + $0x118] sm:$0xff]  ;;  %v672_v3 = vand.u32 4294901760, %v671_v48 }
  0x40   :  { %513 = vmatpush.msra.mxu1 %v4627_v53  ;;  %560 = vmatpush.msra.mxu2 %v439_v23  ;;  %v71_v53 = vld [vmem:[#allocation5 + $0x50] sm:$0xff]  ;;  %v4882_v23 = vand.u32 4294901760, %v96_v42  ;;  %v688_v16 = vand.u32 4294901760, %v4868_v45 }
  0x41   :  { %591 = vmatpush.msra.mxu3 %v4629_v54  ;;  %488 = vmatpush.msra.mxu0 %v4698_v55  ;;  %v4826_v0 = vand.u32 4294901760, %v71_v53  ;;  %v666_v57 = vand.u32 4294901760, %v665_v38 }
  0x42   :  { %456 = vmatmul.f32.vlgmr.msrb.gmra.mxu3 %v4646_v63  ;;  %515 = vmatpush.msra.mxu1 %v4629_v54  ;;  %v647_v54 = vsub.f32 %v4776_v26, %v646_v41  ;;  %v4905_v9 = vsub.f32 %v96_v42, %v4882_v23  ;;  %v689_v28 = vsub.f32 %v4868_v45, %v688_v16 }
  0x43   :  { %564 = vmatpush.msra.mxu2 %v445_v24  ;;  %593 = vmatpush.msra.mxu3 %v4659_v8  ;;  %v4852_v33 = vsub.f32 %v71_v53, %v4826_v0  ;;  %v883_v24 = vand.u32 4294901760, %v4863_v40  ;;  %v4917_v53 = vand.u32 4294901760, %v80_v18 }
  0x44   :  { %491 = vmatpush.msra.mxu0 %v4705_v56  ;;  %517 = vmatpush.msra.mxu1 %v4659_v8  ;;  %v112_v8 = vld [vmem:[#allocation5 + $0x198] sm:$0xff]  ;;  %v648_v13 = vand.u32 4294901760, %v647_v54 }
  0x45   :  { %568 = vmatpush.msra.mxu2 %v451_v25  ;;  %595 = vmatpush.msra.mxu3 %v4675_v37  ;;  %v4854_v35 = vand.u32 4294901760, %v112_v8  ;;  %v682_v55 = vand.u32 4294901760, %v4852_v33  ;;  %v88_v56 = vld [vmem:[#allocation5 + $0xd8] sm:$0xff]  ;;  %v884_v17 = vsub.f32 %v4863_v40, %v883_v24  ;;  %v4938_v38 = vsub.f32 %v80_v18, %v4917_v53 }
  0x46   :  { %612 = vmatpush.msrb.mxu0 %v4761_v11  ;;  %519 = vmatpush.msra.mxu1 %v4675_v37  ;;  %v654_v37 = vand.u32 4294901760, %v653_v1  ;;  %v4896_v4 = vand.u32 4294901760, %v88_v56  ;;  %v64_v54 = vld [vmem:[#allocation5 + $0x18] sm:$0xff] }
  0x47   :  { %707 = vmatpush.msrb.mxu2 %v4776_v26  ;;  %597 = vmatpush.msra.mxu3 %v4686_v43  ;;  %v4880_v14 = vsub.f32 %v112_v8, %v4854_v35  ;;  %v683_v5 = vsub.f32 %v4852_v33, %v682_v55  ;;  %v901_v8 = vand.u32 4294901760, %v4905_v9  ;;  %v885_v22 = vand.u32 4294901760, %v884_v17 }
  0x48   :  { %570 = vmatmul.f32.vlgmr.msra.gmra.mxu2 %v4646_v63  ;;  %614 = vmatpush.msrb.mxu0 %v4768_v20  ;;  %v4921_v58 = vsub.f32 %v88_v56, %v4896_v4  ;;  %v4940_v42 = vand.u32 4294901760, %v64_v54 }
  0x49   :  { %710 = vmatpush.msrb.mxu2 %v4786_v29  ;;  %744 = vmatpush.msrb.mxu3 %v4761_v11  ;;  %v889_v19 = vand.u32 4294901760, %v4880_v14  ;;  %v684_v62 = vand.u32 4294901760, %v683_v5  ;;  %v902_v56 = vsub.f32 %v4905_v9, %v901_v8 }
  0x4a   :  { %521 = vmatpush.msra.mxu1 %v4686_v43  ;;  %494 = vmatmul.f32.vlgmr.msra.gmra.mxu0 %v4668_v30  ;;  %v4870_v43 = vand.u32 4294901760, %v104_v32  ;;  %v4958_v15 = vsub.f32 %v64_v54, %v4940_v42 }
  0x4b   :  { %599 = vmatmul.f32.vlgmr.msra.gmra.mxu3 %v4646_v63  ;;  %616 = vmatpush.msrb.mxu0 %v4778_v27  ;;  %v890_v1 = vsub.f32 %v4880_v14, %v889_v19 }
  0x4c   :  { %649 = vmatpush.msrb.mxu1 %v648_v13  ;;  %713 = vmatpush.msrb.mxu2 %v4797_v47  ;;  %v4893_v25 = vsub.f32 %v104_v32, %v4870_v43  ;;  %v4929_v13 = vand.u32 4294901760, %v72_v21  ;;  %v690_v32 = vand.u32 4294901760, %v689_v28  ;;  %v925_v47 = vand.u32 4294901760, %v4958_v15 }
  0x4d   :  { %746 = vmatpush.msrb.mxu3 %v4768_v20  ;;  %525 = vmatmul.f32.vlgmr.msra.gmra.mxu1 %v4692_v44  ;;  %v891_v48 = vand.u32 4294901760, %v890_v1  ;;  %v106_v1 = vld [vmem:[#allocation5 + $0x168] sm:$0xff] }
  0x4e   :  { %618 = vmatpush.msrb.mxu0 %v4788_v34  ;;  %655 = vmatpush.msrb.mxu1 %v654_v37  ;;  %v895_v36 = vand.u32 4294901760, %v4893_v25 }
  0x4f   :  { %716 = vmatpush.msrb.mxu2 %v4807_v51  ;;  %748 = vmatpush.msrb.mxu3 %v4778_v27 }
  0x50   :  { %620 = vmatpush.msrb.mxu0 %v4799_v49  ;;  %661 = vmatpush.msrb.mxu1 %v660_v46  ;;  %v896_v37 = vsub.f32 %v4893_v25, %v895_v36  ;;  %v907_v46 = vand.u32 4294901760, %v4921_v58 }
  0x51   :  { %719 = vmatpush.msrb.mxu2 %v4821_v60  ;;  %750 = vmatpush.msrb.mxu3 %v4788_v34 }
  0x52   :  { %622 = vmatpush.msrb.mxu0 %v4809_v52  ;;  %667 = vmatpush.msrb.mxu1 %v666_v57  ;;  %v4951_v57 = vsub.f32 %v72_v21, %v4929_v13  ;;  %v897_v26 = vand.u32 4294901760, %v896_v37  ;;  %v908_v29 = vsub.f32 %v4921_v58, %v907_v46 }
  0x53   :  { %722 = vmatpush.msrb.mxu2 %v4835_v6  ;;  %752 = vmatpush.msrb.mxu3 %v4799_v49 }
  0x54   :  { %624 = vmatpush.msrb.mxu0 %v4826_v0  ;;  %673 = vmatpush.msrb.mxu1 %v672_v3  ;;  %v919_v3 = vand.u32 4294901760, %v4951_v57 }
  0x55   :  { %725 = vmatpush.msrb.mxu2 %v4852_v33  ;;  %754 = vmatpush.msrb.mxu3 %v4809_v52  ;;  %v89_v33 = vld [vmem:[#allocation5 + $0xe0] sm:$0xff] }
  0x56   :  { %626 = vmatpush.msrb.mxu0 %v4841_v12  ;;  %679 = vmatpush.msrb.mxu1 %v678_v10 }
  0x57   :  { %728 = vmatpush.msrb.mxu2 %v4868_v45  ;;  %756 = vmatpush.msrb.mxu3 %v4826_v0 }
  0x58   :  { %777 = vmatpush.msra.mxu0 %v646_v41  ;;  %685 = vmatpush.msrb.mxu1 %v684_v62  ;;  %v913_v41 = vand.u32 4294901760, %v4938_v38 }
  0x59   :  { %849 = vmatpush.msra.mxu2 %v4837_v7  ;;  %758 = vmatpush.msrb.mxu3 %v4841_v12 }
  0x5a   :  { %781 = vmatpush.msra.mxu0 %v652_v50  ;;  %691 = vmatpush.msrb.mxu1 %v690_v32  ;;  %v903_v50 = vand.u32 4294901760, %v902_v56 }
  0x5b   :  { %851 = vmatpush.msra.mxu2 %v4854_v35  ;;  %886 = vmatpush.msra.mxu3 %v885_v22 }
  0x5c   :  { %785 = vmatpush.msra.mxu0 %v658_v59  ;;  %820 = vmatpush.msra.mxu1 %v4761_v11  ;;  %v914_v11 = vsub.f32 %v4938_v38, %v913_v41  ;;  %v909_v59 = vand.u32 4294901760, %v908_v29  ;;  %v90_v29 = vld [vmem:[#allocation5 + $0xe8] sm:$0xff] }
  0x5d   :  { %853 = vmatpush.msra.mxu2 %v4870_v43  ;;  %892 = vmatpush.msra.mxu3 %v891_v48 }
  0x5e   :  { %789 = vmatpush.msra.mxu0 %v664_v2  ;;  %822 = vmatpush.msra.mxu1 %v4768_v20  ;;  %v920_v20 = vsub.f32 %v4951_v57, %v919_v3  ;;  %v915_v51 = vand.u32 4294901760, %v914_v11 }
  0x5f   :  { %855 = vmatpush.msra.mxu2 %v4882_v23  ;;  %898 = vmatpush.msra.mxu3 %v897_v26 }
  0x60   :  { %793 = vmatpush.msra.mxu0 %v670_v31  ;;  %824 = vmatpush.msra.mxu1 %v4778_v27  ;;  %v926_v27 = vsub.f32 %v4958_v15, %v925_v47  ;;  %v921_v60 = vand.u32 4294901760, %v920_v20 }
  0x61   :  { %857 = vmatpush.msra.mxu2 %v4896_v4  ;;  %904 = vmatpush.msra.mxu3 %v903_v50 }
  0x62   :  { %731 = vmatmul.f32.vlgmr.msrb.gmra.mxu2 %v4668_v30  ;;  %797 = vmatpush.msra.mxu0 %v676_v39 }
  0x63   :  { %826 = vmatpush.msra.mxu1 %v4788_v34  ;;  %859 = vmatpush.msra.mxu2 %v4917_v53  ;;  %v927_v34 = vand.u32 4294901760, %v926_v27  ;;  %v82_v27 = vld [vmem:[#allocation5 + $0xa8] sm:$0xff] }
  0x64   :  { %910 = vmatpush.msra.mxu3 %v909_v59  ;;  %632 = vmatmul.f32.vlgmr.msrb.gmra.mxu0 %v4724_v61 }
  0x65   :  { %762 = vmatmul.f32.vlgmr.msrb.gmra.mxu3 %v4692_v44  ;;  %801 = vmatpush.msra.mxu0 %v682_v55  ;;  %v5051_v55 = vand.u32 4294901760, %v89_v33 }
  0x66   :  { %828 = vmatpush.msra.mxu1 %v4799_v49  ;;  %861 = vmatpush.msra.mxu2 %v4929_v13  ;;  %v121_v49 = vld [vmem:[#allocation5 + $0x1e0] sm:$0xff] }
  0x67   :  { %916 = vmatpush.msra.mxu3 %v915_v51  ;;  %693 = vmatmul.f32.vlgmr.msrb.gmra.mxu1 %v4646_v63  ;;  %v5013_v2 = vand.u32 4294901760, %v121_v49  ;;  %v5073_v5 = vsub.f32 %v89_v33, %v5051_v55  ;;  %v5148_v51 = vand.u32 4294901760, %v90_v29 }
  0x68   :  { %805 = vmatpush.msra.mxu0 %v688_v16  ;;  %830 = vmatpush.msra.mxu1 %v4809_v52  ;;  %v113_v52 = vld [vmem:[#allocation5 + $0x1a0] sm:$0xff] }
  0x69   :  { %863 = vmatpush.msra.mxu2 %v4940_v42  ;;  %922 = vmatpush.msra.mxu3 %v921_v60  ;;  %v5020_v6 = vand.u32 4294901760, %v113_v52  ;;  %v73_v16 = vld [vmem:[#allocation5 + $0x60] sm:$0xff]  ;;  %v1144_v62 = vand.u32 4294901760, %v5073_v5 }
  0x6a   :  { %944 = vmatpush.msrb.mxu0 %v4863_v40  ;;  %832 = vmatpush.msra.mxu1 %v4826_v0  ;;  %v105_v0 = vld [vmem:[#allocation5 + $0x160] sm:$0xff] }
  0x6b   :  { %1014 = vmatpush.msrb.mxu2 %v883_v24  ;;  %928 = vmatpush.msra.mxu3 %v927_v34  ;;  %v5030_v31 = vand.u32 4294901760, %v105_v0  ;;  %v81_v40 = vld [vmem:[#allocation5 + $0xa0] sm:$0xff] }
  0x6c   :  { %947 = vmatpush.msrb.mxu0 %v4880_v14  ;;  %834 = vmatpush.msra.mxu1 %v4841_v12  ;;  %v97_v12 = vld [vmem:[#allocation5 + $0x120] sm:$0xff]  ;;  %v5061_v24 = vand.u32 4294901760, %v81_v40 }
  0x6d   :  { %1018 = vmatpush.msrb.mxu2 %v889_v19  ;;  %1057 = vmatpush.msrb.mxu3 %v4837_v7  ;;  %v5040_v39 = vand.u32 4294901760, %v97_v12  ;;  %v65_v19 = vld [vmem:[#allocation5 + $0x20] sm:$0xff] }
  0x6e   :  { %807 = vmatmul.f32.vlgmr.msra.gmra.mxu0 %v4646_v63  ;;  %981 = vmatpush.msrb.mxu1 %v4837_v7  ;;  %v5028_v7 = vsub.f32 %v121_v49, %v5013_v2  ;;  %v5087_v21 = vsub.f32 %v81_v40, %v5061_v24 }
  0x6f   :  { %950 = vmatpush.msrb.mxu0 %v4893_v25  ;;  %1022 = vmatpush.msrb.mxu2 %v895_v36  ;;  %v122_v25 = vld [vmem:[#allocation5 + $0x1e8] sm:$0xff] }
  0x70   :  { %1059 = vmatpush.msrb.mxu3 %v4854_v35  ;;  %836 = vmatmul.f32.vlgmr.msra.gmra.mxu1 %v4646_v63  ;;  %v1120_v45 = vand.u32 4294901760, %v5028_v7  ;;  %v5089_v28 = vand.u32 4294901760, %v122_v25  ;;  %v114_v36 = vld [vmem:[#allocation5 + $0x1a8] sm:$0xff]  ;;  %v1150_v37 = vand.u32 4294901760, %v5087_v21 }
  0x71   :  { %953 = vmatpush.msrb.mxu0 %v4905_v9  ;;  %983 = vmatpush.msrb.mxu1 %v4854_v35  ;;  %v5038_v35 = vsub.f32 %v113_v52, %v5020_v6  ;;  %v5078_v9 = vand.u32 4294901760, %v73_v16 }
  0x72   :  { %1026 = vmatpush.msrb.mxu2 %v901_v8  ;;  %1061 = vmatpush.msrb.mxu3 %v4870_v43 }
  0x73   :  { %956 = vmatpush.msrb.mxu0 %v4921_v58  ;;  %985 = vmatpush.msrb.mxu1 %v4870_v43  ;;  %v5049_v43 = vsub.f32 %v105_v0, %v5030_v31  ;;  %v1126_v14 = vand.u32 4294901760, %v5038_v35  ;;  %v5104_v8 = vsub.f32 %v73_v16, %v5078_v9  ;;  %v5169_v16 = vand.u32 4294901760, %v82_v27 }
  0x74   :  { %1030 = vmatpush.msrb.mxu2 %v907_v46  ;;  %1063 = vmatpush.msrb.mxu3 %v4882_v23  ;;  %v98_v46 = vld [vmem:[#allocation5 + $0x128] sm:$0xff] }
  0x75   :  { %869 = vmatmul.f32.vlgmr.msra.gmra.mxu2 %v4724_v61  ;;  %959 = vmatpush.msrb.mxu0 %v4938_v38  ;;  %v1132_v18 = vand.u32 4294901760, %v5049_v43  ;;  %v1127_v10 = vsub.f32 %v5038_v35, %v1126_v14  ;;  %v5115_v38 = vsub.f32 %v122_v25, %v5089_v28  ;;  %v1156_v26 = vand.u32 4294901760, %v5104_v8 }
  0x76   :  { %987 = vmatpush.msrb.mxu1 %v4882_v23  ;;  %1034 = vmatpush.msrb.mxu2 %v913_v41  ;;  %v5059_v23 = vsub.f32 %v97_v12, %v5040_v39  ;;  %v74_v12 = vld [vmem:[#allocation5 + $0x68] sm:$0xff]  ;;  %v5173_v25 = vsub.f32 %v90_v29, %v5148_v51 }
  0x77   :  { %1065 = vmatpush.msrb.mxu3 %v4896_v4  ;;  %962 = vmatpush.msrb.mxu0 %v4951_v57  ;;  %v1133_v54 = vsub.f32 %v5049_v43, %v1132_v18  ;;  %v1128_v22 = vand.u32 4294901760, %v1127_v10  ;;  %v1145_v57 = vsub.f32 %v5073_v5, %v1144_v62  ;;  %v1357_v11 = vand.u32 4294901760, %v5115_v38 }
  0x78   :  { %930 = vmatmul.f32.vlgmr.msra.gmra.mxu3 %v4646_v63  ;;  %989 = vmatpush.msrb.mxu1 %v4896_v4  ;;  %v1121_v4 = vsub.f32 %v5028_v7, %v1120_v45  ;;  %v1138_v17 = vand.u32 4294901760, %v5059_v23  ;;  %v1157_v60 = vsub.f32 %v5104_v8, %v1156_v26 }
  0x79   :  { %1038 = vmatpush.msrb.mxu2 %v919_v3  ;;  %1067 = vmatpush.msrb.mxu3 %v4917_v53  ;;  %v1134_v56 = vand.u32 4294901760, %v1133_v54  ;;  %v1151_v3 = vsub.f32 %v5087_v21, %v1150_v37  ;;  %v1146_v20 = vand.u32 4294901760, %v1145_v57  ;;  %v1358_v0 = vsub.f32 %v5115_v38, %v1357_v11 }
  0x7a   :  { %965 = vmatpush.msrb.mxu0 %v4958_v15  ;;  %991 = vmatpush.msrb.mxu1 %v4917_v53  ;;  %v5093_v53 = vand.u32 4294901760, %v65_v19  ;;  %v1122_v58 = vand.u32 4294901760, %v1121_v4  ;;  %v1139_v32 = vsub.f32 %v5059_v23, %v1138_v17  ;;  %v5134_v15 = vand.u32 4294901760, %v98_v46  ;;  %v66_v4 = vld [vmem:[#allocation5 + $0x28] sm:$0xff] }
  0x7b   :  { %1042 = vmatpush.msrb.mxu2 %v925_v47  ;;  %1069 = vmatpush.msrb.mxu3 %v4929_v13  ;;  %v1152_v52 = vand.u32 4294901760, %v1151_v3  ;;  %v1359_v54 = vand.u32 4294901760, %v1358_v0 }
  0x7c   :  { %1086 = vmatpush.msra.mxu0 %v5013_v2  ;;  %993 = vmatpush.msrb.mxu1 %v4929_v13  ;;  %v5106_v13 = vand.u32 4294901760, %v114_v36  ;;  %v5120_v48 = vsub.f32 %v65_v19, %v5093_v53  ;;  %v1140_v50 = vand.u32 4294901760, %v1139_v32  ;;  %v5157_v49 = vsub.f32 %v98_v46, %v5134_v15 }
  0x7d   :  { %1181 = vmatpush.msra.mxu2 %v5028_v7  ;;  %1071 = vmatpush.msrb.mxu3 %v4940_v42  ;;  %v1158_v19 = vand.u32 4294901760, %v1157_v60  ;;  %v5190_v32 = vsub.f32 %v82_v27, %v5169_v16  ;;  %v5192_v46 = vand.u32 4294901760, %v66_v4 }
  0x7e   :  { %1044 = vmatmul.f32.vlgmr.msrb.gmra.mxu2 %v4646_v63  ;;  %1088 = vmatpush.msra.mxu0 %v5020_v6  ;;  %v5132_v41 = vsub.f32 %v114_v36, %v5106_v13  ;;  %v1162_v47 = vand.u32 4294901760, %v5120_v48  ;;  %v1375_v36 = vand.u32 4294901760, %v5157_v49 }
  0x7f   :  { %1184 = vmatpush.msra.mxu2 %v5038_v35  ;;  %1218 = vmatpush.msra.mxu3 %v5013_v2  ;;  %v5210_v3 = vsub.f32 %v66_v4, %v5192_v46 }
  0x80   :  { %995 = vmatpush.msrb.mxu1 %v4940_v42  ;;  %968 = vmatmul.f32.vlgmr.msrb.gmra.mxu0 %v4668_v30  ;;  %v5122_v42 = vand.u32 4294901760, %v106_v1  ;;  %v1363_v34 = vand.u32 4294901760, %v5132_v41  ;;  %v1163_v33 = vsub.f32 %v5120_v48, %v1162_v47  ;;  %v1376_v29 = vsub.f32 %v5157_v49, %v1375_v36 }
  0x81   :  { %1073 = vmatmul.f32.vlgmr.msrb.gmra.mxu3 %v4646_v63  ;;  %1090 = vmatpush.msra.mxu0 %v5030_v31 }
  0x82   :  { %1123 = vmatpush.msra.mxu1 %v1122_v58  ;;  %1187 = vmatpush.msra.mxu2 %v5049_v43  ;;  %v5145_v59 = vsub.f32 %v106_v1, %v5122_v42  ;;  %v1364_v10 = vsub.f32 %v5132_v41, %v1363_v34  ;;  %v5181_v58 = vand.u32 4294901760, %v74_v12  ;;  %v1164_v1 = vand.u32 4294901760, %v1163_v33 }
  0x83   :  { %1220 = vmatpush.msra.mxu3 %v5020_v6  ;;  %999 = vmatmul.f32.vlgmr.msrb.gmra.mxu1 %v4692_v44  ;;  %v1399_v43 = vand.u32 4294901760, %v5210_v3 }
  0x84   :  { %1092 = vmatpush.msra.mxu0 %v5040_v39  ;;  %1129 = vmatpush.msra.mxu1 %v1128_v22  ;;  %v1369_v40 = vand.u32 4294901760, %v5145_v59  ;;  %v1365_v57 = vand.u32 4294901760, %v1364_v10  ;;  %v108_v10 = vld [vmem:[#allocation5 + $0x178] sm:$0xff] }
  0x85   :  { %1190 = vmatpush.msra.mxu2 %v5059_v23  ;;  %1222 = vmatpush.msra.mxu3 %v5030_v31 }
  0x86   :  { %1094 = vmatpush.msra.mxu0 %v5051_v55  ;;  %1135 = vmatpush.msra.mxu1 %v1134_v56  ;;  %v1370_v22 = vsub.f32 %v5145_v59, %v1369_v40  ;;  %v1381_v56 = vand.u32 4294901760, %v5173_v25 }
  0x87   :  { %1193 = vmatpush.msra.mxu2 %v5073_v5  ;;  %1224 = vmatpush.msra.mxu3 %v5040_v39 }
  0x88   :  { %1096 = vmatpush.msra.mxu0 %v5061_v24  ;;  %1141 = vmatpush.msra.mxu1 %v1140_v50  ;;  %v5203_v50 = vsub.f32 %v74_v12, %v5181_v58  ;;  %v1371_v7 = vand.u32 4294901760, %v1370_v22  ;;  %v1382_v35 = vsub.f32 %v5173_v25, %v1381_v56 }
  0x89   :  { %1196 = vmatpush.msra.mxu2 %v5087_v21  ;;  %1226 = vmatpush.msra.mxu3 %v5051_v55 }
  0x8a   :  { %1098 = vmatpush.msra.mxu0 %v5078_v9  ;;  %1147 = vmatpush.msra.mxu1 %v1146_v20  ;;  %v1393_v20 = vand.u32 4294901760, %v5203_v50 }
  0x8b   :  { %1199 = vmatpush.msra.mxu2 %v5104_v8  ;;  %1228 = vmatpush.msra.mxu3 %v5061_v24  ;;  %v91_v8 = vld [vmem:[#allocation5 + $0xf0] sm:$0xff] }
  0x8c   :  { %1100 = vmatpush.msra.mxu0 %v5093_v53  ;;  %1153 = vmatpush.msra.mxu1 %v1152_v52 }
  0x8d   :  { %1202 = vmatpush.msra.mxu2 %v5120_v48  ;;  %1230 = vmatpush.msra.mxu3 %v5078_v9 }
  0x8e   :  { %1251 = vmatpush.msrb.mxu0 %v1120_v45  ;;  %1159 = vmatpush.msra.mxu1 %v1158_v19  ;;  %v1387_v45 = vand.u32 4294901760, %v5190_v32 }
  0x8f   :  { %1323 = vmatpush.msrb.mxu2 %v5089_v28  ;;  %1232 = vmatpush.msra.mxu3 %v5093_v53 }
  0x90   :  { %1255 = vmatpush.msrb.mxu0 %v1126_v14  ;;  %1165 = vmatpush.msra.mxu1 %v1164_v1  ;;  %v1377_v14 = vand.u32 4294901760, %v1376_v29 }
  0x91   :  { %1325 = vmatpush.msrb.mxu2 %v5106_v13  ;;  %1360 = vmatpush.msrb.mxu3 %v1359_v54 }
  0x92   :  { %1259 = vmatpush.msrb.mxu0 %v1132_v18  ;;  %1294 = vmatpush.msrb.mxu1 %v5013_v2  ;;  %v1388_v2 = vsub.f32 %v5190_v32, %v1387_v45  ;;  %v1383_v18 = vand.u32 4294901760, %v1382_v35 }
  0x93   :  { %1327 = vmatpush.msrb.mxu2 %v5122_v42  ;;  %1366 = vmatpush.msrb.mxu3 %v1365_v57  ;;  %v100_v57 = vld [vmem:[#allocation5 + $0x138] sm:$0xff] }
  0x94   :  { %1263 = vmatpush.msrb.mxu0 %v1138_v17  ;;  %1296 = vmatpush.msrb.mxu1 %v5020_v6  ;;  %v1394_v6 = vsub.f32 %v5203_v50, %v1393_v20  ;;  %v1389_v23 = vand.u32 4294901760, %v1388_v2  ;;  %v92_v2 = vld [vmem:[#allocation5 + $0xf8] sm:$0xff] }
  0x95   :  { %1329 = vmatpush.msrb.mxu2 %v5134_v15  ;;  %1372 = vmatpush.msrb.mxu3 %v1371_v7 }
  0x96   :  { %1267 = vmatpush.msrb.mxu0 %v1144_v62  ;;  %1298 = vmatpush.msrb.mxu1 %v5030_v31  ;;  %v1400_v31 = vsub.f32 %v5210_v3, %v1399_v43  ;;  %v1395_v5 = vand.u32 4294901760, %v1394_v6 }
  0x97   :  { %1331 = vmatpush.msrb.mxu2 %v5148_v51  ;;  %1378 = vmatpush.msrb.mxu3 %v1377_v14 }
  0x98   :  { %1205 = vmatmul.f32.vlgmr.msra.gmra.mxu2 %v4668_v30  ;;  %1271 = vmatpush.msrb.mxu0 %v1150_v37 }
  0x99   :  { %1300 = vmatpush.msrb.mxu1 %v5040_v39  ;;  %1333 = vmatpush.msrb.mxu2 %v5169_v16  ;;  %v1401_v39 = vand.u32 4294901760, %v1400_v31 }
  0x9a   :  { %1384 = vmatpush.msrb.mxu3 %v1383_v18  ;;  %1106 = vmatmul.f32.vlgmr.msra.gmra.mxu0 %v4724_v61 }
  0x9b   :  { %1236 = vmatmul.f32.vlgmr.msra.gmra.mxu3 %v4692_v44  ;;  %1275 = vmatpush.msrb.mxu0 %v1156_v26  ;;  %v5303_v26 = vand.u32 4294901760, %v91_v8 }
  0x9c   :  { %1302 = vmatpush.msrb.mxu1 %v5051_v55  ;;  %1335 = vmatpush.msrb.mxu2 %v5181_v58  ;;  %v123_v55 = vld [vmem:[#allocation5 + $0x1f0] sm:$0xff] }
  0x9d   :  { %1390 = vmatpush.msrb.mxu3 %v1389_v23  ;;  %1167 = vmatmul.f32.vlgmr.msra.gmra.mxu1 %v4646_v63  ;;  %v5265_v17 = vand.u32 4294901760, %v123_v55  ;;  %v5325_v60 = vsub.f32 %v91_v8, %v5303_v26  ;;  %v84_v23 = vld [vmem:[#allocation5 + $0xb8] sm:$0xff] }
  0x9e   :  { %1279 = vmatpush.msrb.mxu0 %v1162_v47  ;;  %1304 = vmatpush.msrb.mxu1 %v5061_v24  ;;  %v115_v24 = vld [vmem:[#allocation5 + $0x1b0] sm:$0xff] }
  0x9f   :  { %1337 = vmatpush.msrb.mxu2 %v5192_v46  ;;  %1396 = vmatpush.msrb.mxu3 %v1395_v5  ;;  %v5272_v21 = vand.u32 4294901760, %v115_v24  ;;  %v75_v47 = vld [vmem:[#allocation5 + $0x70] sm:$0xff]  ;;  %v1618_v19 = vand.u32 4294901760, %v5325_v60 }
  0xa0   :  { %1418 = vmatpush.msra.mxu0 %v5115_v38  ;;  %1306 = vmatpush.msrb.mxu1 %v5078_v9  ;;  %v107_v9 = vld [vmem:[#allocation5 + $0x170] sm:$0xff] }
  0xa1   :  { %1488 = vmatpush.msra.mxu2 %v1357_v11  ;;  %1402 = vmatpush.msrb.mxu3 %v1401_v39  ;;  %v5282_v62 = vand.u32 4294901760, %v107_v9  ;;  %v83_v38 = vld [vmem:[#allocation5 + $0xb0] sm:$0xff]  ;;  %v5406_v39 = vand.u32 4294901760, %v92_v2 }
  0xa2   :  { %1421 = vmatpush.msra.mxu0 %v5132_v41  ;;  %1308 = vmatpush.msrb.mxu1 %v5093_v53  ;;  %v99_v53 = vld [vmem:[#allocation5 + $0x130] sm:$0xff]  ;;  %v5313_v11 = vand.u32 4294901760, %v83_v38 }
  0xa3   :  { %1492 = vmatpush.msra.mxu2 %v1363_v34  ;;  %1531 = vmatpush.msra.mxu3 %v5089_v28  ;;  %v5292_v37 = vand.u32 4294901760, %v99_v53  ;;  %v67_v34 = vld [vmem:[#allocation5 + $0x30] sm:$0xff] }
  0xa4   :  { %1281 = vmatmul.f32.vlgmr.msrb.gmra.mxu0 %v4646_v63  ;;  %1455 = vmatpush.msra.mxu1 %v5089_v28  ;;  %v5280_v28 = vsub.f32 %v123_v55, %v5265_v17  ;;  %v5339_v12 = vsub.f32 %v83_v38, %v5313_v11 }
  0xa5   :  { %1424 = vmatpush.msra.mxu0 %v5145_v59  ;;  %1496 = vmatpush.msra.mxu2 %v1369_v40  ;;  %v124_v59 = vld [vmem:[#allocation5 + $0x1f8] sm:$0xff] }
  0xa6   :  { %1533 = vmatpush.msra.mxu3 %v5106_v13  ;;  %1310 = vmatmul.f32.vlgmr.msrb.gmra.mxu1 %v4646_v63  ;;  %v1594_v48 = vand.u32 4294901760, %v5280_v28  ;;  %v5341_v33 = vand.u32 4294901760, %v124_v59  ;;  %v116_v40 = vld [vmem:[#allocation5 + $0x1b8] sm:$0xff]  ;;  %v1624_v22 = vand.u32 4294901760, %v5339_v12 }
  0xa7   :  { %1427 = vmatpush.msra.mxu0 %v5157_v49  ;;  %1457 = vmatpush.msra.mxu1 %v5106_v13  ;;  %v5290_v13 = vsub.f32 %v115_v24, %v5272_v21  ;;  %v5330_v49 = vand.u32 4294901760, %v75_v47 }
  0xa8   :  { %1500 = vmatpush.msra.mxu2 %v1375_v36  ;;  %1535 = vmatpush.msra.mxu3 %v5122_v42  ;;  %v1625_v35 = vsub.f32 %v5339_v12, %v1624_v22 }
  0xa9   :  { %1430 = vmatpush.msra.mxu0 %v5173_v25  ;;  %1459 = vmatpush.msra.mxu1 %v5122_v42  ;;  %v5301_v42 = vsub.f32 %v107_v9, %v5282_v62  ;;  %v1600_v41 = vand.u32 4294901760, %v5290_v13  ;;  %v5356_v36 = vsub.f32 %v75_v47, %v5330_v49  ;;  %v5421_v47 = vand.u32 4294901760, %v84_v23 }
  0xaa   :  { %1504 = vmatpush.msra.mxu2 %v1381_v56  ;;  %1537 = vmatpush.msra.mxu3 %v5134_v15  ;;  %v1626_v55 = vand.u32 4294901760, %v1625_v35 }
  0xab   :  { %1343 = vmatmul.f32.vlgmr.msrb.gmra.mxu2 %v4724_v61  ;;  %1433 = vmatpush.msra.mxu0 %v5190_v32  ;;  %v1606_v27 = vand.u32 4294901760, %v5301_v42  ;;  %v1601_v52 = vsub.f32 %v5290_v13, %v1600_v41  ;;  %v5367_v32 = vsub.f32 %v124_v59, %v5341_v33  ;;  %v1630_v7 = vand.u32 4294901760, %v5356_v36  ;;  %v68_v59 = vld [vmem:[#allocation5 + $0x38] sm:$0xff] }
  0xac   :  { %1461 = vmatpush.msra.mxu1 %v5134_v15  ;;  %1508 = vmatpush.msra.mxu2 %v1387_v45  ;;  %v5311_v15 = vsub.f32 %v99_v53, %v5292_v37  ;;  %v76_v53 = vld [vmem:[#allocation5 + $0x78] sm:$0xff] }
  0xad   :  { %1539 = vmatpush.msra.mxu3 %v5148_v51  ;;  %1436 = vmatpush.msra.mxu0 %v5203_v50  ;;  %v1607_v4 = vsub.f32 %v5301_v42, %v1606_v27  ;;  %v1602_v54 = vand.u32 4294901760, %v1601_v52  ;;  %v1619_v50 = vsub.f32 %v5325_v60, %v1618_v19  ;;  %v1831_v14 = vand.u32 4294901760, %v5367_v32 }
  0xae   :  { %1404 = vmatmul.f32.vlgmr.msrb.gmra.mxu3 %v4646_v63  ;;  %1463 = vmatpush.msra.mxu1 %v5148_v51  ;;  %v1595_v51 = vsub.f32 %v5280_v28, %v1594_v48  ;;  %v1612_v0 = vand.u32 4294901760, %v5311_v15  ;;  %v1631_v31 = vsub.f32 %v5356_v36, %v1630_v7  ;;  %v5430_v52 = vsub.f32 %v92_v2, %v5406_v39 }
  0xaf   :  { %1512 = vmatpush.msra.mxu2 %v1393_v20  ;;  %1541 = vmatpush.msra.mxu3 %v5169_v16  ;;  %v1608_v29 = vand.u32 4294901760, %v1607_v4  ;;  %v5391_v20 = vand.u32 4294901760, %v100_v57  ;;  %v1620_v6 = vand.u32 4294901760, %v1619_v50  ;;  %v1832_v24 = vsub.f32 %v5367_v32, %v1831_v14 }
  0xb0   :  { %1439 = vmatpush.msra.mxu0 %v5210_v3  ;;  %1465 = vmatpush.msra.mxu1 %v5169_v16  ;;  %v5345_v16 = vand.u32 4294901760, %v67_v34  ;;  %v1596_v25 = vand.u32 4294901760, %v1595_v51  ;;  %v1613_v1 = vsub.f32 %v5311_v15, %v1612_v0  ;;  %v1632_v51 = vand.u32 4294901760, %v1631_v31 }
  0xb1   :  { %1516 = vmatpush.msra.mxu2 %v1399_v43  ;;  %1543 = vmatpush.msra.mxu3 %v5181_v58  ;;  %v5413_v9 = vsub.f32 %v100_v57, %v5391_v20  ;;  %v5444_v57 = vand.u32 4294901760, %v68_v59  ;;  %v1855_v50 = vand.u32 4294901760, %v5430_v52 }
  0xb2   :  { %1560 = vmatpush.msrb.mxu0 %v5265_v17  ;;  %1467 = vmatpush.msra.mxu1 %v5181_v58  ;;  %v5358_v58 = vand.u32 4294901760, %v116_v40  ;;  %v5372_v56 = vsub.f32 %v67_v34, %v5345_v16  ;;  %v1614_v3 = vand.u32 4294901760, %v1613_v1  ;;  %v5442_v1 = vsub.f32 %v84_v23, %v5421_v47 }
  0xb3   :  { %1655 = vmatpush.msrb.mxu2 %v5280_v28  ;;  %1545 = vmatpush.msra.mxu3 %v5192_v46  ;;  %v1849_v4 = vand.u32 4294901760, %v5413_v9  ;;  %v5462_v2 = vsub.f32 %v68_v59, %v5444_v57 }
  0xb4   :  { %1518 = vmatmul.f32.vlgmr.msra.gmra.mxu2 %v4646_v63  ;;  %1562 = vmatpush.msrb.mxu0 %v5272_v21  ;;  %v5384_v45 = vsub.f32 %v116_v40, %v5358_v58  ;;  %v1636_v43 = vand.u32 4294901760, %v5372_v56  ;;  %v5432_v40 = vand.u32 4294901760, %v76_v53  ;;  %v1861_v35 = vand.u32 4294901760, %v5442_v1 }
  0xb5   :  { %1658 = vmatpush.msrb.mxu2 %v5290_v13  ;;  %1692 = vmatpush.msrb.mxu3 %v5265_v17  ;;  %v1850_v28 = vsub.f32 %v5413_v9, %v1849_v4  ;;  %v1856_v13 = vsub.f32 %v5430_v52, %v1855_v50 }
  0xb6   :  { %1469 = vmatpush.msra.mxu1 %v5192_v46  ;;  %1442 = vmatmul.f32.vlgmr.msra.gmra.mxu0 %v4668_v30  ;;  %v5374_v46 = vand.u32 4294901760, %v108_v10  ;;  %v1837_v5 = vand.u32 4294901760, %v5384_v45  ;;  %v1637_v8 = vsub.f32 %v5372_v56, %v1636_v43 }
  0xb7   :  { %1547 = vmatmul.f32.vlgmr.msra.gmra.mxu3 %v4646_v63  ;;  %1564 = vmatpush.msrb.mxu0 %v5282_v62 }
  0xb8   :  { %1597 = vmatpush.msrb.mxu1 %v1596_v25  ;;  %1661 = vmatpush.msrb.mxu2 %v5301_v42  ;;  %v5397_v18 = vsub.f32 %v108_v10, %v5374_v46  ;;  %v1838_v34 = vsub.f32 %v5384_v45, %v1837_v5  ;;  %v1833_v25 = vand.u32 4294901760, %v1832_v24  ;;  %v1638_v10 = vand.u32 4294901760, %v1637_v8 }
  0xb9   :  { %1694 = vmatpush.msrb.mxu3 %v5272_v21  ;;  %1473 = vmatmul.f32.vlgmr.msra.gmra.mxu1 %v4692_v44  ;;  %v1873_v42 = vand.u32 4294901760, %v5462_v2 }
  0xba   :  { %1566 = vmatpush.msrb.mxu0 %v5292_v37  ;;  %1603 = vmatpush.msrb.mxu1 %v1602_v54  ;;  %v1843_v38 = vand.u32 4294901760, %v5397_v18 }
  0xbb   :  { %1664 = vmatpush.msrb.mxu2 %v5311_v15  ;;  %1696 = vmatpush.msrb.mxu3 %v5282_v62 }
  0xbc   :  { %1568 = vmatpush.msrb.mxu0 %v5303_v26  ;;  %1609 = vmatpush.msrb.mxu1 %v1608_v29  ;;  %v1844_v54 = vsub.f32 %v5397_v18, %v1843_v38  ;;  %v1839_v29 = vand.u32 4294901760, %v1838_v34 }
  0xbd   :  { %1667 = vmatpush.msrb.mxu2 %v5325_v60  ;;  %1698 = vmatpush.msrb.mxu3 %v5292_v37  ;;  %v1874_v60 = vsub.f32 %v5462_v2, %v1873_v42 }
  0xbe   :  { %1570 = vmatpush.msrb.mxu0 %v5313_v11  ;;  %1615 = vmatpush.msrb.mxu1 %v1614_v3  ;;  %v5452_v3 = vsub.f32 %v76_v53, %v5432_v40 }
  0xbf   :  { %1670 = vmatpush.msrb.mxu2 %v5339_v12  ;;  %1700 = vmatpush.msrb.mxu3 %v5303_v26 }
  0xc0   :  { %1572 = vmatpush.msrb.mxu0 %v5330_v49  ;;  %1621 = vmatpush.msrb.mxu1 %v1620_v6  ;;  %v1851_v6 = vand.u32 4294901760, %v1850_v28 }
  0xc1   :  { %1673 = vmatpush.msrb.mxu2 %v5356_v36  ;;  %1702 = vmatpush.msrb.mxu3 %v5313_v11 }
  0xc2   :  { %1574 = vmatpush.msrb.mxu0 %v5345_v16  ;;  %1627 = vmatpush.msrb.mxu1 %v1626_v55 }
  0xc3   :  { %1676 = vmatpush.msrb.mxu2 %v5372_v56  ;;  %1704 = vmatpush.msrb.mxu3 %v5330_v49 }
  0xc4   :  { %1725 = vmatpush.msra.mxu0 %v1594_v48  ;;  %1633 = vmatpush.msrb.mxu1 %v1632_v51  ;;  %v1845_v48 = vand.u32 4294901760, %v1844_v54 }
  0xc5   :  { %1797 = vmatpush.msra.mxu2 %v5341_v33  ;;  %1706 = vmatpush.msrb.mxu3 %v5345_v16 }
  0xc6   :  { %1729 = vmatpush.msra.mxu0 %v1600_v41  ;;  %1639 = vmatpush.msrb.mxu1 %v1638_v10  ;;  %v1867_v41 = vand.u32 4294901760, %v5452_v3 }
  0xc7   :  { %1799 = vmatpush.msra.mxu2 %v5358_v58  ;;  %1834 = vmatpush.msra.mxu3 %v1833_v25 }
  0xc8   :  { %1733 = vmatpush.msra.mxu0 %v1606_v27  ;;  %1768 = vmatpush.msra.mxu1 %v5265_v17  ;;  %v1862_v17 = vsub.f32 %v5442_v1, %v1861_v35  ;;  %v1868_v15 = vsub.f32 %v5452_v3, %v1867_v41 }
  0xc9   :  { %1801 = vmatpush.msra.mxu2 %v5374_v46  ;;  %1840 = vmatpush.msra.mxu3 %v1839_v29 }
  0xca   :  { %1737 = vmatpush.msra.mxu0 %v1612_v0  ;;  %1770 = vmatpush.msra.mxu1 %v5272_v21  ;;  %v1857_v21 = vand.u32 4294901760, %v1856_v13  ;;  %v1863_v27 = vand.u32 4294901760, %v1862_v17  ;;  %v1875_v0 = vand.u32 4294901760, %v1874_v60 }
  0xcb   :  { %1803 = vmatpush.msra.mxu2 %v5391_v20  ;;  %1846 = vmatpush.msra.mxu3 %v1845_v48 }
  0xcc   :  { %1679 = vmatmul.f32.vlgmr.msrb.gmra.mxu2 %v4668_v30  ;;  %1741 = vmatpush.msra.mxu0 %v1618_v19 }
  0xcd   :  { %1772 = vmatpush.msra.mxu1 %v5282_v62  ;;  %1805 = vmatpush.msra.mxu2 %v5406_v39  ;;  %v1869_v62 = vand.u32 4294901760, %v1868_v15 }
  0xce   :  { %1852 = vmatpush.msra.mxu3 %v1851_v6  ;;  %1580 = vmatmul.f32.vlgmr.msrb.gmra.mxu0 %v4724_v61 }
  0xcf   :  { %1710 = vmatmul.f32.vlgmr.msrb.gmra.mxu3 %v4692_v44  ;;  %1745 = vmatpush.msra.mxu0 %v1624_v22 }
  0xd0   :  { %1774 = vmatpush.msra.mxu1 %v5292_v37  ;;  %1807 = vmatpush.msra.mxu2 %v5421_v47  ;;  %v220_v37 = vpop.f32.mrf.mxu1 }
  0xd1   :  { %1858 = vmatpush.msra.mxu3 %v1857_v21  ;;  %1641 = vmatmul.f32.vlgmr.msrb.gmra.mxu1 %v4646_v63 }
  0xd2   :  { %1749 = vmatpush.msra.mxu0 %v1630_v7  ;;  %1776 = vmatpush.msra.mxu1 %v5303_v26  ;;  %v258_v26 = vpop.f32.mrf.mxu2 }
  0xd3   :  { %1809 = vmatpush.msra.mxu2 %v5432_v40  ;;  %1864 = vmatpush.msra.mxu3 %v1863_v27 }
  0xd4   :  { %1753 = vmatpush.msra.mxu0 %v1636_v43  ;;  %1778 = vmatpush.msra.mxu1 %v5313_v11  ;;  %v5552_v11 = vpop.f32.mrf.mxu3 }
  0xd5   :  { %1811 = vmatpush.msra.mxu2 %v5444_v57  ;;  %1870 = vmatpush.msra.mxu3 %v1869_v62 }
  0xd6   :  { %1892 = vmatpush.msrb.mxu0 %v5367_v32  ;;  %1780 = vmatpush.msra.mxu1 %v5330_v49 }
  0xd7   :  { %1962 = vmatpush.msrb.mxu2 %v1831_v14  ;;  %1876 = vmatpush.msra.mxu3 %v1875_v0 }
  0xd8   :  { %1895 = vmatpush.msrb.mxu0 %v5384_v45  ;;  %1782 = vmatpush.msra.mxu1 %v5345_v16 }
  0xd9   :  { %1966 = vmatpush.msrb.mxu2 %v1837_v5  ;;  %2005 = vmatpush.msrb.mxu3 %v5341_v33 }
  0xda   :  { %1755 = vmatmul.f32.vlgmr.msra.gmra.mxu0 %v4646_v63  ;;  %1929 = vmatpush.msrb.mxu1 %v5341_v33  ;;  %v396_v12 = vpop.f32.mrf.mxu2 }
  0xdb   :  { %1898 = vmatpush.msrb.mxu0 %v5397_v18  ;;  %1970 = vmatpush.msrb.mxu2 %v1843_v38 }
  0xdc   :  { %2007 = vmatpush.msrb.mxu3 %v5358_v58  ;;  %1784 = vmatmul.f32.vlgmr.msra.gmra.mxu1 %v4646_v63  ;;  %v457_v33 = vpop.f32.mrf.mxu3 }
  0xdd   :  { %1901 = vmatpush.msrb.mxu0 %v5413_v9  ;;  %1931 = vmatpush.msrb.mxu1 %v5358_v58  ;;  %v458_v48 = vadd.f32 %v457_v33, %v396_v12 }
  0xde   :  { %1974 = vmatpush.msrb.mxu2 %v1849_v4  ;;  %2009 = vmatpush.msrb.mxu3 %v5374_v46 }
  0xdf   :  { %1817 = vmatmul.f32.vlgmr.msra.gmra.mxu2 %v4724_v61  ;;  %1878 = vmatmul.f32.vlgmr.msra.gmra.mxu3 %v4646_v63  ;;  %v159_v61 = vpop.f32.mrf.mxu0 }
  0xe0   :  { %1904 = vmatpush.msrb.mxu0 %v5430_v52  ;;  %1933 = vmatpush.msrb.mxu1 %v5374_v46  ;;  %v221_v13 = vadd.f32 %v220_v37, %v159_v61  ;;  %v2025_v61 = vld [vmem:[#allocation7 + $0x280] sm:$0xff] }
  0xe1   :  { %1978 = vmatpush.msrb.mxu2 %v1855_v50  ;;  %2011 = vmatpush.msrb.mxu3 %v5391_v20 }
  0xe2   :  { %1907 = vmatpush.msrb.mxu0 %v5442_v1  ;;  %1935 = vmatpush.msrb.mxu1 %v5391_v20  ;;  %v5558_v36 = vpop.f32.mrf.mxu2 }
  0xe3   :  { %1982 = vmatpush.msrb.mxu2 %v1861_v35  ;;  %2013 = vmatpush.msrb.mxu3 %v5406_v39 }
  0xe4   :  { %1910 = vmatpush.msrb.mxu0 %v5452_v3  ;;  %1937 = vmatpush.msrb.mxu1 %v5406_v39 }
  0xe5   :  { %1986 = vmatpush.msrb.mxu2 %v1867_v41  ;;  %2015 = vmatpush.msrb.mxu3 %v5421_v47 }
  0xe6   :  { %1913 = vmatpush.msrb.mxu0 %v5462_v2  ;;  %1939 = vmatpush.msrb.mxu1 %v5421_v47 }
  0xe7   :  { %1990 = vmatpush.msrb.mxu2 %v1873_v42  ;;  %2017 = vmatpush.msrb.mxu3 %v5432_v40  ;;  %v5554_v49 = vpop.f32.mrf.mxu0 }
  0xe8   :  { %1916 = vmatmul.f32.vlgmr.msrb.gmra.mxu0 %v4668_v30  ;;  %1992 = vmatmul.f32.vlgmr.msrb.gmra.mxu2 %v4646_v63  ;;  %v5556_v30 = vpop.f32.mrf.mxu1 }
  0xe9   :  { %1941 = vmatpush.msrb.mxu1 %v5432_v40  ;;  %2019 = vmatpush.msrb.mxu3 %v5444_v57 }
  0xea   :  { %2021 = vmatmul.f32.vlgmr.msrb.gmra.mxu3 %v4646_v63  ;;  %v5560_v63 = vpop.f32.mrf.mxu3 }
  0xeb   :  { %1943 = vmatpush.msrb.mxu1 %v5444_v57 }
  0xec   :  { %1947 = vmatmul.f32.vlgmr.msrb.gmra.mxu1 %v4692_v44  ;;  %v732_v44 = vpop.f32.mrf.mxu2 }
  0xef   :  { %v495_v16 = vpop.f32.mrf.mxu0 }
  0xf0   :  { %v526_v19 = vpop.f32.mrf.mxu1  ;;  %v496_v27 = vadd.f32 %v495_v16, %v458_v48 }
  0xf2   :  { %v763_v32 = vpop.f32.mrf.mxu3 }
  0xf7   :  { %v633_v58 = vpop.f32.mrf.mxu0 }
  0xf8   :  { %v694_v22 = vpop.f32.mrf.mxu1  ;;  %v870_v7 = vpop.f32.mrf.mxu2 }
  0xf9   :  { %v695_v29 = vadd.f32 %v694_v22, %v633_v58 }
  0xfb   :  { %v931_v45 = vpop.f32.mrf.mxu3  ;;  %v733_v41 = vadd.f32 %v732_v44, %v695_v29 }
  0xfc   :  { %v932_v1 = vadd.f32 %v931_v45, %v870_v7  ;;  %v259_v7 = vadd.f32 %v258_v26, %v221_v13  ;;  %v2054_v26 = vsel %vm125_vm0, %v2025_v61, 0 }
  0xfd   :  { %v764_v45 = vadd.f32 %v763_v32, %v733_v41 }
  0xfe   :  { %v290_v37 = vadd.f32 %v5552_v11, %v259_v7 }
  0xff   :  { %v808_v56 = vpop.f32.mrf.mxu0 }
 0x100   :  { %v5562_v46 = vpop.f32.mrf.mxu1  ;;  %v809_v44 = vadd.f32 %v808_v56, %v764_v45 }
 0x101   :  { %v1045_v43 = vpop.f32.mrf.mxu2 }
 0x104   :  { %v1074_v18 = vpop.f32.mrf.mxu3 }
 0x107   :  { %v969_v14 = vpop.f32.mrf.mxu0 }
 0x108   :  { %v1000_v20 = vpop.f32.mrf.mxu1  ;;  %v970_v35 = vadd.f32 %v969_v14, %v932_v1 }
 0x10a   :  { %v1001_v60 = vadd.f32 %v1000_v20, %v970_v35 }
 0x10c   :  { %v1046_v12 = vadd.f32 %v1045_v43, %v1001_v60  ;;  %v335_v43 = vadd.f32 %v5554_v49, %v290_v37  ;;  %v2026_v49 = vld [vmem:[#allocation7 + $0x288] sm:$0xff] }
 0x117   :  { %v1107_v23 = vpop.f32.mrf.mxu0 }
 0x11a   :  { %v1168_v31 = vpop.f32.mrf.mxu1 }
 0x11b   :  { %v1206_v5 = vpop.f32.mrf.mxu2  ;;  %v1169_v4 = vadd.f32 %v1168_v31, %v1107_v23  ;;  %v527_v31 = vadd.f32 %v526_v19, %v496_v27 }
 0x11d   :  { %v1207_v50 = vadd.f32 %v1206_v5, %v1169_v4  ;;  %v572_v32 = vadd.f32 %v5558_v36, %v527_v31  ;;  %v2029_v4 = vld [vmem:[#allocation7 + $0x3c8] sm:$0xff] }
 0x11e   :  { %v1237_v39 = vpop.f32.mrf.mxu3 }
 0x11f   :  { %v1238_v6 = vadd.f32 %v1237_v39, %v1207_v50 }
 0x121   :  { %v1282_v55 = vpop.f32.mrf.mxu0 }
 0x122   :  { %v1283_v58 = vadd.f32 %v1282_v55, %v1238_v6  ;;  %v1075_v55 = vadd.f32 %v1074_v18, %v1046_v12 }
 0x123   :  { %v1311_v24 = vpop.f32.mrf.mxu1 }
 0x124   :  { %v1312_v5 = vadd.f32 %v1311_v24, %v1283_v58  ;;  %v5581_v36 = vand.u32 4294901760, %v1075_v55 }
 0x126   :  { %v5573_v11 = vand.u32 4294901760, %v1312_v5  ;;  %v5609_v1 = vsub.f32 %v1075_v55, %v5581_v36 }
 0x12e   :  { %v1344_v9 = vpop.f32.mrf.mxu2 }
 0x131   :  { %v1405_v53 = vpop.f32.mrf.mxu3 }
 0x132   :  { %v1406_v25 = vadd.f32 %v1405_v53, %v1344_v9 }
 0x133   :  { %v1443_v8 = vpop.f32.mrf.mxu0 }
 0x134   :  { %v1444_v57 = vadd.f32 %v1443_v8, %v1406_v25  ;;  %v838_v8 = vadd.f32 %v5562_v46, %v809_v44  ;;  %v364_v46 = vadd.f32 %v5556_v30, %v335_v43  ;;  %v2057_v30 = vsel %vm125_vm0, %v2026_v49, 0 }
 0x135   :  { %v5631_v13 = vand.u32 4294901760, %v2057_v30 }
 0x136   :  { %v1474_v38 = vpop.f32.mrf.mxu1  ;;  %v5615_v50 = vand.u32 4294901760, %v364_v46 }
 0x137   :  { %v1519_v47 = vpop.f32.mrf.mxu2  ;;  %v1475_v2 = vadd.f32 %v1474_v38, %v1444_v57  ;;  %v5655_v7 = vsub.f32 %v2057_v30, %v5631_v13 }
 0x139   :  { %v1520_v62 = vadd.f32 %v1519_v47, %v1475_v2  ;;  %v5578_v47 = vand.u32 4294901760, %v2054_v26  ;;  %v2099_v61 = vand.u32 4294901760, %v5655_v7 }
 0x13a   :  { %v1548_v59 = vpop.f32.mrf.mxu3 }
 0x13b   :  { %v1549_v33 = vadd.f32 %v1548_v59, %v1520_v62  ;;  %v601_v59 = vadd.f32 %v5560_v63, %v572_v32  ;;  %v5601_v25 = vsub.f32 %v2054_v26, %v5578_v47  ;;  %v2100_v26 = vsub.f32 %v5655_v7, %v2099_v61 }
 0x13d   :  { %v5569_v53 = vand.u32 4294901760, %v1549_v33  ;;  %v2091_v2 = vand.u32 4294901760, %v5601_v25 }
 0x13f   :  { %v5584_v18 = vsub.f32 %v1549_v33, %v5569_v53 }
 0x141   :  { %v2144_v29 = vand.u32 4294901760, %v5584_v18 }
 0x14b   :  { %v1581_v51 = vpop.f32.mrf.mxu0 }
 0x14e   :  { %v1642_v34 = vpop.f32.mrf.mxu1 }
 0x14f   :  { %v1643_v52 = vadd.f32 %v1642_v34, %v1581_v51  ;;  %v1680_v40 = vpop.f32.mrf.mxu2  ;;  %v5589_v34 = vand.u32 4294901760, %v838_v8 }
 0x151   :  { %v1681_v10 = vadd.f32 %v1680_v40, %v1643_v52  ;;  %v5592_v52 = vsub.f32 %v1312_v5, %v5573_v11 }
 0x152   :  { %v1711_v54 = vpop.f32.mrf.mxu3 }
 0x153   :  { %v1712_v28 = vadd.f32 %v1711_v54, %v1681_v10  ;;  %v6464_v10 = vmov 0   ;;  %v5606_v54 = vand.u32 4294901760, %v601_v59 }
 0x154   :  { %4340 = vset.pattern.permute.xlu0 %v6464_v10  ;;  %4341 = vset.pattern.permute.xlu1 %v6464_v10 }
 0x155   :  { %2035 = vperm.xlu0 %4340, %v2029_v4   ;;  %4342 = vset.pattern.permute.xlu2 %v6464_v10  ;;  %v5636_v41 = vsub.f32 %v601_v59, %v5606_v54 }
 0x157   :  { %v1756_v3 = vpop.f32.mrf.mxu0 }
 0x158   :  { %v1757_v42 = vadd.f32 %v1756_v3, %v1712_v28  ;;  %v5618_v3 = vsub.f32 %v838_v8, %v5589_v34  ;;  %v2150_v28 = vand.u32 4294901760, %v5592_v52  ;;  %v2031_v8 = vld [vmem:[#allocation7 + $0x3d8] sm:$0xff] }
 0x159   :  { %v1785_v17 = vpop.f32.mrf.mxu1  ;;  %2045 = vperm.xlu1 %4341, %v2031_v8   ;;  %v2424_v8 = vld [vmem:[#allocation7 + $0x28] sm:$0xff] }
 0x15a   :  { %v1786_v23 = vadd.f32 %v1785_v17, %v1757_v42  ;;  %v2145_v17 = vsub.f32 %v5584_v18, %v2144_v29  ;;  %v2156_v42 = vand.u32 4294901760, %v5609_v1  ;;  %v2162_v27 = vand.u32 4294901760, %v5618_v3 }
 0x15b   :  { %v2151_v62 = vsub.f32 %v5592_v52, %v2150_v28 }
 0x15c   :  { %v5565_v9 = vand.u32 4294901760, %v1786_v23  ;;  %v2146_v58 = vand.u32 4294901760, %v2145_v17  ;;  %v2163_v31 = vsub.f32 %v5618_v3, %v2162_v27 }
 0x15d   :  { %v2152_v33 = vand.u32 4294901760, %v2151_v62 }
 0x15e   :  { %v5576_v24 = vsub.f32 %v1786_v23, %v5565_v9  ;;  %v2168_v23 = vand.u32 4294901760, %v5636_v41 }
 0x160   :  { %v2138_v63 = vand.u32 4294901760, %v5576_v24  ;;  %v2169_v5 = vsub.f32 %v5636_v41, %v2168_v23 }
 0x162   :  { %v1818_v21 = vpop.f32.mrf.mxu2  ;;  %v1879_v15 = vpop.f32.mrf.mxu3  ;;  %v2139_v35 = vsub.f32 %v5576_v24, %v2138_v63  ;;  %v2170_v43 = vand.u32 4294901760, %v2169_v5 }
 0x163   :  { %v1880_v0 = vadd.f32 %v1879_v15, %v1818_v21  ;;  %v2027_v21 = vld [vmem:[#allocation7 + $0x290] sm:$0xff]  ;;  %v5645_v15 = vsub.f32 %v364_v46, %v5615_v50 }
 0x164   :  { %v2140_v60 = vand.u32 4294901760, %v2139_v35  ;;  %v2060_v45 = vsel %vm125_vm0, %v2027_v21, 0 }
 0x165   :  { %v1917_v22 = vpop.f32.mrf.mxu0  ;;  %v2174_v12 = vand.u32 4294901760, %v5645_v15  ;;  %v5673_v37 = vand.u32 4294901760, %v2060_v45 }
 0x166   :  { %v1918_v14 = vadd.f32 %v1917_v22, %v1880_v0  ;;  %v2092_v0 = vsub.f32 %v5601_v25, %v2091_v2  ;;  %v2157_v22 = vsub.f32 %v5609_v1, %v2156_v42 }
 0x167   :  { %v2106_v32 = vsub.f32 %v2060_v45, %v5673_v37 }
 0x168   :  { %v2158_v44 = vand.u32 4294901760, %v2157_v22  ;;  %v2427_v22 = vld [vmem:[#allocation7 + $0x40] sm:$0xff] }
 0x169   :  { %v1948_v39 = vpop.f32.mrf.mxu1  ;;  %v2107_v59 = vand.u32 4294901760, %v2106_v32 }
 0x16a   :  { %v1949_v16 = vadd.f32 %v1948_v39, %v1918_v14  ;;  %v2093_v14 = vand.u32 4294901760, %v2092_v0  ;;  %v2028_v39 = vld [vmem:[#allocation7 + $0x298] sm:$0xff] }
 0x16b   :  { %v1993_v20 = vpop.f32.mrf.mxu2  ;;  %v2063_v55 = vsel %vm125_vm0, %v2028_v39, 0 }
 0x16c   :  { %v1994_v19 = vadd.f32 %v1993_v20, %v1949_v16  ;;  %v2164_v16 = vand.u32 4294901760, %v2163_v31  ;;  %v2175_v20 = vsub.f32 %v5645_v15, %v2174_v12  ;;  %v2113_v49 = vand.u32 4294901760, %v2063_v55 }
 0x16d   :  { %v2022_v56 = vpop.f32.mrf.mxu3 }
 0x16e   :  { %v2023_v38 = vadd.f32 %v2022_v56, %v1994_v19  ;;  %v2030_v19 = vld [vmem:[#allocation7 + $0x3d0] sm:$0xff]  ;;  %v2176_v56 = vand.u32 4294901760, %v2175_v20  ;;  %v2114_v46 = vsub.f32 %v2063_v55, %v2113_v49 }
 0x16f   :  { %2040 = vperm.xlu0 %4340, %v2030_v19   ;;  %v2425_v20 = vld [vmem:[#allocation7 + $0x30] sm:$0xff] }
 0x170   :  { %v5586_v51 = vand.u32 4294901760, %v2023_v38  ;;  %v5814_v19 = vand.u32 4294901760, %v2425_v20 }
 0x172   :  { %v5595_v40 = vsub.f32 %v2023_v38, %v5586_v51  ;;  %2074 = vmatpush.msra.mxu0 %v5586_v51  ;;  %2257 = vmatpush.msra.mxu3 %v5586_v51  ;;  %v2101_v38 = vand.u32 4294901760, %v2100_v26 }
 0x174   :  { %v2132_v57 = vand.u32 4294901760, %v5595_v40  ;;  %2076 = vmatpush.msra.mxu0 %v5565_v9  ;;  %2205 = vmatpush.msra.mxu2 %v5595_v40 }
 0x175   :  { %2259 = vmatpush.msra.mxu3 %v5565_v9 }
 0x176   :  { %2078 = vmatpush.msra.mxu0 %v5569_v53  ;;  %2208 = vmatpush.msra.mxu2 %v5576_v24  ;;  %v2133_v48 = vsub.f32 %v5595_v40, %v2132_v57  ;;  %v2108_v24 = vsub.f32 %v2106_v32, %v2107_v59  ;;  %v2115_v40 = vand.u32 4294901760, %v2114_v46 }
 0x177   :  { %2261 = vmatpush.msra.mxu3 %v5569_v53 }
 0x178   :  { %2080 = vmatpush.msra.mxu0 %v5573_v11  ;;  %2211 = vmatpush.msra.mxu2 %v5584_v18  ;;  %v2134_v6 = vand.u32 4294901760, %v2133_v48  ;;  %v2032_v18 = vld [vmem:[#allocation7 + $0x3e0] sm:$0xff] }
 0x179   :  { %2263 = vmatpush.msra.mxu3 %v5573_v11  ;;  %2050 = vperm.xlu1 %4341, %v2032_v18  }
 0x17a   :  { %2082 = vmatpush.msra.mxu0 %v5581_v36  ;;  %2135 = vmatpush.msra.mxu1 %v2134_v6 }
 0x17b   :  { %2214 = vmatpush.msra.mxu2 %v5592_v52  ;;  %2265 = vmatpush.msra.mxu3 %v5581_v36  ;;  %v2109_v52 = vand.u32 4294901760, %v2108_v24  ;;  %v5825_v24 = vand.u32 4294901760, %v2424_v8 }
 0x17c   :  { %2084 = vmatpush.msra.mxu0 %v5589_v34  ;;  %2141 = vmatpush.msra.mxu1 %v2140_v60 }
 0x17d   :  { %2217 = vmatpush.msra.mxu2 %v5609_v1  ;;  %2267 = vmatpush.msra.mxu3 %v5589_v34 }
 0x17e   :  { %2086 = vmatpush.msra.mxu0 %v5606_v54  ;;  %2147 = vmatpush.msra.mxu1 %v2146_v58 }
 0x17f   :  { %2220 = vmatpush.msra.mxu2 %v5618_v3  ;;  %2269 = vmatpush.msra.mxu3 %v5606_v54  ;;  %v2430_v3 = vld [vmem:[#allocation7 + $0x58] sm:$0xff] }
 0x180   :  { %2088 = vmatpush.msra.mxu0 %v5615_v50  ;;  %2153 = vmatpush.msra.mxu1 %v2152_v33 }
 0x181   :  { %2223 = vmatpush.msra.mxu2 %v5636_v41  ;;  %2271 = vmatpush.msra.mxu3 %v5615_v50  ;;  %v2429_v41 = vld [vmem:[#allocation7 + $0x50] sm:$0xff] }
 0x182   :  { %2094 = vmatmul.f32.vlgmr.msra.gmra.mxu0 %v2093_v14  ;;  %2159 = vmatpush.msra.mxu1 %v2158_v44  ;;  %v5764_v21 = vand.u32 4294901760, %v2429_v41  ;;  %v5793_v14 = vand.u32 4294901760, %v2427_v22 }
 0x183   :  { %2308 = vmatpush.msrb.mxu0 %v2132_v57  ;;  %2226 = vmatpush.msra.mxu2 %v5645_v15 }
 0x184   :  { %2165 = vmatpush.msra.mxu1 %v2164_v16  ;;  %2229 = vmatmul.f32.vlgmr.msra.gmra.mxu2 %v5601_v25  ;;  %v5775_v0 = vsub.f32 %v2429_v41, %v5764_v21  ;;  %v5804_v16 = vsub.f32 %v2427_v22, %v5793_v14  ;;  %v2421_v41 = vld [vmem:[#allocation7 + $0x10] sm:$0xff]  ;;  %v2420_v22 = vld [vmem:[#allocation7 + $0x8] sm:$0xff] }
 0x185   :  { %2312 = vmatpush.msrb.mxu0 %v2138_v63  ;;  %2275 = vmatmul.f32.vlgmr.msra.gmra.mxu3 %v2091_v2 }
 0x186   :  { %2171 = vmatpush.msra.mxu1 %v2170_v43  ;;  %v2532_v31 = vand.u32 4294901760, %v5775_v0  ;;  %v2544_v43 = vand.u32 4294901760, %v5804_v16 }
 0x187   :  { %2316 = vmatpush.msrb.mxu0 %v2144_v29 }
 0x188   :  { %2177 = vmatpush.msra.mxu1 %v2176_v56  ;;  %v2545_v18 = vsub.f32 %v5804_v16, %v2544_v43 }
 0x189   :  { %2320 = vmatpush.msrb.mxu0 %v2150_v28  ;;  %2179 = vmatmul.f32.vlgmr.msra.gmra.mxu1 %v5578_v47 }
 0x18a   :  { %2102 = vmatmul.f32.gmra.mxu0 %v2101_v38  ;;  %2363 = vmatpush.msrb.mxu1 %v5586_v51  ;;  %v2433_v51 = vld [vmem:[#allocation7 + $0x70] sm:$0xff] }
 0x18b   :  { %2324 = vmatpush.msrb.mxu0 %v2156_v42  ;;  %v5722_v63 = vand.u32 4294901760, %v2433_v51 }
 0x18c   :  { %2365 = vmatpush.msrb.mxu1 %v5565_v9  ;;  %2234 = vmatmul.f32.gmra.mxu2 %v5655_v7  ;;  %v2116_v9 = vsub.f32 %v2114_v46, %v2115_v40 }
 0x18d   :  { %2328 = vmatpush.msrb.mxu0 %v2162_v27  ;;  %2281 = vmatmul.f32.gmra.mxu3 %v2099_v61  ;;  %v5728_v4 = vsub.f32 %v2433_v51, %v5722_v63  ;;  %v2428_v27 = vld [vmem:[#allocation7 + $0x48] sm:$0xff]  ;;  %v2426_v61 = vld [vmem:[#allocation7 + $0x38] sm:$0xff] }
 0x18e   :  { %2367 = vmatpush.msrb.mxu1 %v5569_v53  ;;  %v2117_v53 = vand.u32 4294901760, %v2116_v9  ;;  %v5777_v7 = vand.u32 4294901760, %v2428_v27  ;;  %v5800_v5 = vand.u32 4294901760, %v2426_v61 }
 0x18f   :  { %2332 = vmatpush.msrb.mxu0 %v2168_v23  ;;  %v2508_v57 = vand.u32 4294901760, %v5728_v4 }
 0x190   :  { %2369 = vmatpush.msrb.mxu1 %v5573_v11  ;;  %v2434_v11 = vld [vmem:[#allocation7 + $0x78] sm:$0xff]  ;;  %v5812_v55 = vsub.f32 %v2426_v61, %v5800_v5 }
 0x191   :  { %2336 = vmatpush.msrb.mxu0 %v2174_v12  ;;  %2183 = vmatmul.f32.gmra.mxu1 %v5631_v13  ;;  %v2509_v48 = vsub.f32 %v5728_v4, %v2508_v57  ;;  %v5786_v12 = vsub.f32 %v2428_v27, %v5777_v7 }
 0x192   :  { %2110 = vmatmul.f32.gmra.mxu0 %v2109_v52  ;;  %2371 = vmatpush.msrb.mxu1 %v5581_v36  ;;  %v5717_v36 = vand.u32 4294901760, %v2434_v11  ;;  %v2423_v52 = vld [vmem:[#allocation7 + $0x20] sm:$0xff] }
 0x193   :  { %v2510_v6 = vand.u32 4294901760, %v2509_v48  ;;  %v2538_v44 = vand.u32 4294901760, %v5786_v12  ;;  %v5845_v51 = vand.u32 4294901760, %v2423_v52 }
 0x194   :  { %2373 = vmatpush.msrb.mxu1 %v5589_v34  ;;  %2239 = vmatmul.f32.gmra.mxu2 %v2106_v32  ;;  %v5720_v34 = vsub.f32 %v2434_v11, %v5717_v36  ;;  %v2546_v11 = vand.u32 4294901760, %v2545_v18 }
 0x195   :  { %2287 = vmatmul.f32.gmra.mxu3 %v2107_v59  ;;  %2436 = vmatpush.msrb.mxu2 %v5717_v36  ;;  %v2539_v32 = vsub.f32 %v5786_v12, %v2538_v44  ;;  %v2550_v59 = vand.u32 4294901760, %v5812_v55  ;;  %v5856_v48 = vsub.f32 %v2423_v52, %v5845_v51 }
 0x196   :  { %2375 = vmatpush.msrb.mxu1 %v5606_v54  ;;  %v2502_v25 = vand.u32 4294901760, %v5720_v34  ;;  %2615 = vmatpush.msra.mxu0 %v5720_v34  ;;  %v2431_v54 = vld [vmem:[#allocation7 + $0x60] sm:$0xff] }
 0x197   :  { %2438 = vmatpush.msrb.mxu2 %v5722_v63  ;;  %v2540_v38 = vand.u32 4294901760, %v2539_v32  ;;  %v2419_v32 = vld [vmem:[#allocation7] sm:$0xff] }
 0x198   :  { %2377 = vmatpush.msrb.mxu1 %v5615_v50  ;;  %v2503_v1 = vsub.f32 %v5720_v34, %v2502_v25  ;;  %2618 = vmatpush.msra.mxu0 %v5728_v4  ;;  %v5743_v50 = vand.u32 4294901760, %v2431_v54 }
 0x199   :  { %2187 = vmatmul.f32.gmra.mxu1 %v5673_v37 }
 0x19a   :  { %2118 = vmatmul.f32.gmra.mxu0 %v2117_v53  ;;  %2683 = vmatpush.msra.mxu1 %v5717_v36  ;;  %v2504_v28 = vand.u32 4294901760, %v2503_v1  ;;  %v5752_v2 = vsub.f32 %v2431_v54, %v5743_v50  ;;  %v5840_v53 = vsub.f32 %v2424_v8, %v5825_v24 }
 0x19c   :  { %2244 = vmatmul.f32.gmra.mxu2 %v2114_v46  ;;  %2685 = vmatpush.msra.mxu1 %v5722_v63  ;;  %v2520_v42 = vand.u32 4294901760, %v5752_v2 }
 0x19d   :  { %2293 = vmatmul.f32.gmra.mxu3 %v2115_v40  ;;  %v2551_v40 = vsub.f32 %v5812_v55, %v2550_v59 }
 0x19e   :  { %2505 = vmatpush.msrb.mxu3 %v2504_v28  ;;  %v2521_v62 = vsub.f32 %v5752_v2, %v2520_v42 }
 0x19f   :  { %v2552_v54 = vand.u32 4294901760, %v2551_v40  ;;  %v5897_v40 = vand.u32 4294901760, %v2419_v32 }
 0x1a0   :  { %2511 = vmatpush.msrb.mxu3 %v2510_v6  ;;  %v2522_v23 = vand.u32 4294901760, %v2521_v62  ;;  %v2568_v62 = vand.u32 4294901760, %v5856_v48 }
 0x1a1   :  { %2191 = vmatmul.f32.gmra.mxu1 %v2113_v49 }
 0x1a2   :  { %2338 = vmatmul.f32.vlgmr.msrb.gmra.mxu0 %v5578_v47 }
 0x1a9   :  { %2379 = vmatmul.f32.vlgmr.msrb.gmra.mxu1 %v5578_v47  ;;  %v2432_v47 = vld [vmem:[#allocation7 + $0x68] sm:$0xff] }
 0x1aa   :  { %2342 = vmatmul.f32.gmra.mxu0 %v5631_v13  ;;  %v5731_v30 = vand.u32 4294901760, %v2432_v47 }
 0x1ac   :  { %v5740_v29 = vsub.f32 %v2432_v47, %v5731_v30  ;;  %2687 = vmatpush.msra.mxu1 %v5731_v30  ;;  %2440 = vmatpush.msrb.mxu2 %v5731_v30  ;;  %v2422_v47 = vld [vmem:[#allocation7 + $0x18] sm:$0xff] }
 0x1ad   :  { %v5851_v28 = vand.u32 4294901760, %v2422_v47 }
 0x1ae   :  { %v2514_v35 = vand.u32 4294901760, %v5740_v29  ;;  %2621 = vmatpush.msra.mxu0 %v5740_v29  ;;  %2689 = vmatpush.msra.mxu1 %v5743_v50 }
 0x1af   :  { %2442 = vmatpush.msrb.mxu2 %v5743_v50  ;;  %v5863_v27 = vsub.f32 %v2422_v47, %v5851_v28 }
 0x1b0   :  { %v2515_v17 = vsub.f32 %v5740_v29, %v2514_v35  ;;  %2624 = vmatpush.msra.mxu0 %v5752_v2 }
 0x1b1   :  { %2383 = vmatmul.f32.gmra.mxu1 %v5631_v13  ;;  %v5756_v13 = vand.u32 4294901760, %v2430_v3  ;;  %v2574_v61 = vand.u32 4294901760, %v5863_v27 }
 0x1b2   :  { %2346 = vmatmul.f32.gmra.mxu0 %v5673_v37  ;;  %v2516_v60 = vand.u32 4294901760, %v2515_v17 }
 0x1b3   :  { %v5767_v15 = vsub.f32 %v2430_v3, %v5756_v13  ;;  %2691 = vmatpush.msra.mxu1 %v5756_v13  ;;  %2444 = vmatpush.msrb.mxu2 %v5756_v13  ;;  %v2562_v3 = vand.u32 4294901760, %v5840_v53  ;;  %v2575_v8 = vsub.f32 %v5863_v27, %v2574_v61 }
 0x1b4   :  { %2517 = vmatpush.msrb.mxu3 %v2516_v60  ;;  %v5865_v60 = vand.u32 4294901760, %v2421_v41 }
 0x1b5   :  { %v2526_v58 = vand.u32 4294901760, %v5767_v15  ;;  %2627 = vmatpush.msra.mxu0 %v5767_v15  ;;  %2693 = vmatpush.msra.mxu1 %v5764_v21  ;;  %v2563_v17 = vsub.f32 %v5840_v53, %v2562_v3  ;;  %v2576_v47 = vand.u32 4294901760, %v2575_v8 }
 0x1b6   :  { %2446 = vmatpush.msrb.mxu2 %v5764_v21  ;;  %2523 = vmatpush.msrb.mxu3 %v2522_v23 }
 0x1b7   :  { %v2527_v33 = vsub.f32 %v5767_v15, %v2526_v58  ;;  %2630 = vmatpush.msra.mxu0 %v5775_v0  ;;  %2695 = vmatpush.msra.mxu1 %v5777_v7 }
 0x1b8   :  { %2448 = vmatpush.msrb.mxu2 %v5777_v7 }
 0x1b9   :  { %2387 = vmatmul.f32.gmra.mxu1 %v5673_v37  ;;  %v2533_v37 = vsub.f32 %v5775_v0, %v2532_v31  ;;  %v2528_v39 = vand.u32 4294901760, %v2527_v33  ;;  %2633 = vmatpush.msra.mxu0 %v5786_v12  ;;  %v2564_v33 = vand.u32 4294901760, %v2563_v17 }
 0x1ba   :  { %2350 = vmatmul.f32.gmra.mxu0 %v2113_v49  ;;  %2697 = vmatpush.msra.mxu1 %v5793_v14 }
 0x1bb   :  { %v2534_v26 = vand.u32 4294901760, %v2533_v37  ;;  %2450 = vmatpush.msrb.mxu2 %v5793_v14  ;;  %2529 = vmatpush.msrb.mxu3 %v2528_v39  ;;  %v5875_v37 = vsub.f32 %v2421_v41, %v5865_v60  ;;  %v5877_v39 = vand.u32 4294901760, %v2420_v22  ;;  %v5906_v41 = vsub.f32 %v2419_v32, %v5897_v40 }
 0x1bc   :  { %2636 = vmatpush.msra.mxu0 %v5804_v16  ;;  %2699 = vmatpush.msra.mxu1 %v5800_v5 }
 0x1bd   :  { %2452 = vmatpush.msrb.mxu2 %v5800_v5  ;;  %2535 = vmatpush.msrb.mxu3 %v2534_v26  ;;  %v2569_v26 = vsub.f32 %v5856_v48, %v2568_v62  ;;  %v5892_v18 = vsub.f32 %v2420_v22, %v5877_v39  ;;  %v2592_v22 = vand.u32 4294901760, %v5906_v41 }
 0x1be   :  { %2639 = vmatpush.msra.mxu0 %v5812_v55  ;;  %2701 = vmatpush.msra.mxu1 %v5814_v19 }
 0x1bf   :  { %2454 = vmatpush.msrb.mxu2 %v5814_v19  ;;  %2541 = vmatpush.msrb.mxu3 %v2540_v38  ;;  %v2580_v38 = vand.u32 4294901760, %v5875_v37  ;;  %v2570_v52 = vand.u32 4294901760, %v2569_v26 }
 0x1c0   :  { %2703 = vmatpush.msra.mxu1 %v5825_v24 }
 0x1c1   :  { %2391 = vmatmul.f32.gmra.mxu1 %v2113_v49  ;;  %v5823_v49 = vsub.f32 %v2425_v20, %v5814_v19  ;;  %2456 = vmatpush.msrb.mxu2 %v5825_v24 }
 0x1c2   :  { %2547 = vmatpush.msrb.mxu3 %v2546_v11  ;;  %2705 = vmatpush.msra.mxu1 %v5845_v51 }
 0x1c3   :  { %v2556_v9 = vand.u32 4294901760, %v5823_v49  ;;  %2642 = vmatpush.msra.mxu0 %v5823_v49  ;;  %2458 = vmatpush.msrb.mxu2 %v5845_v51 }
 0x1c4   :  { %2553 = vmatpush.msrb.mxu3 %v2552_v54  ;;  %2707 = vmatpush.msra.mxu1 %v5851_v28  ;;  %v2581_v54 = vsub.f32 %v5875_v37, %v2580_v38 }
 0x1c5   :  { %v2557_v1 = vsub.f32 %v5823_v49, %v2556_v9  ;;  %2645 = vmatpush.msra.mxu0 %v5840_v53  ;;  %2460 = vmatpush.msrb.mxu2 %v5851_v28 }
 0x1c6   :  { %2709 = vmatpush.msra.mxu1 %v5865_v60 }
 0x1c7   :  { %v2558_v6 = vand.u32 4294901760, %v2557_v1  ;;  %2648 = vmatpush.msra.mxu0 %v5856_v48  ;;  %2462 = vmatpush.msrb.mxu2 %v5865_v60  ;;  %v2036_v11 = vpop.permute.xlu0 %2035  ;;  %v2586_v1 = vand.u32 4294901760, %v5892_v18 }
 0x1c8   :  { %2711 = vmatpush.msra.mxu1 %v5877_v39 }
 0x1c9   :  { %2559 = vmatpush.msrb.mxu3 %v2558_v6  ;;  %2651 = vmatpush.msra.mxu0 %v5863_v27  ;;  %v2582_v6 = vand.u32 4294901760, %v2581_v54  ;;  %v2587_v17 = vsub.f32 %v5892_v18, %v2586_v1  ;;  %v2593_v54 = vsub.f32 %v5906_v41, %v2592_v22 }
 0x1ca   :  { %2464 = vmatpush.msrb.mxu2 %v5877_v39  ;;  %2713 = vmatpush.msra.mxu1 %v5897_v40 }
 0x1cb   :  { %2565 = vmatpush.msrb.mxu3 %v2564_v33  ;;  %2654 = vmatpush.msra.mxu0 %v5875_v37  ;;  %v2588_v32 = vand.u32 4294901760, %v2587_v17 }
 0x1cc   :  { %2466 = vmatpush.msrb.mxu2 %v5897_v40 }
 0x1cd   :  { %2571 = vmatpush.msrb.mxu3 %v2570_v52  ;;  %2657 = vmatpush.msra.mxu0 %v5892_v18 }
 0x1ce   :  { %2742 = vmatpush.msra.mxu2 %v2502_v25 }
 0x1cf   :  { %2577 = vmatpush.msrb.mxu3 %v2576_v47  ;;  %2660 = vmatpush.msra.mxu0 %v5906_v41  ;;  %v2594_v47 = vand.u32 4294901760, %v2593_v54 }
 0x1d0   :  { %2746 = vmatpush.msra.mxu2 %v2508_v57 }
 0x1d1   :  { %2583 = vmatpush.msrb.mxu3 %v2582_v6 }
 0x1d2   :  { %2750 = vmatpush.msra.mxu2 %v2514_v35 }
 0x1d3   :  { %2589 = vmatpush.msrb.mxu3 %v2588_v32 }
 0x1d4   :  { %2754 = vmatpush.msra.mxu2 %v2520_v42 }
 0x1d5   :  { %2595 = vmatpush.msrb.mxu3 %v2594_v47 }
 0x1d6   :  { %2758 = vmatpush.msra.mxu2 %v2526_v58 }
 0x1d7   :  { %2821 = vmatpush.msra.mxu3 %v5717_v36  ;;  %v2046_v36 = vpop.permute.xlu1 %2045 }
 0x1d8   :  { %2762 = vmatpush.msra.mxu2 %v2532_v31 }
 0x1d9   :  { %2823 = vmatpush.msra.mxu3 %v5722_v63 }
 0x1da   :  { %2766 = vmatpush.msra.mxu2 %v2538_v44 }
 0x1db   :  { %2825 = vmatpush.msra.mxu3 %v5731_v30 }
 0x1dc   :  { %2770 = vmatpush.msra.mxu2 %v2544_v43 }
 0x1dd   :  { %2827 = vmatpush.msra.mxu3 %v5743_v50 }
 0x1de   :  { %2774 = vmatpush.msra.mxu2 %v2550_v59 }
 0x1df   :  { %2829 = vmatpush.msra.mxu3 %v5756_v13 }
 0x1e0   :  { %2778 = vmatpush.msra.mxu2 %v2556_v9 }
 0x1e1   :  { %v2041_v25 = vpop.permute.xlu0 %2040  ;;  %2831 = vmatpush.msra.mxu3 %v5764_v21 }
 0x1e2   :  { %2782 = vmatpush.msra.mxu2 %v2562_v3 }
 0x1e3   :  { %2833 = vmatpush.msra.mxu3 %v5777_v7 }
 0x1e4   :  { %2786 = vmatpush.msra.mxu2 %v2568_v62 }
 0x1e5   :  { %2835 = vmatpush.msra.mxu3 %v5793_v14 }
 0x1e6   :  { %2790 = vmatpush.msra.mxu2 %v2574_v61 }
 0x1e7   :  { %2837 = vmatpush.msra.mxu3 %v5800_v5 }
 0x1e8   :  { %2794 = vmatpush.msra.mxu2 %v2580_v38 }
 0x1e9   :  { %2839 = vmatpush.msra.mxu3 %v5814_v19 }
 0x1ea   :  { %2798 = vmatpush.msra.mxu2 %v2586_v1 }
 0x1eb   :  { %v2051_v16 = vpop.permute.xlu1 %2050  ;;  %2841 = vmatpush.msra.mxu3 %v5825_v24 }
 0x1ec   :  { %2802 = vmatpush.msra.mxu2 %v2592_v22 }
 0x1ed   :  { %2843 = vmatpush.msra.mxu3 %v5845_v51 }
 0x1ef   :  { %2845 = vmatpush.msra.mxu3 %v5851_v28 }
 0x1f1   :  { %2847 = vmatpush.msra.mxu3 %v5865_v60 }
 0x1f3   :  { %2849 = vmatpush.msra.mxu3 %v5877_v39 }
 0x1f5   :  { %2851 = vmatpush.msra.mxu3 %v5897_v40 }
 0x1ff   :  { %v5779_v45 = vpop.f32.mrf.mxu0 }
 0x200   :  { %v2096_v8 = vadd.f32 %v5779_v45, %v2036_v11 }
 0x206   :  { %v5819_v56 = vpop.f32.mrf.mxu1 }
 0x207   :  { %v5829_v46 = vpop.f32.mrf.mxu0  ;;  %v2230_v33 = vpop.f32.mrf.mxu2  ;;  %v2181_v34 = vadd.f32 %v5819_v56, %v2096_v8 }
 0x208   :  { %v2276_v10 = vpop.f32.mrf.mxu3  ;;  %v2104_v57 = vadd.f32 %v5829_v46, %v2041_v25 }
 0x209   :  { %v2231_v4 = vadd.f32 %v2230_v33, %v2181_v34 }
 0x20b   :  { %v2277_v63 = vadd.f32 %v2276_v10, %v2231_v4 }
 0x20e   :  { %v5871_v23 = vpop.f32.mrf.mxu1 }
 0x20f   :  { %v5881_v20 = vpop.f32.mrf.mxu0  ;;  %v2235_v35 = vpop.f32.mrf.mxu2  ;;  %v2185_v2 = vadd.f32 %v5871_v23, %v2104_v57 }
 0x210   :  { %v2282_v42 = vpop.f32.mrf.mxu3  ;;  %v2112_v0 = vadd.f32 %v5881_v20, %v2046_v36 }
 0x211   :  { %v2236_v50 = vadd.f32 %v2235_v35, %v2185_v2 }
 0x213   :  { %v2283_v21 = vadd.f32 %v2282_v42, %v2236_v50 }
 0x216   :  { %v2188_v26 = vpop.f32.mrf.mxu1 }
 0x217   :  { %v2119_v52 = vpop.f32.mrf.mxu0  ;;  %v2240_v31 = vpop.f32.mrf.mxu2  ;;  %v2189_v12 = vadd.f32 %v2188_v26, %v2112_v0 }
 0x218   :  { %v2288_v55 = vpop.f32.mrf.mxu3  ;;  %v2120_v56 = vadd.f32 %v2119_v52, %v2051_v16 }
 0x219   :  { %v2241_v14 = vadd.f32 %v2240_v31, %v2189_v12 }
 0x21b   :  { %v2289_v19 = vadd.f32 %v2288_v55, %v2241_v14 }
 0x21e   :  { %v2192_v45 = vpop.f32.mrf.mxu1 }
 0x21f   :  { %v2339_v29 = vpop.f32.mrf.mxu0  ;;  %v2193_v9 = vadd.f32 %v2192_v45, %v2120_v56  ;;  %v2245_v3 = vpop.f32.mrf.mxu2 }
 0x220   :  { %v2340_v15 = vadd.f32 %v2339_v29, %v2277_v63  ;;  %v2294_v37 = vpop.f32.mrf.mxu3 }
 0x221   :  { %v2246_v51 = vadd.f32 %v2245_v3, %v2193_v9 }
 0x223   :  { %v2295_v11 = vadd.f32 %v2294_v37, %v2246_v51 }
 0x226   :  { %v2380_v30 = vpop.f32.mrf.mxu1 }
 0x227   :  { %v2343_v58 = vpop.f32.mrf.mxu0  ;;  %v2381_v10 = vadd.f32 %v2380_v30, %v2340_v15 }
 0x228   :  { %v2344_v7 = vadd.f32 %v2343_v58, %v2283_v21 }
 0x229   :  { %v2399_v13 = vmin.f32 %v2381_v10, 0.0  ;;  %vm2395_vm1 = vcmp.gt.f32.partialorder %v2381_v10, 0.0 }
 0x22b   :  { %v2403_v44 = vmul.f32 1.442695, %v2399_v13 }
 0x22d   :  { %4357 = vpow2.f32 %v2403_v44 }
 0x22e   :  { %v2384_v43 = vpop.f32.mrf.mxu1 }
 0x22f   :  { %v2385_v59 = vadd.f32 %v2384_v43, %v2344_v7  ;;  %v2347_v49 = vpop.f32.mrf.mxu0 }
 0x230   :  { %v2348_v24 = vadd.f32 %v2347_v49, %v2289_v19 }
 0x231   :  { %v2400_v5 = vmin.f32 %v2385_v59, 0.0  ;;  %vm2396_vm2 = vcmp.gt.f32.partialorder %v2385_v59, 0.0 }
 0x233   :  { %v4358_v46 = vpop.eup %4357  ;;  %v2405_v53 = vmul.f32 1.442695, %v2400_v5 }
 0x234   :  { %v4305_v48 = vadd.f32 -1.0, %v4358_v46 }
 0x235   :  { %4359 = vpow2.f32 %v2405_v53 }
 0x236   :  { %v2415_v27 = vsel %vm2395_vm1, %v2381_v10, %v4305_v48  ;;  %v2388_v62 = vpop.f32.mrf.mxu1 }
 0x237   :  { %v5970_v23 = vand.u32 4294901760, %v2415_v27  ;;  %v2389_v61 = vadd.f32 %v2388_v62, %v2348_v24  ;;  %v2351_v38 = vpop.f32.mrf.mxu0 }
 0x238   :  { %v2352_v6 = vadd.f32 %v2351_v38, %v2295_v11 }
 0x239   :  { %v2468_v20 = vsub.f32 %v2415_v27, %v5970_v23  ;;  %v2401_v28 = vmin.f32 %v2389_v61, 0.0  ;;  %2597 = vmatmul.f32.vlgmr.msrb.gmra.mxu3 %v5970_v23  ;;  %vm2397_vm3 = vcmp.gt.f32.partialorder %v2389_v61, 0.0 }
 0x23b   :  { %v4360_v18 = vpop.eup %4359  ;;  %v2407_v1 = vmul.f32 1.442695, %v2401_v28  ;;  %2663 = vmatmul.f32.vlgmr.msra.gmra.mxu0 %v2468_v20  ;;  %v2469_v60 = vand.u32 4294901760, %v2468_v20 }
 0x23c   :  { %v4306_v41 = vadd.f32 -1.0, %v4360_v18 }
 0x23d   :  { %4361 = vpow2.f32 %v2407_v1  ;;  %2717 = vmatmul.f32.vlgmr.msra.gmra.mxu1 %v2469_v60  ;;  %v2470_v17 = vsub.f32 %v2468_v20, %v2469_v60 }
 0x23e   :  { %v2416_v39 = vsel %vm2396_vm2, %v2385_v59, %v4306_v41  ;;  %v2392_v22 = vpop.f32.mrf.mxu1 }
 0x23f   :  { %v2475_v33 = vand.u32 4294901760, %v2416_v39  ;;  %v2393_v26 = vadd.f32 %v2392_v22, %v2352_v6  ;;  %v2471_v32 = vand.u32 4294901760, %v2470_v17 }
 0x241   :  { %v2402_v8 = vmin.f32 %v2393_v26, 0.0  ;;  %2472 = vmatmul.f32.vlgmr.msrb.gmra.mxu2 %v2471_v32  ;;  %2601 = vmatmul.f32.gmra.mxu3 %v2475_v33  ;;  %v2476_v40 = vsub.f32 %v2416_v39, %v2475_v33  ;;  %vm2398_vm4 = vcmp.gt.f32.partialorder %v2393_v26, 0.0 }
 0x243   :  { %v4362_v52 = vpop.eup %4361  ;;  %v2409_v54 = vmul.f32 1.442695, %v2402_v8  ;;  %2668 = vmatmul.f32.gmra.mxu0 %v2476_v40  ;;  %v2477_v47 = vand.u32 4294901760, %v2476_v40 }
 0x244   :  { %v4307_v34 = vadd.f32 -1.0, %v4362_v52 }
 0x245   :  { %4363 = vpow2.f32 %v2409_v54  ;;  %2723 = vmatmul.f32.gmra.mxu1 %v2477_v47  ;;  %v2478_v25 = vsub.f32 %v2476_v40, %v2477_v47 }
 0x246   :  { %v2417_v45 = vsel %vm2397_vm3, %v2389_v61, %v4307_v34  ;;  %v2945_v34 = vld [vmem:[#allocation7 + $0x120] sm:$0xff] }
 0x247   :  { %v2483_v4 = vand.u32 4294901760, %v2417_v45  ;;  %v2479_v57 = vand.u32 4294901760, %v2478_v25  ;;  %v2877_v25 = vld [vmem:[#allocation7 + $0xa0] sm:$0xff] }
 0x249   :  { %2480 = vmatmul.f32.gmra.mxu2 %v2479_v57  ;;  %2605 = vmatmul.f32.gmra.mxu3 %v2483_v4  ;;  %v2484_v29 = vsub.f32 %v2417_v45, %v2483_v4  ;;  %v3025_v57 = vld [vmem:[#allocation7 + $0x1a0] sm:$0xff] }
 0x24b   :  { %v4364_v35 = vpop.eup %4363  ;;  %2673 = vmatmul.f32.gmra.mxu0 %v2484_v29  ;;  %v2485_v36 = vand.u32 4294901760, %v2484_v29 }
 0x24c   :  { %v4308_v63 = vadd.f32 -1.0, %v4364_v35 }
 0x24d   :  { %2729 = vmatmul.f32.gmra.mxu1 %v2485_v36  ;;  %v2486_v2 = vsub.f32 %v2484_v29, %v2485_v36 }
 0x24e   :  { %v2418_v42 = vsel %vm2398_vm4, %v2393_v26, %v4308_v63 }
 0x24f   :  { %v2491_v15 = vand.u32 4294901760, %v2418_v42  ;;  %v2487_v30 = vand.u32 4294901760, %v2486_v2 }
 0x251   :  { %2488 = vmatmul.f32.gmra.mxu2 %v2487_v30  ;;  %2609 = vmatmul.f32.gmra.mxu3 %v2491_v15  ;;  %v2492_v50 = vsub.f32 %v2418_v42, %v2491_v15  ;;  %v2893_v42 = vld [vmem:[#allocation7 + $0xc0] sm:$0xff] }
 0x253   :  { %2678 = vmatmul.f32.gmra.mxu0 %v2492_v50  ;;  %v2493_v0 = vand.u32 4294901760, %v2492_v50 }
 0x255   :  { %2735 = vmatmul.f32.gmra.mxu1 %v2493_v0  ;;  %v2494_v58 = vsub.f32 %v2492_v50, %v2493_v0 }
 0x257   :  { %v2495_v10 = vand.u32 4294901760, %v2494_v58 }
 0x259   :  { %2496 = vmatmul.f32.gmra.mxu2 %v2495_v10  ;;  %2853 = vmatmul.f32.vlgmr.msra.gmra.mxu3 %v5970_v23 }
 0x261   :  { %2804 = vmatmul.f32.vlgmr.msra.gmra.mxu2 %v5970_v23  ;;  %2857 = vmatmul.f32.gmra.mxu3 %v2475_v33 }
 0x269   :  { %2808 = vmatmul.f32.gmra.mxu2 %v2475_v33  ;;  %2861 = vmatmul.f32.gmra.mxu3 %v2483_v4 }
 0x271   :  { %2812 = vmatmul.f32.gmra.mxu2 %v2483_v4  ;;  %2865 = vmatmul.f32.gmra.mxu3 %v2491_v15 }
 0x279   :  { %2816 = vmatmul.f32.gmra.mxu2 %v2491_v15  ;;  %v2965_v15 = vld [vmem:[#allocation7 + $0x140] sm:$0xff] }
 0x2b8   :  { %v2664_v59 = vpop.f32.mrf.mxu0 }
 0x2ba   :  { %v2718_v5 = vpop.f32.mrf.mxu1 }
 0x2bc   :  { %v2598_v13 = vpop.f32.mrf.mxu3 }
 0x2c0   :  { %v2669_v24 = vpop.f32.mrf.mxu0 }
 0x2c2   :  { %v2724_v62 = vpop.f32.mrf.mxu1 }
 0x2c4   :  { %v2473_v31 = vpop.f32.mrf.mxu2  ;;  %v2602_v21 = vpop.f32.mrf.mxu3 }
 0x2c5   :  { %v2599_v55 = vadd.f32 %v2598_v13, %v2473_v31 }
 0x2c7   :  { %v2665_v49 = vadd.f32 %v2664_v59, %v2599_v55  ;;  %v2925_v59 = vld [vmem:[#allocation7 + $0x100] sm:$0xff] }
 0x2c8   :  { %v2674_v28 = vpop.f32.mrf.mxu0 }
 0x2c9   :  { %v2719_v46 = vadd.f32 %v2718_v5, %v2665_v49 }
 0x2ca   :  { %v2730_v18 = vpop.f32.mrf.mxu1 }
 0x2cc   :  { %v2481_v12 = vpop.f32.mrf.mxu2  ;;  %v2606_v44 = vpop.f32.mrf.mxu3 }
 0x2cd   :  { %v2603_v48 = vadd.f32 %v2602_v21, %v2481_v12  ;;  %v3045_v21 = vld [vmem:[#allocation7 + $0x1c0] sm:$0xff] }
 0x2ce   :  { %v2909_v12 = vld [vmem:[#allocation7 + $0xe0] sm:$0xff] }
 0x2cf   :  { %v2670_v27 = vadd.f32 %v2669_v24, %v2603_v48 }
 0x2d0   :  { %v2679_v39 = vpop.f32.mrf.mxu0 }
 0x2d1   :  { %v2725_v23 = vadd.f32 %v2724_v62, %v2670_v27  ;;  %v3085_v27 = vld [vmem:[#allocation7 + $0x200] sm:$0xff] }
 0x2d2   :  { %v2736_v33 = vpop.f32.mrf.mxu1 }
 0x2d4   :  { %v2489_v16 = vpop.f32.mrf.mxu2  ;;  %v2610_v43 = vpop.f32.mrf.mxu3 }
 0x2d5   :  { %v2607_v7 = vadd.f32 %v2606_v44, %v2489_v16  ;;  %v2985_v44 = vld [vmem:[#allocation7 + $0x160] sm:$0xff] }
 0x2d7   :  { %v2675_v38 = vadd.f32 %v2674_v28, %v2607_v7 }
 0x2d9   :  { %v2731_v1 = vadd.f32 %v2730_v18, %v2675_v38  ;;  %v3065_v38 = vld [vmem:[#allocation7 + $0x1e0] sm:$0xff] }
 0x2dc   :  { %v2497_v14 = vpop.f32.mrf.mxu2  ;;  %v2854_v53 = vpop.f32.mrf.mxu3 }
 0x2dd   :  { %v5978_v56 = vadd.f32 %v2610_v43, %v2497_v14 }
 0x2df   :  { %v2680_v22 = vadd.f32 %v2679_v39, %v5978_v56  ;;  %v2894_v39 = vld [vmem:[#allocation7 + $0xc8] sm:$0xff] }
 0x2e1   :  { %v2737_v32 = vadd.f32 %v2736_v33, %v2680_v22  ;;  %v2966_v22 = vld [vmem:[#allocation7 + $0x148] sm:$0xff] }
 0x2e2   :  { %v2946_v33 = vld [vmem:[#allocation7 + $0x128] sm:$0xff] }
 0x2e4   :  { %v2805_v19 = vpop.f32.mrf.mxu2  ;;  %v2858_v37 = vpop.f32.mrf.mxu3 }
 0x2e5   :  { %v2806_v9 = vadd.f32 %v2805_v19, %v2719_v46  ;;  %v2869_v46 = vld [vmem:[#allocation7 + $0x80] sm:$0xff] }
 0x2e7   :  { %v5980_v3 = vadd.f32 %v2854_v53, %v2806_v9  ;;  %v3005_v9 = vld [vmem:[#allocation7 + $0x180] sm:$0xff] }
 0x2e9   :  { %2913 = vrot.lane.b32.xlu0 %v5980_v3, %s4487_s0  ;;  %2897 = vrot.lane.b32.xlu2 %v5980_v3, %s4488_s2  ;;  %v2873_v53 = vmul.f32 %v2869_v46, %v5980_v3 }
 0x2ea   :  { %2881 = vrot.lane.b32.xlu1 %v5980_v3, %s4489_s30 }
 0x2ec   :  { %v2809_v51 = vpop.f32.mrf.mxu2  ;;  %v2862_v41 = vpop.f32.mrf.mxu3 }
 0x2ed   :  { %v2810_v61 = vadd.f32 %v2809_v51, %v2725_v23 }
 0x2ef   :  { %v6000_v20 = vadd.f32 %v2858_v37, %v2810_v61 }
 0x2f1   :  { %2969 = vrot.lane.b32.xlu0 %v5980_v3, %s4490_s4  ;;  %2949 = vrot.lane.b32.xlu2 %v5980_v3, %s4491_s5 }
 0x2f2   :  { %2929 = vrot.lane.b32.xlu1 %v5980_v3, %s4492_s6 }
 0x2f4   :  { %v2813_v11 = vpop.f32.mrf.mxu2  ;;  %v2866_v52 = vpop.f32.mrf.mxu3 }
 0x2f5   :  { %v2814_v60 = vadd.f32 %v2813_v11, %v2731_v1 }
 0x2f7   :  { %v6032_v6 = vadd.f32 %v2862_v41, %v2814_v60 }
 0x2f9   :  { %3049 = vrot.lane.b32.xlu0 %v5980_v3, %s4493_s7  ;;  %3029 = vrot.lane.b32.xlu2 %v5980_v3, %s4494_s8 }
 0x2fa   :  { %2989 = vrot.lane.b32.xlu1 %v5980_v3, %s4495_s9 }
 0x2fc   :  { %v2817_v26 = vpop.f32.mrf.mxu2 }
 0x2fd   :  { %v2818_v8 = vadd.f32 %v2817_v26, %v2737_v32  ;;  %v2878_v26 = vld [vmem:[#allocation7 + $0xa8] sm:$0xff] }
 0x2ff   :  { %v6065_v54 = vadd.f32 %v2866_v52, %v2818_v8 }
 0x301   :  { %3089 = vrot.lane.b32.xlu0 %v5980_v3, %s4496_s10  ;;  %2899 = vrot.lane.b32.xlu2 %v6000_v20, %s4488_s2 }
 0x302   :  { %3009 = vrot.lane.b32.xlu1 %v5980_v3, %s4497_s11 }
 0x309   :  { %2915 = vrot.lane.b32.xlu0 %v6000_v20, %s4487_s0  ;;  %2951 = vrot.lane.b32.xlu2 %v6000_v20, %s4491_s5 }
 0x30a   :  { %3069 = vrot.lane.b32.xlu1 %v5980_v3, %s4498_s12 }
 0x311   :  { %2971 = vrot.lane.b32.xlu0 %v6000_v20, %s4490_s4  ;;  %3011 = vrot.lane.b32.xlu2 %v6000_v20, %s4497_s11 }
 0x312   :  { %2883 = vrot.lane.b32.xlu1 %v6000_v20, %s4489_s30 }
 0x319   :  { %3031 = vrot.lane.b32.xlu0 %v6000_v20, %s4494_s8  ;;  %3071 = vrot.lane.b32.xlu2 %v6000_v20, %s4498_s12 }
 0x31a   :  { %2931 = vrot.lane.b32.xlu1 %v6000_v20, %s4492_s6 }
 0x321   :  { %3111 = vrot.lane.b32.xlu0 %v6000_v20, %s4499_s13  ;;  %3091 = vrot.lane.b32.xlu2 %v6000_v20, %s4496_s10 }
 0x322   :  { %2991 = vrot.lane.b32.xlu1 %v6000_v20, %s4495_s9 }
 0x329   :  { %2901 = vrot.lane.b32.xlu0 %v6032_v6, %s4488_s2  ;;  %3151 = vrot.lane.b32.xlu2 %v6000_v20, %s4500_s14 }
 0x32a   :  { %3051 = vrot.lane.b32.xlu1 %v6000_v20, %s4493_s7 }
 0x331   :  { %2953 = vrot.lane.b32.xlu0 %v6032_v6, %s4491_s5  ;;  %2885 = vrot.lane.b32.xlu2 %v6032_v6, %s4489_s30 }
 0x332   :  { %3131 = vrot.lane.b32.xlu1 %v6000_v20, %s4501_s15 }
 0x339   :  { %3033 = vrot.lane.b32.xlu0 %v6032_v6, %s4494_s8  ;;  %2933 = vrot.lane.b32.xlu2 %v6032_v6, %s4492_s6 }
 0x33a   :  { %2917 = vrot.lane.b32.xlu1 %v6032_v6, %s4487_s0 }
 0x341   :  { %3093 = vrot.lane.b32.xlu0 %v6032_v6, %s4496_s10  ;;  %2993 = vrot.lane.b32.xlu2 %v6032_v6, %s4495_s9 }
 0x342   :  { %2973 = vrot.lane.b32.xlu1 %v6032_v6, %s4490_s4 }
 0x343   :  { %v2898_v17 = vpop.permute.xlu2 %2897 }
 0x344   :  { %v2905_v58 = vmul.f32 %v2898_v17, %v2893_v42  ;;  %v3181_v17 = vld [vmem:[#allocation7 + $0x3e8] sm:$0xff] }
 0x349   :  { %3153 = vrot.lane.b32.xlu0 %v6032_v6, %s4500_s14  ;;  %3013 = vrot.lane.b32.xlu2 %v6032_v6, %s4497_s11 }
 0x34a   :  { %3053 = vrot.lane.b32.xlu1 %v6032_v6, %s4493_s7 }
 0x34b   :  { %v2950_v40 = vpop.permute.xlu2 %2949 }
 0x34c   :  { %v2957_v35 = vmul.f32 %v2950_v40, %v2945_v34 }
 0x351   :  { %3073 = vrot.lane.b32.xlu2 %v6032_v6, %s4498_s12  ;;  %2919 = vrot.lane.b32.xlu0 %v6065_v54, %s4487_s0 }
 0x352   :  { %3113 = vrot.lane.b32.xlu1 %v6032_v6, %s4499_s13 }
 0x353   :  { %v3030_v47 = vpop.permute.xlu2 %3029 }
 0x354   :  { %v3037_v63 = vmul.f32 %v3030_v47, %v3025_v57  ;;  %v3183_v57 = vld [vmem:[#allocation7 + $0x3f8] sm:$0xff] }
 0x359   :  { %3133 = vrot.lane.b32.xlu2 %v6032_v6, %s4501_s15  ;;  %2975 = vrot.lane.b32.xlu0 %v6065_v54, %s4490_s4 }
 0x35a   :  { %2935 = vrot.lane.b32.xlu1 %v6065_v54, %s4492_s6 }
 0x35b   :  { %v2914_v45 = vpop.permute.xlu0 %2913  ;;  %v6079_v4 = vpop.permute.xlu2 %2899 }
 0x35c   :  { %v2882_v29 = vpop.permute.xlu1 %2881  ;;  %v2921_v14 = vmul.f32 %v2914_v45, %v2909_v12  ;;  %v2906_v40 = vmul.f32 %v6079_v4, %v2894_v39  ;;  %v2879_v39 = vld [vmem:[#allocation7 + $0xb0] sm:$0xff] }
 0x35d   :  { %v2889_v36 = vmul.f32 %v2882_v29, %v2877_v25 }
 0x35f   :  { %v2961_v2 = vadd.f32 %v2957_v35, %v2889_v36  ;;  %v3184_v35 = vld [vmem:[#allocation7 + $0x400] sm:$0xff]  ;;  %v3026_v36 = vld [vmem:[#allocation7 + $0x1a8] sm:$0xff] }
 0x361   :  { %3015 = vrot.lane.b32.xlu0 %v6065_v54, %s4497_s11  ;;  %2887 = vrot.lane.b32.xlu2 %v6065_v54, %s4489_s30  ;;  %v6085_v30 = vadd.f32 %v3037_v63, %v2961_v2  ;;  %v2870_v63 = vld [vmem:[#allocation7 + $0x88] sm:$0xff] }
 0x362   :  { %2995 = vrot.lane.b32.xlu1 %v6065_v54, %s4495_s9  ;;  %v2926_v2 = vld [vmem:[#allocation7 + $0x108] sm:$0xff] }
 0x363   :  { %v2970_v50 = vpop.permute.xlu0 %2969  ;;  %v2952_v0 = vpop.permute.xlu2 %2951 }
 0x364   :  { %v2977_v10 = vmul.f32 %v2970_v50, %v2965_v15  ;;  %v2930_v13 = vpop.permute.xlu1 %2929  ;;  %v2958_v34 = vmul.f32 %v2952_v0, %v2946_v33  ;;  %v3006_v50 = vld [vmem:[#allocation7 + $0x188] sm:$0xff]  ;;  %v2874_v0 = vmul.f32 %v2870_v63, %v6000_v20 }
 0x365   :  { %v2937_v19 = vmul.f32 %v2930_v13, %v2925_v59  ;;  %v3086_v13 = vld [vmem:[#allocation7 + $0x208] sm:$0xff] }
 0x366   :  { %v2981_v31 = vadd.f32 %v2977_v10, %v2905_v58  ;;  %v3146_v20 = vld [vmem:[#allocation7 + $0x268] sm:$0xff] }
 0x367   :  { %v2941_v51 = vadd.f32 %v2937_v19, %v2873_v53  ;;  %v3126_v33 = vld [vmem:[#allocation7 + $0x248] sm:$0xff] }
 0x369   :  { %3075 = vrot.lane.b32.xlu0 %v6065_v54, %s4498_s12  ;;  %2903 = vrot.lane.b32.xlu2 %v6065_v54, %s4488_s2 }
 0x36a   :  { %3035 = vrot.lane.b32.xlu1 %v6065_v54, %s4494_s8 }
 0x36b   :  { %v3050_v16 = vpop.permute.xlu0 %3049  ;;  %v6095_v7 = vpop.permute.xlu2 %3011 }
 0x36c   :  { %v3057_v55 = vmul.f32 %v3050_v16, %v3045_v21  ;;  %v2990_v43 = vpop.permute.xlu1 %2989  ;;  %v3018_v21 = vmul.f32 %v6095_v7, %v3006_v50 }
 0x36d   :  { %v2997_v56 = vmul.f32 %v2990_v43, %v2985_v44  ;;  %v2986_v43 = vld [vmem:[#allocation7 + $0x168] sm:$0xff] }
 0x36e   :  { %v6097_v49 = vadd.f32 %v3057_v55, %v2981_v31  ;;  %v2910_v55 = vld [vmem:[#allocation7 + $0xe8] sm:$0xff] }
 0x36f   :  { %v3001_v5 = vadd.f32 %v2997_v56, %v2921_v14 }
 0x371   :  { %3095 = vrot.lane.b32.xlu0 %v6065_v54, %s4496_s10  ;;  %2955 = vrot.lane.b32.xlu2 %v6065_v54, %s4491_s5 }
 0x372   :  { %3115 = vrot.lane.b32.xlu1 %v6065_v54, %s4499_s13 }
 0x373   :  { %v3090_v48 = vpop.permute.xlu0 %3089  ;;  %v6106_v24 = vpop.permute.xlu2 %3071 }
 0x374   :  { %v3010_v62 = vpop.permute.xlu1 %3009  ;;  %v3097_v61 = vmul.f32 %v3090_v48, %v3085_v27 }
 0x375   :  { %v3017_v23 = vmul.f32 %v3010_v62, %v3005_v9 }
 0x377   :  { %v3021_v37 = vadd.f32 %v3017_v23, %v2941_v51 }
 0x379   :  { %v6108_v28 = vadd.f32 %v3097_v61, %v3021_v37  ;;  %3155 = vrot.lane.b32.xlu0 %v6065_v54, %s4500_s14  ;;  %3055 = vrot.lane.b32.xlu2 %v6065_v54, %s4493_s7  ;;  %v3046_v61 = vld [vmem:[#allocation7 + $0x1c8] sm:$0xff] }
 0x37a   :  { %3109 = vrot.lane.b32.xlu1 %v5980_v3, %s4499_s13 }
 0x37b   :  { %v2916_v18 = vpop.permute.xlu0 %2915  ;;  %v3092_v11 = vpop.permute.xlu2 %3091 }
 0x37c   :  { %v3070_v1 = vpop.permute.xlu1 %3069  ;;  %v3098_v44 = vmul.f32 %v3092_v11, %v3086_v13  ;;  %v2922_v9 = vmul.f32 %v2916_v18, %v2910_v55 }
 0x37d   :  { %v3077_v60 = vmul.f32 %v3070_v1, %v3065_v38 }
 0x37f   :  { %v6116_v41 = vadd.f32 %v3077_v60, %v3001_v5  ;;  %v3066_v5 = vld [vmem:[#allocation7 + $0x1e8] sm:$0xff] }
 0x380   :  { %v3078_v27 = vmul.f32 %v6106_v24, %v3066_v5 }
 0x381   :  { %3149 = vrot.lane.b32.xlu0 %v5980_v3, %s4500_s14  ;;  %3135 = vrot.lane.b32.xlu2 %v6065_v54, %s4501_s15 }
 0x382   :  { %3187 = vperm.xlu1 %4341, %v3181_v17  }
 0x383   :  { %v2972_v32 = vpop.permute.xlu0 %2971  ;;  %v3152_v8 = vpop.permute.xlu2 %3151 }
 0x384   :  { %v2978_v52 = vmul.f32 %v2972_v32, %v2966_v22  ;;  %v2884_v47 = vpop.permute.xlu1 %2883  ;;  %v3158_v51 = vmul.f32 %v3152_v8, %v3146_v20  ;;  %v2947_v22 = vld [vmem:[#allocation7 + $0x130] sm:$0xff] }
 0x385   :  { %v2890_v25 = vmul.f32 %v2884_v47, %v2878_v26  ;;  %v3127_v20 = vld [vmem:[#allocation7 + $0x250] sm:$0xff] }
 0x386   :  { %v2982_v45 = vadd.f32 %v2978_v52, %v2906_v40 }
 0x387   :  { %v2962_v29 = vadd.f32 %v2958_v34, %v2890_v25  ;;  %v3027_v25 = vld [vmem:[#allocation7 + $0x1b0] sm:$0xff] }
 0x389   :  { %3197 = vperm.xlu0 %4340, %v3183_v57   ;;  %3129 = vrot.lane.b32.xlu2 %v5980_v3, %s4501_s15  ;;  %v3106_v3 = vld [vmem:[#allocation7 + $0x228] sm:$0xff] }
 0x38a   :  { %3202 = vperm.xlu1 %4341, %v3184_v35  }
 0x38b   :  { %v3032_v42 = vpop.permute.xlu0 %3031  ;;  %v2886_v15 = vpop.permute.xlu2 %2885 }
 0x38c   :  { %v3038_v4 = vmul.f32 %v3032_v42, %v3026_v36  ;;  %v2932_v58 = vpop.permute.xlu1 %2931  ;;  %v2891_v32 = vmul.f32 %v2886_v15, %v2879_v39  ;;  %v2911_v15 = vld [vmem:[#allocation7 + $0xf0] sm:$0xff] }
 0x38d   :  { %v2938_v10 = vmul.f32 %v2932_v58, %v2926_v2  ;;  %v2895_v58 = vld [vmem:[#allocation7 + $0xd0] sm:$0xff] }
 0x38e   :  { %v3042_v31 = vadd.f32 %v3038_v4, %v2962_v29  ;;  %v2967_v4 = vld [vmem:[#allocation7 + $0x150] sm:$0xff] }
 0x38f   :  { %v2942_v12 = vadd.f32 %v2938_v10, %v2874_v0  ;;  %v3047_v0 = vld [vmem:[#allocation7 + $0x1d0] sm:$0xff] }
 0x390   :  { %v2927_v10 = vld [vmem:[#allocation7 + $0x110] sm:$0xff] }
 0x391   :  { %v3022_v16 = vadd.f32 %v3018_v21, %v2942_v12  ;;  %v2987_v21 = vld [vmem:[#allocation7 + $0x170] sm:$0xff] }
 0x393   :  { %v3112_v14 = vpop.permute.xlu0 %3111  ;;  %v3102_v56 = vadd.f32 %v3098_v44, %v3022_v16  ;;  %v2934_v59 = vpop.permute.xlu2 %2933  ;;  %v2871_v44 = vld [vmem:[#allocation7 + $0x90] sm:$0xff] }
 0x394   :  { %v3118_v46 = vmul.f32 %v3112_v14, %v3106_v3  ;;  %v2992_v19 = vpop.permute.xlu1 %2991  ;;  %v2939_v14 = vmul.f32 %v2934_v59, %v2927_v10  ;;  %v3008_v10 = vld [vmem:[#allocation7 + $0x198] sm:$0xff] }
 0x395   :  { %v2998_v53 = vmul.f32 %v2992_v19, %v2986_v43 }
 0x396   :  { %v3122_v48 = vadd.f32 %v3118_v46, %v3042_v31  ;;  %v3067_v46 = vld [vmem:[#allocation7 + $0x1f0] sm:$0xff] }
 0x397   :  { %v3002_v62 = vadd.f32 %v2998_v53, %v2922_v9  ;;  %v2875_v9 = vmul.f32 %v2871_v44, %v6032_v6  ;;  %v3087_v53 = vld [vmem:[#allocation7 + $0x210] sm:$0xff]  ;;  %v3068_v44 = vld [vmem:[#allocation7 + $0x1f8] sm:$0xff] }
 0x398   :  { %v3166_v7 = vadd.f32 %v3122_v48, %v3102_v56  ;;  %v3007_v56 = vld [vmem:[#allocation7 + $0x190] sm:$0xff] }
 0x399   :  { %v3082_v23 = vadd.f32 %v3078_v27, %v3002_v62  ;;  %v3147_v48 = vld [vmem:[#allocation7 + $0x270] sm:$0xff] }
 0x39b   :  { %v2902_v37 = vpop.permute.xlu0 %2901  ;;  %v2994_v38 = vpop.permute.xlu2 %2993  ;;  %v3162_v11 = vadd.f32 %v3158_v51, %v3082_v23  ;;  %v2943_v51 = vadd.f32 %v2939_v14, %v2875_v9  ;;  %v3107_v23 = vld [vmem:[#allocation7 + $0x230] sm:$0xff] }
 0x39c   :  { %v3052_v1 = vpop.permute.xlu1 %3051  ;;  %v2907_v16 = vmul.f32 %v2902_v37, %v2895_v58  ;;  %v2999_v5 = vmul.f32 %v2994_v38, %v2987_v21  ;;  %v2968_v58 = vld [vmem:[#allocation7 + $0x158] sm:$0xff] }
 0x39d   :  { %v3058_v60 = vmul.f32 %v3052_v1, %v3046_v61  ;;  %v2896_v21 = vld [vmem:[#allocation7 + $0xd8] sm:$0xff] }
 0x39f   :  { %v3062_v17 = vadd.f32 %v3058_v60, %v2982_v45 }
 0x3a3   :  { %v2954_v18 = vpop.permute.xlu0 %2953  ;;  %v3014_v26 = vpop.permute.xlu2 %3013 }
 0x3a4   :  { %v2959_v40 = vmul.f32 %v2954_v18, %v2947_v22  ;;  %v3132_v52 = vpop.permute.xlu1 %3131  ;;  %v3019_v27 = vmul.f32 %v3014_v26, %v3007_v56 }
 0x3a5   :  { %v3138_v24 = vmul.f32 %v3132_v52, %v3126_v33 }
 0x3a6   :  { %v2963_v47 = vadd.f32 %v2959_v40, %v2891_v32 }
 0x3a7   :  { %v3142_v34 = vadd.f32 %v3138_v24, %v3062_v17  ;;  %v3023_v17 = vadd.f32 %v3019_v27, %v2943_v51 }
 0x3a9   :  { %v3170_v8 = vadd.f32 %v3162_v11, %v3142_v34 }
 0x3ab   :  { %v6128_v57 = vadd.f32 %v3170_v8, %v3166_v7  ;;  %v3034_v29 = vpop.permute.xlu0 %3033  ;;  %v3074_v35 = vpop.permute.xlu2 %3073 }
 0x3ac   :  { %v3039_v36 = vmul.f32 %v3034_v29, %v3027_v25  ;;  %v2918_v63 = vpop.permute.xlu1 %2917  ;;  %v3079_v61 = vmul.f32 %v3074_v35, %v3067_v46  ;;  %v3088_v46 = vld [vmem:[#allocation7 + $0x218] sm:$0xff] }
 0x3ad   :  { %v2923_v3 = vmul.f32 %v2918_v63, %v2911_v15  ;;  %v2928_v63 = vld [vmem:[#allocation7 + $0x118] sm:$0xff] }
 0x3ae   :  { %v3043_v45 = vadd.f32 %v3039_v36, %v2963_v47 }
 0x3af   :  { %v3003_v62 = vadd.f32 %v2999_v5, %v2923_v3  ;;  %v3108_v5 = vld [vmem:[#allocation7 + $0x238] sm:$0xff] }
 0x3b1   :  { %v3083_v38 = vadd.f32 %v3079_v61, %v3003_v62 }
 0x3b3   :  { %v3094_v2 = vpop.permute.xlu0 %3093  ;;  %v3134_v42 = vpop.permute.xlu2 %3133 }
 0x3b4   :  { %v2974_v50 = vpop.permute.xlu1 %2973  ;;  %v3099_v37 = vmul.f32 %v3094_v2, %v3087_v53  ;;  %v3139_v11 = vmul.f32 %v3134_v42, %v3127_v20  ;;  %v2948_v2 = vld [vmem:[#allocation7 + $0x138] sm:$0xff] }
 0x3b5   :  { %v2979_v13 = vmul.f32 %v2974_v50, %v2967_v4  ;;  %v2872_v42 = vld [vmem:[#allocation7 + $0x98] sm:$0xff] }
 0x3b6   :  { %v3103_v33 = vadd.f32 %v3099_v37, %v3023_v17  ;;  %v2880_v50 = vld [vmem:[#allocation7 + $0xb8] sm:$0xff] }
 0x3b7   :  { %v2983_v19 = vadd.f32 %v2979_v13, %v2907_v16  ;;  %v2912_v4 = vld [vmem:[#allocation7 + $0xf8] sm:$0xff] }
 0x3b8   :  { %v3028_v13 = vld [vmem:[#allocation7 + $0x1b8] sm:$0xff] }
 0x3bb   :  { %v3154_v31 = vpop.permute.xlu0 %3153  ;;  %v2888_v43 = vpop.permute.xlu2 %2887 }
 0x3bc   :  { %v3054_v12 = vpop.permute.xlu1 %3053  ;;  %v3159_v1 = vmul.f32 %v3154_v31, %v3147_v48  ;;  %v2892_v3 = vmul.f32 %v2888_v43, %v2880_v50 }
 0x3bd   :  { %v3059_v55 = vmul.f32 %v3054_v12, %v3047_v0  ;;  %v2988_v0 = vld [vmem:[#allocation7 + $0x178] sm:$0xff] }
 0x3be   :  { %v3163_v6 = vadd.f32 %v3159_v1, %v3083_v38  ;;  %v3048_v12 = vld [vmem:[#allocation7 + $0x1d8] sm:$0xff] }
 0x3bf   :  { %v3063_v7 = vadd.f32 %v3059_v55, %v2983_v19  ;;  %v2876_v55 = vmul.f32 %v2872_v42, %v6065_v54  ;;  %v3177_v19 = vld [vmem:[#allocation7 + $0x2a0] sm:$0xff]  ;;  %v3148_v1 = vld [vmem:[#allocation7 + $0x278] sm:$0xff] }
 0x3c0   :  { %v3207_v54 = vsel %vm3205_vm5, %v3177_v19, 0 }
 0x3c1   :  { %v3143_v39 = vadd.f32 %v3139_v11, %v3063_v7 }
 0x3c3   :  { %v2920_v60 = vpop.permute.xlu0 %2919  ;;  %v2904_v32 = vpop.permute.xlu2 %2903  ;;  %v3171_v40 = vadd.f32 %v3163_v6, %v3143_v39  ;;  %v6135_v6 = vand.u32 4294901760, %v3207_v54 }
 0x3c4   :  { %v3114_v59 = vpop.permute.xlu1 %3113  ;;  %v2924_v9 = vmul.f32 %v2920_v60, %v2912_v4  ;;  %v2908_v27 = vmul.f32 %v2904_v32, %v2896_v21  ;;  %v3105_v60 = vld [vmem:[#allocation7 + $0x220] sm:$0xff]  ;;  %v6145_v4 = vand.u32 4294901760, %v6128_v57 }
 0x3c5   :  { %v3119_v22 = vmul.f32 %v3114_v59, %v3107_v23  ;;  %v3128_v23 = vld [vmem:[#allocation7 + $0x258] sm:$0xff] }
 0x3c7   :  { %v3123_v18 = vadd.f32 %v3119_v22, %v3043_v45 }
 0x3c9   :  { %v3167_v26 = vadd.f32 %v3123_v18, %v3103_v33 }
 0x3cb   :  { %v6131_v52 = vadd.f32 %v3171_v40, %v3167_v26  ;;  %v2976_v24 = vpop.permute.xlu0 %2975  ;;  %v2956_v34 = vpop.permute.xlu2 %2955 }
 0x3cc   :  { %v2936_v47 = vpop.permute.xlu1 %2935  ;;  %v2960_v15 = vmul.f32 %v2956_v34, %v2948_v2  ;;  %v2980_v14 = vmul.f32 %v2976_v24, %v2968_v58  ;;  %v3178_v34 = vld [vmem:[#allocation7 + $0x2a8] sm:$0xff]  ;;  %v6142_v2 = vsub.f32 %v3207_v54, %v6135_v6 }
 0x3cd   :  { %v2940_v45 = vmul.f32 %v2936_v47, %v2928_v63  ;;  %v3210_v58 = vsel %vm3205_vm5, %v3178_v34, 0  ;;  %v3535_v34 = vld [vmem:[#allocation7 + $0x338] sm:$0xff] }
 0x3ce   :  { %v2964_v7 = vadd.f32 %v2960_v15, %v2892_v3  ;;  %v2984_v11 = vadd.f32 %v2980_v14, %v2908_v27  ;;  %v3145_v15 = vld [vmem:[#allocation7 + $0x260] sm:$0xff]  ;;  %v6152_v21 = vand.u32 4294901760, %v3210_v58  ;;  %v3179_v3 = vld [vmem:[#allocation7 + $0x2b0] sm:$0xff] }
 0x3cf   :  { %v2944_v62 = vadd.f32 %v2940_v45, %v2876_v55 }
 0x3d3   :  { %v3016_v8 = vpop.permute.xlu0 %3015  ;;  %v3056_v29 = vpop.permute.xlu2 %3055 }
 0x3d4   :  { %v2996_v25 = vpop.permute.xlu1 %2995  ;;  %v3020_v20 = vmul.f32 %v3016_v8, %v3008_v10  ;;  %v3060_v51 = vmul.f32 %v3056_v29, %v3048_v12  ;;  %v6138_v29 = vand.u32 4294901760, %v6131_v52 }
 0x3d5   :  { %v3000_v53 = vmul.f32 %v2996_v25, %v2988_v0 }
 0x3d6   :  { %v3024_v17 = vadd.f32 %v3020_v20, %v2944_v62  ;;  %v3064_v22 = vadd.f32 %v3060_v51, %v2984_v11 }
 0x3d7   :  { %v3004_v59 = vadd.f32 %v3000_v53, %v2924_v9 }
 0x3db   :  { %v3076_v35 = vpop.permute.xlu0 %3075  ;;  %v3136_v56 = vpop.permute.xlu2 %3135 }
 0x3dc   :  { %v3036_v36 = vpop.permute.xlu1 %3035  ;;  %v3080_v61 = vmul.f32 %v3076_v35, %v3068_v44  ;;  %v3140_v39 = vmul.f32 %v3136_v56, %v3128_v23  ;;  %v3125_v35 = vld [vmem:[#allocation7 + $0x240] sm:$0xff]  ;;  %v3180_v23 = vld [vmem:[#allocation7 + $0x2b8] sm:$0xff] }
 0x3dd   :  { %v3040_v48 = vmul.f32 %v3036_v36, %v3028_v13  ;;  %v3290_v13 = vsub.f32 %v6131_v52, %v6138_v29 }
 0x3de   :  { %v3084_v18 = vadd.f32 %v3080_v61, %v3004_v59  ;;  %v3144_v8 = vadd.f32 %v3140_v39, %v3064_v22  ;;  %v3216_v59 = vsel %vm3205_vm5, %v3180_v23, 0 }
 0x3df   :  { %v3044_v38 = vadd.f32 %v3040_v48, %v2964_v7  ;;  %v3291_v56 = vand.u32 4294901760, %v3290_v13 }
 0x3e1   :  { %v3292_v53 = vsub.f32 %v3290_v13, %v3291_v56 }
 0x3e3   :  { %v3096_v31 = vpop.permute.xlu0 %3095  ;;  %v3130_v36 = vpop.permute.xlu2 %3129  ;;  %v3293_v61 = vand.u32 4294901760, %v3292_v53 }
 0x3e4   :  { %v3116_v16 = vpop.permute.xlu1 %3115  ;;  %v3100_v43 = vmul.f32 %v3096_v31, %v3088_v46  ;;  %v3137_v0 = vmul.f32 %v3130_v36, %v3125_v35 }
 0x3e5   :  { %v3120_v37 = vmul.f32 %v3116_v16, %v3108_v5  ;;  %v3296_v16 = vsub.f32 %v6128_v57, %v6145_v4  ;;  %v3247_v5 = vsub.f32 %v3210_v58, %v6152_v21  ;;  %v3213_v57 = vsel %vm3205_vm5, %v3179_v3, 0 }
 0x3e6   :  { %v3104_v40 = vadd.f32 %v3100_v43, %v3024_v17  ;;  %v3141_v55 = vadd.f32 %v3137_v0, %v6097_v49  ;;  %v3254_v27 = vand.u32 4294901760, %v3213_v57 }
 0x3e7   :  { %v3124_v32 = vadd.f32 %v3120_v37, %v3044_v38  ;;  %v3297_v9 = vand.u32 4294901760, %v3296_v16  ;;  %v3248_v48 = vand.u32 4294901760, %v3247_v5 }
 0x3e8   :  { %v3255_v54 = vsub.f32 %v3213_v57, %v3254_v27 }
 0x3e9   :  { %v3168_v42 = vadd.f32 %v3124_v32, %v3104_v40  ;;  %v3298_v51 = vsub.f32 %v3296_v16, %v3297_v9  ;;  %v3249_v43 = vsub.f32 %v3247_v5, %v3248_v48 }
 0x3ea   :  { %v3256_v39 = vand.u32 4294901760, %v3255_v54 }
 0x3eb   :  { %v3156_v33 = vpop.permute.xlu0 %3155  ;;  %v3299_v11 = vand.u32 4294901760, %v3298_v51  ;;  %v3250_v38 = vand.u32 4294901760, %v3249_v43 }
 0x3ec   :  { %v3110_v26 = vpop.permute.xlu1 %3109  ;;  %v3160_v24 = vmul.f32 %v3156_v33, %v3148_v1  ;;  %v3257_v33 = vsub.f32 %v3255_v54, %v3256_v39 }
 0x3ed   :  { %v3117_v47 = vmul.f32 %v3110_v26, %v3105_v60  ;;  %v3262_v60 = vand.u32 4294901760, %v3216_v59 }
 0x3ee   :  { %v3164_v25 = vadd.f32 %v3160_v24, %v3084_v18  ;;  %v3258_v32 = vand.u32 4294901760, %v3257_v33  ;;  %v3182_v24 = vld [vmem:[#allocation7 + $0x3f0] sm:$0xff] }
 0x3ef   :  { %v3121_v63 = vadd.f32 %v3117_v47, %v6085_v30  ;;  %v3240_v30 = vand.u32 4294901760, %v6142_v2  ;;  %v3263_v18 = vsub.f32 %v3216_v59, %v3262_v60  ;;  %3192 = vperm.xlu2 %4342, %v3182_v24   ;;  %v3525_v59 = vld [vmem:[#allocation7 + $0x2e8] sm:$0xff] }
 0x3f0   :  { %v3172_v50 = vadd.f32 %v3164_v25, %v3144_v8  ;;  %v6175_v8 = vand.u32 4294901760, %v3535_v34  ;;  %v3534_v25 = vld [vmem:[#allocation7 + $0x330] sm:$0xff]  ;;  %v6285_v33 = vand.u32 4294901760, %v3525_v59 }
 0x3f1   :  { %v3165_v45 = vadd.f32 %v3121_v63, %v6108_v28  ;;  %v3241_v52 = vsub.f32 %v6142_v2, %v3240_v30  ;;  %v3264_v40 = vand.u32 4294901760, %v3263_v18  ;;  %v6180_v35 = vand.u32 4294901760, %v3534_v25 }
 0x3f2   :  { %v3176_v10 = vadd.f32 %v3172_v50, %v3168_v42  ;;  %v3532_v42 = vld [vmem:[#allocation7 + $0x320] sm:$0xff]  ;;  %v6297_v24 = vsub.f32 %v3525_v59, %v6285_v33 }
 0x3f3   :  { %v3150_v31 = vpop.permute.xlu0 %3149  ;;  %v3242_v20 = vand.u32 4294901760, %v3241_v52  ;;  %v3265_v26 = vsub.f32 %v3263_v18, %v3264_v40  ;;  %v6186_v63 = vsub.f32 %v3534_v25, %v6180_v35  ;;  %v3523_v25 = vld [vmem:[#allocation7 + $0x2d8] sm:$0xff] }
 0x3f4   :  { %v3157_v12 = vmul.f32 %v3150_v31, %v3145_v15  ;;  %v3230_v44 = vand.u32 4294901760, %v3176_v10  ;;  %v3531_v15 = vld [vmem:[#allocation7 + $0x318] sm:$0xff] }
 0x3f5   :  { %v3266_v47 = vand.u32 4294901760, %v3265_v26 }
 0x3f6   :  { %v3161_v28 = vadd.f32 %v3157_v12, %v6116_v41  ;;  %3231 = vmatpush.msrb.mxu0 %v3230_v44  ;;  %3382 = vmatpush.msrb.mxu3 %v3230_v44  ;;  %v3284_v14 = vsub.f32 %v3176_v10, %v3230_v44 }
 0x3f8   :  { %v3169_v46 = vadd.f32 %v3161_v28, %v3141_v55  ;;  %3233 = vmatpush.msrb.mxu0 %v6138_v29  ;;  %3338 = vmatpush.msrb.mxu2 %v3284_v14  ;;  %v3285_v19 = vand.u32 4294901760, %v3284_v14  ;;  %v3529_v28 = vld [vmem:[#allocation7 + $0x308] sm:$0xff] }
 0x3f9   :  { %3384 = vmatpush.msrb.mxu3 %v6138_v29 }
 0x3fa   :  { %v3173_v49 = vadd.f32 %v3169_v46, %v3165_v45  ;;  %3235 = vmatpush.msrb.mxu0 %v6145_v4  ;;  %3341 = vmatpush.msrb.mxu2 %v3290_v13  ;;  %v3286_v41 = vsub.f32 %v3284_v14, %v3285_v19  ;;  %v6201_v45 = vand.u32 4294901760, %v3532_v42  ;;  %v6237_v46 = vand.u32 4294901760, %v3529_v28 }
 0x3fb   :  { %3386 = vmatpush.msrb.mxu3 %v6145_v4 }
 0x3fc   :  { %3344 = vmatpush.msrb.mxu2 %v3296_v16  ;;  %v3236_v62 = vand.u32 4294901760, %v3173_v49  ;;  %v3287_v7 = vand.u32 4294901760, %v3286_v41  ;;  %v6210_v31 = vsub.f32 %v3532_v42, %v6201_v45  ;;  %v6244_v41 = vsub.f32 %v3529_v28, %v6237_v46 }
 0x3fd   :  { %v3663_v42 = vand.u32 4294901760, %v6297_v24 }
 0x3fe   :  { %3237 = vmatpush.msrb.mxu0 %v3236_v62  ;;  %3288 = vmatpush.msrb.mxu1 %v3287_v7  ;;  %v3302_v37 = vsub.f32 %v3173_v49, %v3236_v62  ;;  %v3621_v16 = vand.u32 4294901760, %v6210_v31 }
 0x3ff   :  { %3388 = vmatpush.msrb.mxu3 %v3236_v62  ;;  %3243 = vmatmul.f32.vlgmr.msrb.gmra.mxu0 %v3242_v20 }
 0x400   :  { %3429 = vmatpush.msra.mxu0 %v3285_v19  ;;  %3294 = vmatpush.msrb.mxu1 %v3293_v61  ;;  %v3303_v1 = vand.u32 4294901760, %v3302_v37  ;;  %v3622_v52 = vsub.f32 %v6210_v31, %v3621_v16  ;;  %v3526_v61 = vld [vmem:[#allocation7 + $0x2f0] sm:$0xff] }
 0x401   :  { %3347 = vmatpush.msrb.mxu2 %v3302_v37  ;;  %3392 = vmatmul.f32.vlgmr.msrb.gmra.mxu3 %v3240_v30  ;;  %v6214_v30 = vand.u32 4294901760, %v3531_v15 }
 0x402   :  { %3433 = vmatpush.msra.mxu0 %v3291_v56  ;;  %3300 = vmatpush.msrb.mxu1 %v3299_v11  ;;  %v3304_v17 = vsub.f32 %v3302_v37, %v3303_v1  ;;  %v3623_v57 = vand.u32 4294901760, %v3622_v52  ;;  %v3521_v52 = vld [vmem:[#allocation7 + $0x2c8] sm:$0xff] }
 0x403   :  { %3350 = vmatmul.f32.vlgmr.msrb.gmra.mxu2 %v6142_v2  ;;  %v6225_v55 = vsub.f32 %v3531_v15, %v6214_v30  ;;  %v6309_v15 = vand.u32 4294901760, %v3523_v25 }
 0x404   :  { %3437 = vmatpush.msra.mxu0 %v3297_v9  ;;  %v3305_v22 = vand.u32 4294901760, %v3304_v17  ;;  %3537 = vmatpush.msra.mxu2 %v6175_v8  ;;  %v3528_v9 = vld [vmem:[#allocation7 + $0x300] sm:$0xff] }
 0x405   :  { %v3627_v19 = vand.u32 4294901760, %v6225_v55  ;;  %v6246_v53 = vand.u32 4294901760, %v3528_v9 }
 0x406   :  { %3441 = vmatpush.msra.mxu0 %v3303_v1  ;;  %3306 = vmatpush.msrb.mxu1 %v3305_v22  ;;  %v6275_v1 = vand.u32 4294901760, %v3526_v61 }
 0x407   :  { %3251 = vmatmul.f32.gmra.mxu0 %v3250_v38  ;;  %3308 = vmatmul.f32.vlgmr.msrb.gmra.mxu1 %v6135_v6  ;;  %v3628_v20 = vsub.f32 %v6225_v55, %v3627_v19  ;;  %v6259_v7 = vsub.f32 %v3528_v9, %v6246_v53 }
 0x408   :  { %3472 = vmatpush.msra.mxu1 %v3230_v44  ;;  %3539 = vmatpush.msra.mxu2 %v6180_v35 }
 0x409   :  { %3398 = vmatmul.f32.gmra.mxu3 %v3248_v48  ;;  %v3527_v48 = vld [vmem:[#allocation7 + $0x2f8] sm:$0xff]  ;;  %v3629_v23 = vand.u32 4294901760, %v3628_v20 }
 0x40a   :  { %3474 = vmatpush.msra.mxu1 %v6138_v29  ;;  %v6178_v29 = vsub.f32 %v3535_v34, %v6175_v8  ;;  %v6261_v51 = vand.u32 4294901760, %v3527_v48 }
 0x40b   :  { %3355 = vmatmul.f32.gmra.mxu2 %v3247_v5 }
 0x40c   :  { %3476 = vmatpush.msra.mxu1 %v6145_v4  ;;  %v3603_v36 = vand.u32 4294901760, %v6178_v29  ;;  %3716 = vmatpush.msrb.mxu0 %v6178_v29  ;;  %v3609_v4 = vand.u32 4294901760, %v6186_v63  ;;  %v6271_v11 = vsub.f32 %v3527_v48, %v6261_v51 }
 0x40e   :  { %3478 = vmatpush.msra.mxu1 %v3236_v62  ;;  %v3604_v50 = vsub.f32 %v6178_v29, %v3603_v36  ;;  %3719 = vmatpush.msrb.mxu0 %v6186_v63  ;;  %v3610_v10 = vsub.f32 %v6186_v63, %v3609_v4  ;;  %v3639_v62 = vand.u32 4294901760, %v6244_v41  ;;  %v3651_v22 = vand.u32 4294901760, %v6271_v11 }
 0x40f   :  { %3259 = vmatmul.f32.gmra.mxu0 %v3258_v32  ;;  %3312 = vmatmul.f32.gmra.mxu1 %v6152_v21  ;;  %v3524_v32 = vld [vmem:[#allocation7 + $0x2e0] sm:$0xff] }
 0x410   :  { %3784 = vmatpush.msrb.mxu1 %v6175_v8  ;;  %v3605_v0 = vand.u32 4294901760, %v3604_v50  ;;  %v3611_v12 = vand.u32 4294901760, %v3610_v10  ;;  %v3640_v43 = vsub.f32 %v6244_v41, %v3639_v62  ;;  %v3652_v26 = vsub.f32 %v6271_v11, %v3651_v22  ;;  %v3522_v10 = vld [vmem:[#allocation7 + $0x2d0] sm:$0xff] }
 0x411   :  { %3404 = vmatmul.f32.gmra.mxu3 %v3256_v39  ;;  %v6324_v28 = vand.u32 4294901760, %v3522_v10 }
 0x412   :  { %3786 = vmatpush.msrb.mxu1 %v6180_v35  ;;  %3606 = vmatpush.msra.mxu3 %v3605_v0  ;;  %v3641_v39 = vand.u32 4294901760, %v3640_v43 }
 0x413   :  { %3360 = vmatmul.f32.gmra.mxu2 %v3255_v54  ;;  %v3645_v54 = vand.u32 4294901760, %v6259_v7 }
 0x414   :  { %3612 = vmatpush.msra.mxu3 %v3611_v12 }
 0x417   :  { %3267 = vmatmul.f32.gmra.mxu0 %v3266_v47  ;;  %3316 = vmatmul.f32.gmra.mxu1 %v3254_v27  ;;  %v6299_v47 = vand.u32 4294901760, %v3524_v32 }
 0x419   :  { %3410 = vmatmul.f32.gmra.mxu3 %v3264_v40  ;;  %v6307_v50 = vsub.f32 %v3524_v32, %v6299_v47 }
 0x41b   :  { %3365 = vmatmul.f32.gmra.mxu2 %v3263_v18  ;;  %v6290_v18 = vsub.f32 %v3526_v61, %v6275_v1  ;;  %v3669_v12 = vand.u32 4294901760, %v6307_v50  ;;  %v6343_v61 = vand.u32 4294901760, %v3521_v52 }
 0x41d   :  { %v3657_v34 = vand.u32 4294901760, %v6290_v18  ;;  %v3670_v48 = vsub.f32 %v6307_v50, %v3669_v12  ;;  %v6354_v32 = vsub.f32 %v3521_v52, %v6343_v61 }
 0x41f   :  { %3320 = vmatmul.f32.gmra.mxu1 %v3262_v60  ;;  %3443 = vmatmul.f32.vlgmr.msra.gmra.mxu0 %v6135_v6  ;;  %v3658_v0 = vsub.f32 %v6290_v18, %v3657_v34  ;;  %v3671_v43 = vand.u32 4294901760, %v3670_v48 }
 0x427   :  { %3447 = vmatmul.f32.gmra.mxu0 %v6152_v21  ;;  %3480 = vmatmul.f32.vlgmr.msra.gmra.mxu1 %v6135_v6  ;;  %v3533_v6 = vld [vmem:[#allocation7 + $0x328] sm:$0xff] }
 0x428   :  { %v6189_v2 = vand.u32 4294901760, %v3533_v6 }
 0x42a   :  { %v6198_v58 = vsub.f32 %v3533_v6, %v6189_v2  ;;  %3788 = vmatpush.msrb.mxu1 %v6189_v2  ;;  %3541 = vmatpush.msra.mxu2 %v6189_v2  ;;  %v3653_v6 = vand.u32 4294901760, %v3652_v26 }
 0x42c   :  { %v3615_v13 = vand.u32 4294901760, %v6198_v58  ;;  %3722 = vmatpush.msrb.mxu0 %v6198_v58  ;;  %3790 = vmatpush.msrb.mxu1 %v6201_v45 }
 0x42d   :  { %3543 = vmatpush.msra.mxu2 %v6201_v45 }
 0x42e   :  { %v3616_v44 = vsub.f32 %v6198_v58, %v3615_v13  ;;  %3725 = vmatpush.msrb.mxu0 %v6210_v31  ;;  %3792 = vmatpush.msrb.mxu1 %v6214_v30 }
 0x42f   :  { %3451 = vmatmul.f32.gmra.mxu0 %v3254_v27  ;;  %3484 = vmatmul.f32.gmra.mxu1 %v6152_v21  ;;  %v3530_v21 = vld [vmem:[#allocation7 + $0x310] sm:$0xff] }
 0x430   :  { %v6222_v3 = vand.u32 4294901760, %v3530_v21  ;;  %3545 = vmatpush.msra.mxu2 %v6214_v30  ;;  %v3617_v56 = vand.u32 4294901760, %v3616_v44  ;;  %3728 = vmatpush.msrb.mxu0 %v6225_v55  ;;  %v6322_v44 = vsub.f32 %v3523_v25, %v6309_v15 }
 0x432   :  { %v6235_v5 = vsub.f32 %v3530_v21, %v6222_v3  ;;  %3794 = vmatpush.msrb.mxu1 %v6222_v3  ;;  %3618 = vmatpush.msra.mxu3 %v3617_v56  ;;  %v3664_v21 = vsub.f32 %v6297_v24, %v3663_v42  ;;  %v3659_v56 = vand.u32 4294901760, %v3658_v0 }
 0x433   :  { %3547 = vmatpush.msra.mxu2 %v6222_v3 }
 0x434   :  { %v3633_v49 = vand.u32 4294901760, %v6235_v5  ;;  %3731 = vmatpush.msrb.mxu0 %v6235_v5  ;;  %3796 = vmatpush.msrb.mxu1 %v6237_v46  ;;  %v3665_v20 = vand.u32 4294901760, %v3664_v21 }
 0x435   :  { %3624 = vmatpush.msra.mxu3 %v3623_v57  ;;  %3549 = vmatpush.msra.mxu2 %v6237_v46 }
 0x436   :  { %3734 = vmatpush.msrb.mxu0 %v6244_v41  ;;  %3798 = vmatpush.msrb.mxu1 %v6246_v53 }
 0x437   :  { %3455 = vmatmul.f32.gmra.mxu0 %v3262_v60  ;;  %3488 = vmatmul.f32.gmra.mxu1 %v3254_v27  ;;  %v3634_v27 = vsub.f32 %v6235_v5, %v3633_v49 }
 0x438   :  { %3551 = vmatpush.msra.mxu2 %v6246_v53  ;;  %3630 = vmatpush.msra.mxu3 %v3629_v23  ;;  %v6338_v23 = vsub.f32 %v3522_v10, %v6324_v28 }
 0x439   :  { %v3635_v37 = vand.u32 4294901760, %v3634_v27  ;;  %3737 = vmatpush.msrb.mxu0 %v6259_v7  ;;  %3800 = vmatpush.msrb.mxu1 %v6261_v51  ;;  %v3675_v27 = vand.u32 4294901760, %v6322_v44 }
 0x43a   :  { %3553 = vmatpush.msra.mxu2 %v6261_v51 }
 0x43b   :  { %3636 = vmatpush.msra.mxu3 %v3635_v37  ;;  %3740 = vmatpush.msrb.mxu0 %v6271_v11  ;;  %v3520_v37 = vld [vmem:[#allocation7 + $0x2c0] sm:$0xff]  ;;  %v3676_v59 = vsub.f32 %v6322_v44, %v3675_v27 }
 0x43c   :  { %3802 = vmatpush.msrb.mxu1 %v6275_v1  ;;  %3555 = vmatpush.msra.mxu2 %v6275_v1 }
 0x43d   :  { %3642 = vmatpush.msra.mxu3 %v3641_v39  ;;  %3743 = vmatpush.msrb.mxu0 %v6290_v18  ;;  %v3681_v39 = vand.u32 4294901760, %v6338_v23 }
 0x43e   :  { %3804 = vmatpush.msrb.mxu1 %v6285_v33  ;;  %3557 = vmatpush.msra.mxu2 %v6285_v33 }
 0x43f   :  { %3492 = vmatmul.f32.gmra.mxu1 %v3262_v60  ;;  %v3646_v60 = vsub.f32 %v6259_v7, %v3645_v54  ;;  %3746 = vmatpush.msrb.mxu0 %v6297_v24  ;;  %v3682_v26 = vsub.f32 %v6338_v23, %v3681_v39 }
 0x440   :  { %3806 = vmatpush.msrb.mxu1 %v6299_v47  ;;  %3559 = vmatpush.msra.mxu2 %v6299_v47 }
 0x441   :  { %v3647_v40 = vand.u32 4294901760, %v3646_v60  ;;  %3749 = vmatpush.msrb.mxu0 %v6307_v50  ;;  %v6349_v60 = vand.u32 4294901760, %v3520_v37  ;;  %v3683_v0 = vand.u32 4294901760, %v3682_v26 }
 0x442   :  { %3808 = vmatpush.msrb.mxu1 %v6309_v15  ;;  %3561 = vmatpush.msra.mxu2 %v6309_v15 }
 0x443   :  { %3648 = vmatpush.msra.mxu3 %v3647_v40  ;;  %3752 = vmatpush.msrb.mxu0 %v6322_v44  ;;  %v3677_v40 = vand.u32 4294901760, %v3676_v59  ;;  %v6361_v25 = vsub.f32 %v3520_v37, %v6349_v60 }
 0x444   :  { %3810 = vmatpush.msrb.mxu1 %v6324_v28  ;;  %3563 = vmatpush.msra.mxu2 %v6324_v28 }
 0x445   :  { %3654 = vmatpush.msra.mxu3 %v3653_v6  ;;  %3755 = vmatpush.msrb.mxu0 %v6338_v23  ;;  %v6466_v6 = vand.u32 4294901760, %v6354_v32  ;;  %v6467_v10 = vand.u32 4294901760, %v6361_v25 }
 0x446   :  { %3812 = vmatpush.msrb.mxu1 %v6343_v61  ;;  %3565 = vmatpush.msra.mxu2 %v6343_v61 }
 0x447   :  { %3660 = vmatpush.msra.mxu3 %v3659_v56  ;;  %3758 = vmatpush.msrb.mxu0 %v6354_v32  ;;  %v3688_v56 = vsub.f32 %v6354_v32, %v6466_v6  ;;  %v3694_v48 = vsub.f32 %v6361_v25, %v6467_v10 }
 0x448   :  { %3814 = vmatpush.msrb.mxu1 %v6349_v60  ;;  %3567 = vmatpush.msra.mxu2 %v6349_v60 }
 0x449   :  { %3666 = vmatpush.msra.mxu3 %v3665_v20  ;;  %3761 = vmatpush.msrb.mxu0 %v6361_v25  ;;  %v3689_v37 = vand.u32 4294901760, %v3688_v56  ;;  %v3695_v59 = vand.u32 4294901760, %v3694_v48  ;;  %v3193_v10 = vpop.permute.xlu2 %3192 }
 0x44a   :  { %3843 = vmatpush.msrb.mxu2 %v3603_v36 }
 0x44b   :  { %3672 = vmatpush.msra.mxu3 %v3671_v43  ;;  %v3188_v43 = vpop.permute.xlu1 %3187 }
 0x44c   :  { %3847 = vmatpush.msrb.mxu2 %v3609_v4 }
 0x44d   :  { %3678 = vmatpush.msra.mxu3 %v3677_v40 }
 0x44e   :  { %3851 = vmatpush.msrb.mxu2 %v3615_v13 }
 0x44f   :  { %3684 = vmatpush.msra.mxu3 %v3683_v0 }
 0x450   :  { %3855 = vmatpush.msrb.mxu2 %v3621_v16 }
 0x451   :  { %3690 = vmatpush.msra.mxu3 %v3689_v37 }
 0x452   :  { %3859 = vmatpush.msrb.mxu2 %v3627_v19 }
 0x453   :  { %3696 = vmatpush.msra.mxu3 %v3695_v59  ;;  %v3203_v11 = vpop.permute.xlu1 %3202 }
 0x454   :  { %3863 = vmatpush.msrb.mxu2 %v3633_v49 }
 0x455   :  { %3922 = vmatpush.msrb.mxu3 %v6175_v8 }
 0x456   :  { %3867 = vmatpush.msrb.mxu2 %v3639_v62 }
 0x457   :  { %3924 = vmatpush.msrb.mxu3 %v6180_v35 }
 0x458   :  { %3871 = vmatpush.msrb.mxu2 %v3645_v54 }
 0x459   :  { %3926 = vmatpush.msrb.mxu3 %v6189_v2 }
 0x45a   :  { %3875 = vmatpush.msrb.mxu2 %v3651_v22  ;;  %v6468_v22 = vand.u32 4294901760, %v6354_v32 }
 0x45b   :  { %3928 = vmatpush.msrb.mxu3 %v6201_v45 }
 0x45c   :  { %3879 = vmatpush.msrb.mxu2 %v3657_v34 }
 0x45d   :  { %3930 = vmatpush.msrb.mxu3 %v6214_v30 }
 0x45e   :  { %3883 = vmatpush.msrb.mxu2 %v3663_v42 }
 0x45f   :  { %3932 = vmatpush.msrb.mxu3 %v6222_v3 }
 0x460   :  { %3887 = vmatpush.msrb.mxu2 %v3669_v12 }
 0x461   :  { %3934 = vmatpush.msrb.mxu3 %v6237_v46 }
 0x462   :  { %3891 = vmatpush.msrb.mxu2 %v3675_v27 }
 0x463   :  { %3936 = vmatpush.msrb.mxu3 %v6246_v53 }
 0x464   :  { %3895 = vmatpush.msrb.mxu2 %v3681_v39 }
 0x465   :  { %3938 = vmatpush.msrb.mxu3 %v6261_v51 }
 0x466   :  { %3899 = vmatpush.msrb.mxu2 %v6468_v22 }
 0x467   :  { %3940 = vmatpush.msrb.mxu3 %v6275_v1 }
 0x469   :  { %3942 = vmatpush.msrb.mxu3 %v6285_v33  ;;  %v6469_v33 = vand.u32 4294901760, %v6361_v25 }
 0x46b   :  { %3944 = vmatpush.msrb.mxu3 %v6299_v47  ;;  %3903 = vmatpush.msrb.mxu2 %v6469_v33 }
 0x46d   :  { %3946 = vmatpush.msrb.mxu3 %v6309_v15 }
 0x46f   :  { %3948 = vmatpush.msrb.mxu3 %v6324_v28 }
 0x471   :  { %3950 = vmatpush.msrb.mxu3 %v6343_v61 }
 0x473   :  { %3952 = vmatpush.msrb.mxu3 %v6349_v60 }
 0x47c   :  { %v6229_v14 = vpop.f32.mrf.mxu0 }
 0x47d   :  { %v3245_v40 = vadd.f32 %v6229_v14, %v3188_v43  ;;  %v3198_v14 = vpop.permute.xlu0 %3197 }
 0x484   :  { %v6277_v17 = vpop.f32.mrf.mxu0  ;;  %v6279_v38 = vpop.f32.mrf.mxu1 }
 0x485   :  { %v3393_v26 = vpop.f32.mrf.mxu3  ;;  %v3310_v6 = vadd.f32 %v6279_v38, %v3245_v40  ;;  %v3253_v4 = vadd.f32 %v6277_v17, %v3193_v10 }
 0x486   :  { %v3351_v21 = vpop.f32.mrf.mxu2 }
 0x487   :  { %v3352_v63 = vadd.f32 %v3351_v21, %v3310_v6 }
 0x489   :  { %v3394_v8 = vadd.f32 %v3393_v26, %v3352_v63 }
 0x48c   :  { %v6329_v9 = vpop.f32.mrf.mxu0  ;;  %v6331_v57 = vpop.f32.mrf.mxu1 }
 0x48d   :  { %v3314_v35 = vadd.f32 %v6331_v57, %v3253_v4  ;;  %v3399_v13 = vpop.f32.mrf.mxu3  ;;  %v3261_v30 = vadd.f32 %v6329_v9, %v3198_v14 }
 0x48e   :  { %v3356_v58 = vpop.f32.mrf.mxu2 }
 0x48f   :  { %v3357_v45 = vadd.f32 %v3356_v58, %v3314_v35 }
 0x491   :  { %v3400_v3 = vadd.f32 %v3399_v13, %v3357_v45 }
 0x494   :  { %v6374_v52 = vpop.f32.mrf.mxu0  ;;  %v3317_v20 = vpop.f32.mrf.mxu1 }
 0x495   :  { %v3318_v49 = vadd.f32 %v3317_v20, %v3261_v30  ;;  %v3405_v62 = vpop.f32.mrf.mxu3  ;;  %v3269_v51 = vadd.f32 %v6374_v52, %v3203_v11 }
 0x496   :  { %v3361_v19 = vpop.f32.mrf.mxu2 }
 0x497   :  { %v3362_v53 = vadd.f32 %v3361_v19, %v3318_v49 }
 0x499   :  { %v3406_v18 = vadd.f32 %v3405_v62, %v3362_v53 }
 0x49c   :  { %v3321_v29 = vpop.f32.mrf.mxu1  ;;  %v3444_v36 = vpop.f32.mrf.mxu0 }
 0x49d   :  { %v3445_v31 = vadd.f32 %v3444_v36, %v3394_v8  ;;  %v3322_v24 = vadd.f32 %v3321_v29, %v3269_v51  ;;  %v3411_v23 = vpop.f32.mrf.mxu3 }
 0x49e   :  { %v3366_v42 = vpop.f32.mrf.mxu2 }
 0x49f   :  { %v3367_v47 = vadd.f32 %v3366_v42, %v3322_v24 }
 0x4a1   :  { %v3412_v6 = vadd.f32 %v3411_v23, %v3367_v47 }
 0x4a4   :  { %v3448_v16 = vpop.f32.mrf.mxu0  ;;  %v3481_v2 = vpop.f32.mrf.mxu1 }
 0x4a5   :  { %v3482_v55 = vadd.f32 %v3481_v2, %v3445_v31  ;;  %v3449_v46 = vadd.f32 %v3448_v16, %v3400_v3 }
 0x4a7   :  { %v3500_v5 = vmin.f32 %v3482_v55, 0.0  ;;  %vm3496_vm6 = vcmp.gt.f32.partialorder %v3482_v55, 0.0 }
 0x4a9   :  { %v3504_v41 = vmul.f32 1.442695, %v3500_v5 }
 0x4ab   :  { %4365 = vpow2.f32 %v3504_v41 }
 0x4ac   :  { %v3485_v7 = vpop.f32.mrf.mxu1  ;;  %v3452_v17 = vpop.f32.mrf.mxu0 }
 0x4ad   :  { %v3486_v54 = vadd.f32 %v3485_v7, %v3449_v46  ;;  %v3453_v12 = vadd.f32 %v3452_v17, %v3406_v18  ;;  %v4502_v46 = vmov 1  }
 0x4ae   :  { %4343 = vset.pattern.permute.xlu1 %v4502_v46 }
 0x4af   :  { %v3501_v38 = vmin.f32 %v3486_v54, 0.0  ;;  %vm3497_vm7 = vcmp.gt.f32.partialorder %v3486_v54, 0.0 }
 0x4b1   :  { %v4366_v1 = vpop.eup %4365  ;;  %v3506_v34 = vmul.f32 1.442695, %v3501_v38 }
 0x4b2   :  { %v4309_v50 = vadd.f32 -1.0, %v4366_v1 }
 0x4b3   :  { %4367 = vpow2.f32 %v3506_v34 }
 0x4b4   :  { %v3516_v44 = vsel %vm3496_vm6, %v3482_v55, %v4309_v50  ;;  %v3489_v9 = vpop.f32.mrf.mxu1  ;;  %v3456_v32 = vpop.f32.mrf.mxu0 }
 0x4b5   :  { %v6431_v57 = vand.u32 4294901760, %v3516_v44  ;;  %v3490_v27 = vadd.f32 %v3489_v9, %v3453_v12  ;;  %v3457_v56 = vadd.f32 %v3456_v32, %v3412_v6  ;;  %v6470_v6 = vmov 0  }
 0x4b7   :  { %v3569_v39 = vsub.f32 %v3516_v44, %v6431_v57  ;;  %v3502_v15 = vmin.f32 %v3490_v27, 0.0  ;;  %3698 = vmatmul.f32.vlgmr.msra.gmra.mxu3 %v6431_v57  ;;  %vm3498_vm8 = vcmp.gt.f32.partialorder %v3490_v27, 0.0 }
 0x4b9   :  { %v4368_v25 = vpop.eup %4367  ;;  %v3570_v0 = vand.u32 4294901760, %v3569_v39  ;;  %v3508_v10 = vmul.f32 1.442695, %v3502_v15  ;;  %3764 = vmatmul.f32.vlgmr.msrb.gmra.mxu0 %v3569_v39 }
 0x4ba   :  { %v4310_v28 = vadd.f32 -1.0, %v4368_v25 }
 0x4bb   :  { %v3571_v21 = vsub.f32 %v3569_v39, %v3570_v0  ;;  %4369 = vpow2.f32 %v3508_v10  ;;  %3818 = vmatmul.f32.vlgmr.msrb.gmra.mxu1 %v3570_v0 }
 0x4bc   :  { %v3517_v61 = vsel %vm3497_vm7, %v3486_v54, %v4310_v28  ;;  %v3493_v52 = vpop.f32.mrf.mxu1 }
 0x4bd   :  { %v3572_v20 = vand.u32 4294901760, %v3571_v21  ;;  %v3576_v48 = vand.u32 4294901760, %v3517_v61  ;;  %v3494_v37 = vadd.f32 %v3493_v52, %v3457_v56 }
 0x4bf   :  { %v3503_v43 = vmin.f32 %v3494_v37, 0.0  ;;  %3573 = vmatmul.f32.vlgmr.msra.gmra.mxu2 %v3572_v20  ;;  %3702 = vmatmul.f32.gmra.mxu3 %v3576_v48  ;;  %v3577_v60 = vsub.f32 %v3517_v61, %v3576_v48  ;;  %vm3499_vm9 = vcmp.gt.f32.partialorder %v3494_v37, 0.0 }
 0x4c1   :  { %v4370_v59 = vpop.eup %4369  ;;  %v3510_v40 = vmul.f32 1.442695, %v3503_v43  ;;  %3769 = vmatmul.f32.gmra.mxu0 %v3577_v60  ;;  %v3578_v26 = vand.u32 4294901760, %v3577_v60 }
 0x4c2   :  { %v4311_v29 = vadd.f32 -1.0, %v4370_v59 }
 0x4c3   :  { %4371 = vpow2.f32 %v3510_v40  ;;  %3824 = vmatmul.f32.gmra.mxu1 %v3578_v26  ;;  %v3579_v36 = vsub.f32 %v3577_v60, %v3578_v26 }
 0x4c4   :  { %v3518_v63 = vsel %vm3498_vm8, %v3490_v27, %v4311_v29  ;;  %v4504_v29 = vmov 3  }
 0x4c5   :  { %v3584_v4 = vand.u32 4294901760, %v3518_v63  ;;  %v3580_v58 = vand.u32 4294901760, %v3579_v36 }
 0x4c7   :  { %3581 = vmatmul.f32.gmra.mxu2 %v3580_v58  ;;  %3706 = vmatmul.f32.gmra.mxu3 %v3584_v4  ;;  %v3585_v8 = vsub.f32 %v3518_v63, %v3584_v4 }
 0x4c9   :  { %v4372_v35 = vpop.eup %4371  ;;  %3774 = vmatmul.f32.gmra.mxu0 %v3585_v8  ;;  %v3586_v13 = vand.u32 4294901760, %v3585_v8 }
 0x4ca   :  { %v4312_v31 = vadd.f32 -1.0, %v4372_v35 }
 0x4cb   :  { %3830 = vmatmul.f32.gmra.mxu1 %v3586_v13  ;;  %v3587_v16 = vsub.f32 %v3585_v8, %v3586_v13 }
 0x4cc   :  { %v3519_v2 = vsel %vm3499_vm9, %v3494_v37, %v4312_v31 }
 0x4cd   :  { %v3592_v45 = vand.u32 4294901760, %v3519_v2  ;;  %v3588_v55 = vand.u32 4294901760, %v3587_v16 }
 0x4cf   :  { %3589 = vmatmul.f32.gmra.mxu2 %v3588_v55  ;;  %3710 = vmatmul.f32.gmra.mxu3 %v3592_v45  ;;  %v3593_v14 = vsub.f32 %v3519_v2, %v3592_v45  ;;  %v3972_v55 = vld [vmem:[#allocation7 + $0x350] sm:$0xff] }
 0x4d1   :  { %3779 = vmatmul.f32.gmra.mxu0 %v3593_v14  ;;  %v3594_v30 = vand.u32 4294901760, %v3593_v14 }
 0x4d3   :  { %3836 = vmatmul.f32.gmra.mxu1 %v3594_v30  ;;  %v3595_v5 = vsub.f32 %v3593_v14, %v3594_v30  ;;  %v3971_v14 = vld [vmem:[#allocation7 + $0x348] sm:$0xff]  ;;  %v4000_v30 = vld [vmem:[#allocation7 + $0x370] sm:$0xff] }
 0x4d5   :  { %v3596_v19 = vand.u32 4294901760, %v3595_v5  ;;  %v4028_v5 = vld [vmem:[#allocation7 + $0x390] sm:$0xff] }
 0x4d7   :  { %3597 = vmatmul.f32.gmra.mxu2 %v3596_v19  ;;  %3954 = vmatmul.f32.vlgmr.msrb.gmra.mxu3 %v6431_v57 }
 0x4df   :  { %3905 = vmatmul.f32.vlgmr.msrb.gmra.mxu2 %v6431_v57  ;;  %3958 = vmatmul.f32.gmra.mxu3 %v3576_v48 }
 0x4e7   :  { %3909 = vmatmul.f32.gmra.mxu2 %v3576_v48  ;;  %3962 = vmatmul.f32.gmra.mxu3 %v3584_v4  ;;  %v4503_v48 = vmov 2  }
 0x4ef   :  { %3913 = vmatmul.f32.gmra.mxu2 %v3584_v4  ;;  %3966 = vmatmul.f32.gmra.mxu3 %v3592_v45 }
 0x4f7   :  { %3917 = vmatmul.f32.gmra.mxu2 %v3592_v45  ;;  %v3999_v45 = vld [vmem:[#allocation7 + $0x368] sm:$0xff] }
 0x536   :  { %v3765_v11 = vpop.f32.mrf.mxu0 }
 0x538   :  { %v3819_v51 = vpop.f32.mrf.mxu1 }
 0x53a   :  { %v3699_v3 = vpop.f32.mrf.mxu3 }
 0x53e   :  { %v3770_v18 = vpop.f32.mrf.mxu0 }
 0x540   :  { %v3825_v33 = vpop.f32.mrf.mxu1 }
 0x542   :  { %v3574_v49 = vpop.f32.mrf.mxu2  ;;  %v3703_v41 = vpop.f32.mrf.mxu3 }
 0x543   :  { %v3700_v17 = vadd.f32 %v3699_v3, %v3574_v49  ;;  %v4056_v49 = vld [vmem:[#allocation7 + $0x3b0] sm:$0xff] }
 0x545   :  { %v3766_v22 = vadd.f32 %v3765_v11, %v3700_v17  ;;  %v4082_v17 = vld [vmem:[#allocation7 + $0x3c0] sm:$0x3] }
 0x546   :  { %v3775_v27 = vpop.f32.mrf.mxu0 }
 0x547   :  { %v3820_v34 = vadd.f32 %v3819_v51, %v3766_v22 }
 0x548   :  { %v3831_v25 = vpop.f32.mrf.mxu1 }
 0x54a   :  { %v3582_v62 = vpop.f32.mrf.mxu2  ;;  %v3707_v7 = vpop.f32.mrf.mxu3 }
 0x54b   :  { %v3704_v24 = vadd.f32 %v3703_v41, %v3582_v62 }
 0x54d   :  { %v3771_v12 = vadd.f32 %v3770_v18, %v3704_v24  ;;  %v4001_v18 = vld [vmem:[#allocation7 + $0x378] sm:$0xff] }
 0x54e   :  { %v3780_v61 = vpop.f32.mrf.mxu0 }
 0x54f   :  { %v3826_v57 = vadd.f32 %v3825_v33, %v3771_v12  ;;  %v3973_v33 = vld [vmem:[#allocation7 + $0x358] sm:$0xff] }
 0x550   :  { %v3837_v37 = vpop.f32.mrf.mxu1 }
 0x552   :  { %v3590_v53 = vpop.f32.mrf.mxu2  ;;  %v3711_v54 = vpop.f32.mrf.mxu3 }
 0x553   :  { %v3708_v47 = vadd.f32 %v3707_v7, %v3590_v53  ;;  %v4027_v53 = vld [vmem:[#allocation7 + $0x388] sm:$0xff] }
 0x555   :  { %v3776_v15 = vadd.f32 %v3775_v27, %v3708_v47  ;;  %v4029_v47 = vld [vmem:[#allocation7 + $0x398] sm:$0xff] }
 0x557   :  { %v3832_v10 = vadd.f32 %v3831_v25, %v3776_v15  ;;  %v3970_v25 = vld [vmem:[#allocation7 + $0x340] sm:$0xff] }
 0x55a   :  { %v3598_v38 = vpop.f32.mrf.mxu2  ;;  %v3955_v1 = vpop.f32.mrf.mxu3 }
 0x55b   :  { %v3712_v0 = vadd.f32 %v3711_v54, %v3598_v38  ;;  %v4055_v54 = vld [vmem:[#allocation7 + $0x3a8] sm:$0xff] }
 0x55d   :  { %v3781_v52 = vadd.f32 %v3780_v61, %v3712_v0 }
 0x55f   :  { %v3838_v43 = vadd.f32 %v3837_v37, %v3781_v52 }
 0x562   :  { %v3906_v42 = vpop.f32.mrf.mxu2  ;;  %v3959_v9 = vpop.f32.mrf.mxu3 }
 0x563   :  { %v3907_v50 = vadd.f32 %v3906_v42, %v3820_v34 }
 0x565   :  { %v3956_v44 = vadd.f32 %v3955_v1, %v3907_v50  ;;  %v4086_v50 = vsel %vm3205_vm5, %v4082_v17, 0 }
 0x567   :  { %4003 = vperm.xlu1 %4343, %v3956_v44   ;;  %3976 = vperm.xlu0 %4340, %v3956_v44  }
 0x56a   :  { %v3910_v23 = vpop.f32.mrf.mxu2  ;;  %v3963_v28 = vpop.f32.mrf.mxu3 }
 0x56b   :  { %v3911_v39 = vadd.f32 %v3910_v23, %v3826_v57  ;;  %v6442_v57 = vand.u32 4294901760, %v4086_v50 }
 0x56d   :  { %v3960_v32 = vadd.f32 %v3959_v9, %v3911_v39  ;;  %v4057_v39 = vld [vmem:[#allocation7 + $0x3b8] sm:$0xff] }
 0x56f   :  { %3981 = vperm.xlu2 %4342, %v3960_v32   ;;  %4344 = vset.pattern.permute.xlu0 %v4502_v46 }
 0x570   :  { %4007 = vperm.xlu0 %4344, %v3960_v32   ;;  %4346 = vset.pattern.permute.xlu1 %v6470_v6 }
 0x572   :  { %v3914_v21 = vpop.f32.mrf.mxu2  ;;  %v3967_v40 = vpop.f32.mrf.mxu3 }
 0x573   :  { %v3915_v56 = vadd.f32 %v3914_v21, %v3832_v10 }
 0x575   :  { %v3964_v20 = vadd.f32 %v3963_v28, %v3915_v56  ;;  %v4109_v28 = vsub.f32 %v4086_v50, %v6442_v57  ;;  %v4026_v56 = vld [vmem:[#allocation7 + $0x380] sm:$0xff] }
 0x577   :  { %4345 = vset.pattern.permute.xlu2 %v4503_v48  ;;  %3986 = vperm.xlu1 %4346, %v3964_v20  }
 0x578   :  { %4035 = vperm.xlu2 %4345, %v3960_v32  }
 0x57a   :  { %v3918_v60 = vpop.f32.mrf.mxu2 }
 0x57b   :  { %v3919_v59 = vadd.f32 %v3918_v60, %v3838_v43 }
 0x57d   :  { %v3968_v26 = vadd.f32 %v3967_v40, %v3919_v59  ;;  %v4110_v40 = vand.u32 4294901760, %v4109_v28 }
 0x57f   :  { %4348 = vset.pattern.permute.xlu1 %v4503_v48  ;;  %4015 = vperm.xlu0 %4344, %v3968_v26  }
 0x580   :  { %4347 = vset.pattern.permute.xlu2 %v4502_v46  ;;  %4039 = vperm.xlu1 %4348, %v3964_v20  }
 0x581   :  { %4011 = vperm.xlu2 %4347, %v3964_v20  }
 0x587   :  { %4354 = vset.pattern.permute.xlu0 %v4504_v29 }
 0x588   :  { %4349 = vset.pattern.permute.xlu1 %v4504_v29  ;;  %4063 = vperm.xlu0 %4354, %v3960_v32   ;;  %v3998_v32 = vld [vmem:[#allocation7 + $0x360] sm:$0xff] }
 0x589   :  { %4350 = vset.pattern.permute.xlu2 %v6470_v6  ;;  %4067 = vperm.xlu1 %4349, %v3964_v20  }
 0x58a   :  { %3991 = vperm.xlu2 %4350, %v3968_v26  }
 0x591   :  { %4351 = vset.pattern.permute.xlu1 %v4503_v48 }
 0x592   :  { %4043 = vperm.xlu1 %4351, %v3968_v26   ;;  %4352 = vset.pattern.permute.xlu2 %v4504_v29 }
 0x593   :  { %4071 = vperm.xlu2 %4352, %v3968_v26  }
 0x59a   :  { %4355 = vset.pattern.permute.xlu1 %v4504_v29  ;;  %v4054_v29 = vld [vmem:[#allocation7 + $0x3a0] sm:$0xff] }
 0x59b   :  { %4059 = vperm.xlu1 %4355, %v3956_v44   ;;  %4353 = vset.pattern.permute.xlu2 %v4503_v48 }
 0x59c   :  { %4031 = vperm.xlu2 %4353, %v3956_v44  }
 0x5c9   :  { %v3982_v36 = vpop.permute.xlu2 %3981 }
 0x5ca   :  { %v3995_v41 = vmul.f32 %v3982_v36, %v3971_v14 }
 0x5d2   :  { %v4036_v63 = vpop.permute.xlu2 %4035 }
 0x5d3   :  { %v4047_v24 = vmul.f32 %v4036_v63, %v4027_v53 }
 0x5d9   :  { %v3977_v4 = vpop.permute.xlu0 %3976  ;;  %v4004_v58 = vpop.permute.xlu1 %4003 }
 0x5da   :  { %v4018_v48 = vmul.f32 %v4004_v58, %v3998_v32  ;;  %v3994_v37 = vmul.f32 %v3977_v4, %v3970_v25 }
 0x5db   :  { %v4012_v8 = vpop.permute.xlu2 %4011 }
 0x5dc   :  { %v4020_v46 = vmul.f32 %v4012_v8, %v4000_v30  ;;  %v4022_v63 = vadd.f32 %v4018_v48, %v3994_v37 }
 0x5e2   :  { %v4008_v13 = vpop.permute.xlu0 %4007 }
 0x5e3   :  { %v4019_v19 = vmul.f32 %v4008_v13, %v3999_v45 }
 0x5e4   :  { %v3992_v2 = vpop.permute.xlu2 %3991 }
 0x5e5   :  { %v4023_v51 = vadd.f32 %v4019_v19, %v3995_v41  ;;  %v3997_v27 = vmul.f32 %v3992_v2, %v3973_v33  ;;  %v4111_v2 = vsub.f32 %v4109_v28, %v4110_v40 }
 0x5e7   :  { %v4051_v44 = vadd.f32 %v4047_v24, %v4023_v51 }
 0x5e9   :  { %v3987_v35 = vpop.permute.xlu1 %3986 }
 0x5ea   :  { %v3996_v3 = vmul.f32 %v3987_v35, %v3972_v55 }
 0x5ec   :  { %v4024_v38 = vadd.f32 %v4020_v46, %v3996_v3 }
 0x5ed   :  { %v4072_v22 = vpop.permute.xlu2 %4071 }
 0x5ee   :  { %v4077_v21 = vmul.f32 %v4072_v22, %v4057_v39 }
 0x5f1   :  { %v4016_v31 = vpop.permute.xlu0 %4015 }
 0x5f2   :  { %v4040_v16 = vpop.permute.xlu1 %4039  ;;  %v4021_v12 = vmul.f32 %v4016_v31, %v4001_v18 }
 0x5f3   :  { %v4048_v62 = vmul.f32 %v4040_v16, %v4028_v5  ;;  %v4112_v5 = vand.u32 4294901760, %v4111_v2 }
 0x5f4   :  { %v4025_v6 = vadd.f32 %v4021_v12, %v3997_v27 }
 0x5f5   :  { %v4052_v34 = vadd.f32 %v4048_v62, %v4024_v38 }
 0x5f6   :  { %v4032_v61 = vpop.permute.xlu2 %4031 }
 0x5f7   :  { %v4046_v59 = vmul.f32 %v4032_v61, %v4026_v56 }
 0x5f9   :  { %v4050_v31 = vadd.f32 %v4046_v59, %v4022_v63 }
 0x5fa   :  { %v4064_v11 = vpop.permute.xlu0 %4063 }
 0x5fb   :  { %v4068_v7 = vpop.permute.xlu1 %4067  ;;  %v4075_v42 = vmul.f32 %v4064_v11, %v4055_v54  ;;  %v4356_v54 = vld [vmem:[#allocation7 + $0x408] ss:$0 sm:$0xff] }
 0x5fc   :  { %v4076_v1 = vmul.f32 %v4068_v7, %v4056_v49 }
 0x5fd   :  { %v4079_v23 = vadd.f32 %v4075_v42, %v4051_v44 }
 0x5fe   :  { %v4080_v9 = vadd.f32 %v4076_v1, %v4052_v34 }
 0x5ff   :  { %v4104_v52 = vand.u32 4294901760, %v4079_v23 }
 0x600   :  { %v6444_v0 = vand.u32 4294901760, %v4080_v9 }
 0x601   :  { %v4142_v36 = vsub.f32 %v4079_v23, %v4104_v52 }
 0x602   :  { %v4136_v60 = vsub.f32 %v4080_v9, %v6444_v0 }
 0x603   :  { %v4143_v58 = vand.u32 4294901760, %v4142_v36 }
 0x604   :  { %v4044_v15 = vpop.permute.xlu1 %4043  ;;  %v4137_v13 = vand.u32 4294901760, %v4136_v60 }
 0x605   :  { %v4049_v10 = vmul.f32 %v4044_v15, %v4029_v47  ;;  %v4144_v3 = vsub.f32 %v4142_v36, %v4143_v58 }
 0x606   :  { %v4138_v14 = vsub.f32 %v4136_v60, %v4137_v13 }
 0x607   :  { %v4053_v20 = vadd.f32 %v4049_v10, %v4025_v6  ;;  %v4145_v62 = vand.u32 4294901760, %v4144_v3 }
 0x608   :  { %v4139_v41 = vand.u32 4294901760, %v4138_v14 }
 0x609   :  { %v4081_v43 = vadd.f32 %v4077_v21, %v4053_v20 }
 0x60b   :  { %v4100_v26 = vand.u32 4294901760, %v4081_v43 }
 0x60d   :  { %v4130_v8 = vsub.f32 %v4081_v43, %v4100_v26  ;;  %v4060_v35 = vpop.permute.xlu1 %4059  ;;  %4101 = vmatpush.msra.mxu0 %v4100_v26  ;;  %4201 = vmatpush.msra.mxu3 %v4100_v26 }
 0x60e   :  { %v4074_v16 = vmul.f32 %v4060_v35, %v4054_v29 }
 0x60f   :  { %4103 = vmatpush.msra.mxu0 %v6444_v0  ;;  %4172 = vmatpush.msra.mxu2 %v4130_v8  ;;  %v4131_v4 = vand.u32 4294901760, %v4130_v8 }
 0x610   :  { %v4078_v45 = vadd.f32 %v4074_v16, %v4050_v31  ;;  %4203 = vmatpush.msra.mxu3 %v6444_v0 }
 0x611   :  { %4105 = vmatpush.msra.mxu0 %v4104_v52  ;;  %4175 = vmatpush.msra.mxu2 %v4136_v60  ;;  %v4132_v55 = vsub.f32 %v4130_v8, %v4131_v4 }
 0x612   :  { %v4106_v30 = vand.u32 4294901760, %v4078_v45  ;;  %4205 = vmatpush.msra.mxu3 %v4104_v52 }
 0x613   :  { %4178 = vmatpush.msra.mxu2 %v4142_v36  ;;  %v4133_v19 = vand.u32 4294901760, %v4132_v55 }
 0x614   :  { %4107 = vmatpush.msra.mxu0 %v4106_v30  ;;  %4207 = vmatpush.msra.mxu3 %v4106_v30  ;;  %v4148_v49 = vsub.f32 %v4078_v45, %v4106_v30 }
 0x615   :  { %4134 = vmatpush.msra.mxu1 %v4133_v19  ;;  %4113 = vmatmul.f32.vlgmr.msra.gmra.mxu0 %v4112_v5 }
 0x616   :  { %4230 = vmatpush.msrb.mxu0 %v4131_v4  ;;  %4181 = vmatpush.msra.mxu2 %v4148_v49  ;;  %v4149_v46 = vand.u32 4294901760, %v4148_v49 }
 0x617   :  { %4140 = vmatpush.msra.mxu1 %v4139_v41  ;;  %4184 = vmatmul.f32.vlgmr.msra.gmra.mxu2 %v4109_v28 }
 0x618   :  { %4234 = vmatpush.msrb.mxu0 %v4137_v13  ;;  %4211 = vmatmul.f32.vlgmr.msra.gmra.mxu3 %v4110_v40  ;;  %v4150_v7 = vsub.f32 %v4148_v49, %v4149_v46 }
 0x619   :  { %4146 = vmatpush.msra.mxu1 %v4145_v62 }
 0x61a   :  { %4238 = vmatpush.msrb.mxu0 %v4143_v58  ;;  %v4151_v53 = vand.u32 4294901760, %v4150_v7 }
 0x61c   :  { %4242 = vmatpush.msrb.mxu0 %v4149_v46  ;;  %4152 = vmatpush.msra.mxu1 %v4151_v53 }
 0x61d   :  { %4154 = vmatmul.f32.vlgmr.msra.gmra.mxu1 %v6442_v57  ;;  %4244 = vmatmul.f32.vlgmr.msrb.gmra.mxu0 %v6442_v57 }
 0x61e   :  { %4261 = vmatpush.msrb.mxu1 %v4100_v26 }
 0x620   :  { %4263 = vmatpush.msrb.mxu1 %v6444_v0 }
 0x622   :  { %4265 = vmatpush.msrb.mxu1 %v4104_v52 }
 0x624   :  { %4267 = vmatpush.msrb.mxu1 %v4106_v30 }
 0x625   :  { %4269 = vmatmul.f32.vlgmr.msrb.gmra.mxu1 %v6442_v57 }
 0x692   :  { %v4114_v11 = vpop.f32.mrf.mxu0 }
 0x693   :  { %v4115_v17 = vadd.f32 %v4356_v54, %v4114_v11 }
 0x69a   :  { %v4155_v51 = vpop.f32.mrf.mxu1  ;;  %v4185_v22 = vpop.f32.mrf.mxu2 }
 0x69b   :  { %v4156_v38 = vadd.f32 %v4155_v51, %v4115_v17  ;;  %v4212_v1 = vpop.f32.mrf.mxu3  ;;  %v4245_v24 = vpop.f32.mrf.mxu0 }
 0x69d   :  { %v4186_v18 = vadd.f32 %v4185_v22, %v4156_v38 }
 0x69f   :  { %v4213_v34 = vadd.f32 %v4212_v1, %v4186_v18 }
 0x6a1   :  { %v4246_v42 = vadd.f32 %v4245_v24, %v4213_v34 }
 0x6a2   :  { %v4270_v50 = vpop.f32.mrf.mxu1 }
 0x6a3   :  { %v4271_v33 = vadd.f32 %v4270_v50, %v4246_v42 }
 0x6a5   :  { %v4274_v12 = vsel %vm4273_vm10, %v4271_v33, -inf }
 0x6a6   :  { %4275 = vmax.xlane.f32.xlu2 %v4274_v12 }
 0x719   :  { %v4276_v44 = vpop.xlane.xlu2 %4275 }
 0x71a   :  { %v4277_v9 = vsub.f32 %v4271_v33, %v4276_v44 }
 0x71c   :  { %v4278_v47 = vmul.f32 1.442695, %v4277_v9 }
 0x71e   :  { %4373 = vpow2.f32 %v4278_v47 }
 0x724   :  { %v4374_v57 = vpop.eup %4373 }
 0x725   :  { %v4280_v27 = vsel %vm4273_vm10, %v4374_v57, 0.0 }
 0x726   :  { %4281 = vadd.xlane.f32.xlu1 %v4280_v27 }
 0x799   :  { %v4282_v23 = vpop.xlane.xlu1 %4281 }
 0x79a   :  { %4375 = vlog2.f32 %v4282_v23 }
 0x7a0   :  { %v4376_v39 = vpop.eup %4375 }
 0x7a1   :  { %v4284_v15 = vmul.f32 0.6931472, %v4376_v39 }
 0x7a3   :  { %v4285_v32 = vsub.f32 %v4277_v9, %v4284_v15 }
 0x7a5   :  { %4286 = vst.msk [vmem:[#allocation8] sm:$0x3] %vm4273_vm10, %v4285_v32 }
 0x7a6   :  { %4297 = dma.vmem_to_hbm [thread:$0]  %s4293_s17, 32, %s4295_s20, [#allocation4]  }
 0x7a7   :  { %4477 = dma.done.wait [#allocation4], 32  }
 0x7a8   :  { %4478 = vsyncadd [#allocation4], 4294967264 }
 0x7a9   :  { %4302 = vsyncpa [#allocation3], 1 }
 0x7aa   :  { %4303 = vsyncpa [#allocation6], 1 }
 0x7ab   :  { %4304 = vsyncpa [#allocation4], 1 }

</bundles_post_ra>
